<compile_context>
chip_gen: v7x
topology: tpu7x:2x2x1
jax: 0.10.0
libtpu: 0.0.40
codegen_flags: <defaults>
</compile_context>

<pallas_src>
import jax
import jax.numpy as jnp
from jax import lax
from jax.experimental import pallas as pl
from jax.experimental.pallas import tpu as pltpu

H = W = 16                 # spatial size (W must stay a power of two for the bit-mask halo math)
CIN = 4                    # encoder input channels
COUT = 32                  # encoder.out_channels
KH = KW = 3
NUM_CLASSES = 10
BS = 2
VIEWS = 3
BN_EPS = 1e-5

P = H * W                  # flattened pixels per image
OFF = 128                  # lane-aligned zero halo on each side of the flattened pixel axis


def multiview_kernel(x_ref, w_ref, cb_ref, bns_ref, bnb_ref, fcw_ref, fcb_ref,
                     o_ref, pad_ref):
    # x_ref  : (NV, CIN, P)           per-(image, channel) rows of flattened pixels, P = H*W
    # w_ref  : (COUT, KH*KW*CIN)      conv weights, index [o, (dy*KW+dx)*CIN + c]
    # cb_ref : (COUT, 1)              conv bias
    # bns_ref/bnb_ref : (1, COUT)     folded BatchNorm1d(eval) scale / shift
    # fcw_ref: (COUT, NUM_CLASSES)    fc weight;  fcb_ref: (1, NUM_CLASSES)
    # o_ref  : (BS, NUM_CLASSES)
    # pad_ref: (NV, CIN, 2*OFF + P)   VMEM scratch: zero halo for the SAME 3x3 conv
    nv, cin, p = x_ref.shape
    cout = w_ref.shape[0]
    bs = o_ref.shape[0]
    views = nv // bs

    # Zero halo, then copy the image rows into the middle (lane-tile-aligned store at OFF=128).
    pad_ref[...] = jnp.zeros_like(pad_ref)
    pad_ref[:, :, OFF:OFF + p] = x_ref[...]

    # Flattened-pixel -> (h, w) helpers for the 3x3 boundary masks (W is a power of two).
    pidx = lax.broadcasted_iota(jnp.int32, (1, 1, p), 2)
    hidx = pidx >> (W.bit_length() - 1)        # == pidx // W
    widx = pidx & (W - 1)                      # == pidx %  W

    # 3x3 SAME conv as 9 accumulated batched matmuls over shifted + masked pixel rows.
    conv = jnp.zeros((nv, cout, p), jnp.float32)
    for dy in range(KH):
        for dx in range(KW):
            k = dy * KW + dx
            s = (dy - 1) * W + (dx - 1)                      # flat-pixel shift of this tap
            shifted = pad_ref[:, :, OFF + s:OFF + s + p]     # (NV, CIN, P)
            valid = ((hidx + dy >= 1) & (hidx + dy <= H) &
                     (widx + dx >= 1) & (widx + dx <= W))    # in-bounds 3x3 neighbour?
            tap = jnp.where(valid, shifted, 0.0)
            wk = jnp.broadcast_to(w_ref[:, k * cin:(k + 1) * cin], (nv, cout, cin))
            conv = conv + jnp.einsum('noc,ncp->nop', wk, tap,
                                     preferred_element_type=jnp.float32)

    conv = jnp.maximum(conv + cb_ref[...], 0.0)              # conv bias + ReLU (applied once)
    feat = jnp.sum(conv, axis=-1) * (1.0 / p)                # global average pool -> (NV, COUT)

    # 'mean' multi-view fusion as a tiny (BS, NV) x (NV, COUT) matmul (no reshapes needed).
    row_i = lax.broadcasted_iota(jnp.int32, (bs, nv), 0)
    col_i = lax.broadcasted_iota(jnp.int32, (bs, nv), 1)
    fuse = jnp.where((col_i >= row_i * views) & (col_i < (row_i + 1) * views),
                     1.0 / views, 0.0)
    fused = jnp.dot(fuse, feat, preferred_element_type=jnp.float32)   # (BS, COUT)

    # BatchNorm1d(eval) is a per-channel affine, so it commutes with the view-mean.
    fused = fused * bns_ref[...] + bnb_ref[...]

    # Final classifier.
    o_ref[...] = (jnp.dot(fused, fcw_ref[...], preferred_element_type=jnp.float32)
                  + fcb_ref[...])


@jax.jit
def multiview_forward(x, w_flat, conv_b_col, bn_scale_row, bn_shift_row, fc_w, fc_b_row):
    """x: (bs, views, C, H, W), exactly as the torch module's forward receives it."""
    bs, v, c, h, w = x.shape
    nv = bs * v
    x_rows = x.reshape(nv, c, h * w)           # contiguity-preserving reshape: no HBM copy
    return pl.pallas_call(
        multiview_kernel,
        out_shape=jax.ShapeDtypeStruct((bs, NUM_CLASSES), jnp.float32),
        scratch_shapes=[pltpu.VMEM((nv, c, 2 * OFF + h * w), jnp.float32)],
    )(x_rows, w_flat, conv_b_col, bn_scale_row, bn_shift_row, fc_w, fc_b_row)


if __name__ == "__main__":
    key = jax.random.PRNGKey(0)
    ks = jax.random.split(key, 8)

    # Deterministic synthetic parameters (shapes follow the module's __init__).
    x = jax.random.normal(ks[0], (BS, VIEWS, CIN, H, W), jnp.float32)
    conv_w = 0.1 * jax.random.normal(ks[1], (KH, KW, CIN, COUT), jnp.float32)   # HWIO
    conv_b = 0.1 * jax.random.normal(ks[2], (COUT,), jnp.float32)
    bn_gamma = 1.0 + 0.1 * jax.random.normal(ks[3], (COUT,), jnp.float32)
    bn_beta = 0.1 * jax.random.normal(ks[4], (COUT,), jnp.float32)
    bn_mean = 0.1 * jax.random.normal(ks[5], (COUT,), jnp.float32)
    bn_var = jnp.abs(jax.random.normal(ks[6], (COUT,), jnp.float32)) + 0.5
    fc_w = 0.1 * jax.random.normal(ks[7], (COUT, NUM_CLASSES), jnp.float32)
    fc_b = jnp.linspace(-0.5, 0.5, NUM_CLASSES).astype(jnp.float32)

    # One-time parameter layout prep (weight-conversion style, not per-forward glue):
    #   w_flat[o, (dy*KW+dx)*CIN + c] = conv_w[dy, dx, c, o]
    w_flat = jnp.transpose(conv_w.reshape(KH * KW, CIN, COUT),
                           (2, 0, 1)).reshape(COUT, KH * KW * CIN)
    conv_b_col = conv_b.reshape(COUT, 1)
    bn_scale = bn_gamma / jnp.sqrt(bn_var + BN_EPS)                 # eval-mode BN folded affine
    bn_shift = bn_beta - bn_mean * bn_scale
    bn_scale_row = bn_scale.reshape(1, COUT)
    bn_shift_row = bn_shift.reshape(1, COUT)
    fc_b_row = fc_b.reshape(1, NUM_CLASSES)

    out = multiview_forward(x, w_flat, conv_b_col, bn_scale_row, bn_shift_row, fc_w, fc_b_row)
    out = jax.block_until_ready(out)

    # Pure-JAX reference for the same eval-mode forward pass.
    x_imgs = x.reshape(BS * VIEWS, CIN, H, W)
    w_oihw = jnp.transpose(conv_w, (3, 2, 0, 1))
    y = lax.conv_general_dilated(x_imgs, w_oihw, (1, 1), "SAME",
                                 dimension_numbers=("NCHW", "OIHW", "NCHW"))
    y = jnp.maximum(y + conv_b[None, :, None, None], 0.0)
    feat_ref = y.mean(axis=(2, 3)) * bn_scale + bn_shift            # per-image BN (eval)
    pooled_ref = feat_ref.reshape(BS, VIEWS, COUT).mean(axis=1)     # 'mean' fusion over views
    ref = pooled_ref @ fc_w + fc_b

    assert out.shape == (BS, NUM_CLASSES)
    assert jnp.allclose(out, ref, rtol=2e-3, atol=2e-3), (out, ref)
    print("KERNEL_OK")
</pallas_src>

<mosaic_0001>
module attributes {stable_mosaic.version = 11 : i64} {
  func.func @multiview_kernel(%arg0: memref<6x4x256xf32, #tpu.memory_space<vmem>>, %arg1: memref<32x36xf32, #tpu.memory_space<vmem>>, %arg2: memref<32x1xf32, #tpu.memory_space<vmem>>, %arg3: memref<1x32xf32, #tpu.memory_space<vmem>>, %arg4: memref<1x32xf32, #tpu.memory_space<vmem>>, %arg5: memref<32x10xf32, #tpu.memory_space<vmem>>, %arg6: memref<1x10xf32, #tpu.memory_space<vmem>>, %arg7: memref<2x10xf32, #tpu.memory_space<vmem>>, %arg8: memref<6x4x512xf32, #tpu.memory_space<vmem>>) attributes {dimension_semantics = [], scalar_prefetch = 0 : i64, scratch_operands = 1 : i64, tpu.core_type = #tpu.core_type<tc>} {
    %cst = arith.constant 0.000000e+00 : f32
    %0 = vector.broadcast %cst : f32 to vector<6x4x512xf32>
    %c0 = arith.constant 0 : index
    %c0_0 = arith.constant 0 : index
    %c0_1 = arith.constant 0 : index
    %1 = vector.load %arg8[%c0, %c0_0, %c0_1] : memref<6x4x512xf32, #tpu.memory_space<vmem>>, vector<6x4x512xf32>
    tpu.vector_store %arg8[%c0, %c0_0, %c0_1], %0 {strides = array<i32>} : memref<6x4x512xf32, #tpu.memory_space<vmem>>, vector<6x4x512xf32>,
    %c0_2 = arith.constant 0 : index
    %c0_3 = arith.constant 0 : index
    %c0_4 = arith.constant 0 : index
    %2 = vector.load %arg0[%c0_2, %c0_3, %c0_4] : memref<6x4x256xf32, #tpu.memory_space<vmem>>, vector<6x4x256xf32>
    %c0_5 = arith.constant 0 : index
    %c0_6 = arith.constant 0 : index
    %c128 = arith.constant 128 : index
    %3 = vector.load %arg8[%c0_5, %c0_6, %c128] : memref<6x4x512xf32, #tpu.memory_space<vmem>>, vector<6x4x256xf32>
    tpu.vector_store %arg8[%c0_5, %c0_6, %c128], %2 {strides = array<i32>} : memref<6x4x512xf32, #tpu.memory_space<vmem>>, vector<6x4x256xf32>,
    %4 = tpu.iota {dimensions = array<i32: 2>} : vector<1x1x256xi32>
    %c4_i32 = arith.constant 4 : i32
    %5 = vector.broadcast %c4_i32 : i32 to vector<1x1x256xi32>
    %6 = arith.shrsi %4, %5 : vector<1x1x256xi32>
    %c15_i32 = arith.constant 15 : i32
    %7 = vector.broadcast %c15_i32 : i32 to vector<1x1x256xi32>
    %8 = arith.andi %4, %7 : vector<1x1x256xi32>
    %cst_7 = arith.constant 0.000000e+00 : f32
    %9 = vector.broadcast %cst_7 : f32 to vector<6x32x256xf32>
    %c0_8 = arith.constant 0 : index
    %c0_9 = arith.constant 0 : index
    %c111 = arith.constant 111 : index
    %10 = vector.load %arg8[%c0_8, %c0_9, %c111] : memref<6x4x512xf32, #tpu.memory_space<vmem>>, vector<6x4x256xf32>
    %c0_i32 = arith.constant 0 : i32
    %11 = vector.broadcast %c0_i32 : i32 to vector<1x1x256xi32>
    %12 = arith.addi %6, %11 : vector<1x1x256xi32>
    %c1_i32 = arith.constant 1 : i32
    %13 = vector.broadcast %c1_i32 : i32 to vector<1x1x256xi32>
    %14 = arith.cmpi sge, %12, %13 : vector<1x1x256xi32>
    %c0_i32_10 = arith.constant 0 : i32
    %15 = vector.broadcast %c0_i32_10 : i32 to vector<1x1x256xi32>
    %16 = arith.addi %6, %15 : vector<1x1x256xi32>
    %c16_i32 = arith.constant 16 : i32
    %17 = vector.broadcast %c16_i32 : i32 to vector<1x1x256xi32>
    %18 = arith.cmpi sle, %16, %17 : vector<1x1x256xi32>
    %19 = arith.andi %14, %18 : vector<1x1x256xi1>
    %c0_i32_11 = arith.constant 0 : i32
    %20 = vector.broadcast %c0_i32_11 : i32 to vector<1x1x256xi32>
    %21 = arith.addi %8, %20 : vector<1x1x256xi32>
    %c1_i32_12 = arith.constant 1 : i32
    %22 = vector.broadcast %c1_i32_12 : i32 to vector<1x1x256xi32>
    %23 = arith.cmpi sge, %21, %22 : vector<1x1x256xi32>
    %24 = arith.andi %19, %23 : vector<1x1x256xi1>
    %c0_i32_13 = arith.constant 0 : i32
    %25 = vector.broadcast %c0_i32_13 : i32 to vector<1x1x256xi32>
    %26 = arith.addi %8, %25 : vector<1x1x256xi32>
    %c16_i32_14 = arith.constant 16 : i32
    %27 = vector.broadcast %c16_i32_14 : i32 to vector<1x1x256xi32>
    %28 = arith.cmpi sle, %26, %27 : vector<1x1x256xi32>
    %29 = arith.andi %24, %28 : vector<1x1x256xi1>
    %cst_15 = arith.constant 0.000000e+00 : f32
    %30 = vector.shape_cast %29 : vector<1x1x256xi1> to vector<1x1x256xi1>
    %31 = vector.broadcast %30 : vector<1x1x256xi1> to vector<6x4x256xi1>
    %32 = vector.broadcast %cst_15 : f32 to vector<6x4x256xf32>
    %33 = arith.select %31, %10, %32 : vector<6x4x256xi1>, vector<6x4x256xf32>
    %c0_16 = arith.constant 0 : index
    %c0_17 = arith.constant 0 : index
    %34 = vector.load %arg1[%c0_16, %c0_17] : memref<32x36xf32, #tpu.memory_space<vmem>>, vector<32x4xf32>
    %35 = vector.shape_cast %34 : vector<32x4xf32> to vector<1x32x4xf32>
    %36 = vector.broadcast %35 : vector<1x32x4xf32> to vector<6x32x4xf32>
    "tpu.trace_start"() <{level = 10 : i32, message = "noc,ncp->nop"}> : () -> ()
    %cst_18 = arith.constant dense<0.000000e+00> : vector<6x32x256xf32>
    %37 = tpu.matmul %36, %33, %cst_18 {dimension_numbers = #tpu.dot_dimension_numbers<[2], [1], [1], [2], [0, 0, 0, 1, 1, 2], [0], [0]>} : vector<6x32x4xf32>, vector<6x4x256xf32>, vector<6x32x256xf32> -> vector<6x32x256xf32>
    "tpu.trace_stop"() : () -> ()
    %38 = arith.addf %9, %37 : vector<6x32x256xf32>
    %c0_19 = arith.constant 0 : index
    %c0_20 = arith.constant 0 : index
    %c112 = arith.constant 112 : index
    %39 = vector.load %arg8[%c0_19, %c0_20, %c112] : memref<6x4x512xf32, #tpu.memory_space<vmem>>, vector<6x4x256xf32>
    %c0_i32_21 = arith.constant 0 : i32
    %40 = vector.broadcast %c0_i32_21 : i32 to vector<1x1x256xi32>
    %41 = arith.addi %6, %40 : vector<1x1x256xi32>
    %c1_i32_22 = arith.constant 1 : i32
    %42 = vector.broadcast %c1_i32_22 : i32 to vector<1x1x256xi32>
    %43 = arith.cmpi sge, %41, %42 : vector<1x1x256xi32>
    %c0_i32_23 = arith.constant 0 : i32
    %44 = vector.broadcast %c0_i32_23 : i32 to vector<1x1x256xi32>
    %45 = arith.addi %6, %44 : vector<1x1x256xi32>
    %c16_i32_24 = arith.constant 16 : i32
    %46 = vector.broadcast %c16_i32_24 : i32 to vector<1x1x256xi32>
    %47 = arith.cmpi sle, %45, %46 : vector<1x1x256xi32>
    %48 = arith.andi %43, %47 : vector<1x1x256xi1>
    %c1_i32_25 = arith.constant 1 : i32
    %49 = vector.broadcast %c1_i32_25 : i32 to vector<1x1x256xi32>
    %50 = arith.addi %8, %49 : vector<1x1x256xi32>
    %c1_i32_26 = arith.constant 1 : i32
    %51 = vector.broadcast %c1_i32_26 : i32 to vector<1x1x256xi32>
    %52 = arith.cmpi sge, %50, %51 : vector<1x1x256xi32>
    %53 = arith.andi %48, %52 : vector<1x1x256xi1>
    %c1_i32_27 = arith.constant 1 : i32
    %54 = vector.broadcast %c1_i32_27 : i32 to vector<1x1x256xi32>
    %55 = arith.addi %8, %54 : vector<1x1x256xi32>
    %c16_i32_28 = arith.constant 16 : i32
    %56 = vector.broadcast %c16_i32_28 : i32 to vector<1x1x256xi32>
    %57 = arith.cmpi sle, %55, %56 : vector<1x1x256xi32>
    %58 = arith.andi %53, %57 : vector<1x1x256xi1>
    %cst_29 = arith.constant 0.000000e+00 : f32
    %59 = vector.shape_cast %58 : vector<1x1x256xi1> to vector<1x1x256xi1>
    %60 = vector.broadcast %59 : vector<1x1x256xi1> to vector<6x4x256xi1>
    %61 = vector.broadcast %cst_29 : f32 to vector<6x4x256xf32>
    %62 = arith.select %60, %39, %61 : vector<6x4x256xi1>, vector<6x4x256xf32>
    %c0_30 = arith.constant 0 : index
    %c4 = arith.constant 4 : index
    %63 = vector.load %arg1[%c0_30, %c4] : memref<32x36xf32, #tpu.memory_space<vmem>>, vector<32x4xf32>
    %64 = vector.shape_cast %63 : vector<32x4xf32> to vector<1x32x4xf32>
    %65 = vector.broadcast %64 : vector<1x32x4xf32> to vector<6x32x4xf32>
    "tpu.trace_start"() <{level = 10 : i32, message = "noc,ncp->nop"}> : () -> ()
    %cst_31 = arith.constant dense<0.000000e+00> : vector<6x32x256xf32>
    %66 = tpu.matmul %65, %62, %cst_31 {dimension_numbers = #tpu.dot_dimension_numbers<[2], [1], [1], [2], [0, 0, 0, 1, 1, 2], [0], [0]>} : vector<6x32x4xf32>, vector<6x4x256xf32>, vector<6x32x256xf32> -> vector<6x32x256xf32>
    "tpu.trace_stop"() : () -> ()
    %67 = arith.addf %38, %66 : vector<6x32x256xf32>
    %c0_32 = arith.constant 0 : index
    %c0_33 = arith.constant 0 : index
    %c113 = arith.constant 113 : index
    %68 = vector.load %arg8[%c0_32, %c0_33, %c113] : memref<6x4x512xf32, #tpu.memory_space<vmem>>, vector<6x4x256xf32>
    %c0_i32_34 = arith.constant 0 : i32
    %69 = vector.broadcast %c0_i32_34 : i32 to vector<1x1x256xi32>
    %70 = arith.addi %6, %69 : vector<1x1x256xi32>
    %c1_i32_35 = arith.constant 1 : i32
    %71 = vector.broadcast %c1_i32_35 : i32 to vector<1x1x256xi32>
    %72 = arith.cmpi sge, %70, %71 : vector<1x1x256xi32>
    %c0_i32_36 = arith.constant 0 : i32
    %73 = vector.broadcast %c0_i32_36 : i32 to vector<1x1x256xi32>
    %74 = arith.addi %6, %73 : vector<1x1x256xi32>
    %c16_i32_37 = arith.constant 16 : i32
    %75 = vector.broadcast %c16_i32_37 : i32 to vector<1x1x256xi32>
    %76 = arith.cmpi sle, %74, %75 : vector<1x1x256xi32>
    %77 = arith.andi %72, %76 : vector<1x1x256xi1>
    %c2_i32 = arith.constant 2 : i32
    %78 = vector.broadcast %c2_i32 : i32 to vector<1x1x256xi32>
    %79 = arith.addi %8, %78 : vector<1x1x256xi32>
    %c1_i32_38 = arith.constant 1 : i32
    %80 = vector.broadcast %c1_i32_38 : i32 to vector<1x1x256xi32>
    %81 = arith.cmpi sge, %79, %80 : vector<1x1x256xi32>
    %82 = arith.andi %77, %81 : vector<1x1x256xi1>
    %c2_i32_39 = arith.constant 2 : i32
    %83 = vector.broadcast %c2_i32_39 : i32 to vector<1x1x256xi32>
    %84 = arith.addi %8, %83 : vector<1x1x256xi32>
    %c16_i32_40 = arith.constant 16 : i32
    %85 = vector.broadcast %c16_i32_40 : i32 to vector<1x1x256xi32>
    %86 = arith.cmpi sle, %84, %85 : vector<1x1x256xi32>
    %87 = arith.andi %82, %86 : vector<1x1x256xi1>
    %cst_41 = arith.constant 0.000000e+00 : f32
    %88 = vector.shape_cast %87 : vector<1x1x256xi1> to vector<1x1x256xi1>
    %89 = vector.broadcast %88 : vector<1x1x256xi1> to vector<6x4x256xi1>
    %90 = vector.broadcast %cst_41 : f32 to vector<6x4x256xf32>
    %91 = arith.select %89, %68, %90 : vector<6x4x256xi1>, vector<6x4x256xf32>
    %c0_42 = arith.constant 0 : index
    %c8 = arith.constant 8 : index
    %92 = vector.load %arg1[%c0_42, %c8] : memref<32x36xf32, #tpu.memory_space<vmem>>, vector<32x4xf32>
    %93 = vector.shape_cast %92 : vector<32x4xf32> to vector<1x32x4xf32>
    %94 = vector.broadcast %93 : vector<1x32x4xf32> to vector<6x32x4xf32>
    "tpu.trace_start"() <{level = 10 : i32, message = "noc,ncp->nop"}> : () -> ()
    %cst_43 = arith.constant dense<0.000000e+00> : vector<6x32x256xf32>
    %95 = tpu.matmul %94, %91, %cst_43 {dimension_numbers = #tpu.dot_dimension_numbers<[2], [1], [1], [2], [0, 0, 0, 1, 1, 2], [0], [0]>} : vector<6x32x4xf32>, vector<6x4x256xf32>, vector<6x32x256xf32> -> vector<6x32x256xf32>
    "tpu.trace_stop"() : () -> ()
    %96 = arith.addf %67, %95 : vector<6x32x256xf32>
    %c0_44 = arith.constant 0 : index
    %c0_45 = arith.constant 0 : index
    %c127 = arith.constant 127 : index
    %97 = vector.load %arg8[%c0_44, %c0_45, %c127] : memref<6x4x512xf32, #tpu.memory_space<vmem>>, vector<6x4x256xf32>
    %c1_i32_46 = arith.constant 1 : i32
    %98 = vector.broadcast %c1_i32_46 : i32 to vector<1x1x256xi32>
    %99 = arith.addi %6, %98 : vector<1x1x256xi32>
    %c1_i32_47 = arith.constant 1 : i32
    %100 = vector.broadcast %c1_i32_47 : i32 to vector<1x1x256xi32>
    %101 = arith.cmpi sge, %99, %100 : vector<1x1x256xi32>
    %c1_i32_48 = arith.constant 1 : i32
    %102 = vector.broadcast %c1_i32_48 : i32 to vector<1x1x256xi32>
    %103 = arith.addi %6, %102 : vector<1x1x256xi32>
    %c16_i32_49 = arith.constant 16 : i32
    %104 = vector.broadcast %c16_i32_49 : i32 to vector<1x1x256xi32>
    %105 = arith.cmpi sle, %103, %104 : vector<1x1x256xi32>
    %106 = arith.andi %101, %105 : vector<1x1x256xi1>
    %c0_i32_50 = arith.constant 0 : i32
    %107 = vector.broadcast %c0_i32_50 : i32 to vector<1x1x256xi32>
    %108 = arith.addi %8, %107 : vector<1x1x256xi32>
    %c1_i32_51 = arith.constant 1 : i32
    %109 = vector.broadcast %c1_i32_51 : i32 to vector<1x1x256xi32>
    %110 = arith.cmpi sge, %108, %109 : vector<1x1x256xi32>
    %111 = arith.andi %106, %110 : vector<1x1x256xi1>
    %c0_i32_52 = arith.constant 0 : i32
    %112 = vector.broadcast %c0_i32_52 : i32 to vector<1x1x256xi32>
    %113 = arith.addi %8, %112 : vector<1x1x256xi32>
    %c16_i32_53 = arith.constant 16 : i32
    %114 = vector.broadcast %c16_i32_53 : i32 to vector<1x1x256xi32>
    %115 = arith.cmpi sle, %113, %114 : vector<1x1x256xi32>
    %116 = arith.andi %111, %115 : vector<1x1x256xi1>
    %cst_54 = arith.constant 0.000000e+00 : f32
    %117 = vector.shape_cast %116 : vector<1x1x256xi1> to vector<1x1x256xi1>
    %118 = vector.broadcast %117 : vector<1x1x256xi1> to vector<6x4x256xi1>
    %119 = vector.broadcast %cst_54 : f32 to vector<6x4x256xf32>
    %120 = arith.select %118, %97, %119 : vector<6x4x256xi1>, vector<6x4x256xf32>
    %c0_55 = arith.constant 0 : index
    %c12 = arith.constant 12 : index
    %121 = vector.load %arg1[%c0_55, %c12] : memref<32x36xf32, #tpu.memory_space<vmem>>, vector<32x4xf32>
    %122 = vector.shape_cast %121 : vector<32x4xf32> to vector<1x32x4xf32>
    %123 = vector.broadcast %122 : vector<1x32x4xf32> to vector<6x32x4xf32>
    "tpu.trace_start"() <{level = 10 : i32, message = "noc,ncp->nop"}> : () -> ()
    %cst_56 = arith.constant dense<0.000000e+00> : vector<6x32x256xf32>
    %124 = tpu.matmul %123, %120, %cst_56 {dimension_numbers = #tpu.dot_dimension_numbers<[2], [1], [1], [2], [0, 0, 0, 1, 1, 2], [0], [0]>} : vector<6x32x4xf32>, vector<6x4x256xf32>, vector<6x32x256xf32> -> vector<6x32x256xf32>
    "tpu.trace_stop"() : () -> ()
    %125 = arith.addf %96, %124 : vector<6x32x256xf32>
    %c0_57 = arith.constant 0 : index
    %c0_58 = arith.constant 0 : index
    %c128_59 = arith.constant 128 : index
    %126 = vector.load %arg8[%c0_57, %c0_58, %c128_59] : memref<6x4x512xf32, #tpu.memory_space<vmem>>, vector<6x4x256xf32>
    %c1_i32_60 = arith.constant 1 : i32
    %127 = vector.broadcast %c1_i32_60 : i32 to vector<1x1x256xi32>
    %128 = arith.addi %6, %127 : vector<1x1x256xi32>
    %c1_i32_61 = arith.constant 1 : i32
    %129 = vector.broadcast %c1_i32_61 : i32 to vector<1x1x256xi32>
    %130 = arith.cmpi sge, %128, %129 : vector<1x1x256xi32>
    %c1_i32_62 = arith.constant 1 : i32
    %131 = vector.broadcast %c1_i32_62 : i32 to vector<1x1x256xi32>
    %132 = arith.addi %6, %131 : vector<1x1x256xi32>
    %c16_i32_63 = arith.constant 16 : i32
    %133 = vector.broadcast %c16_i32_63 : i32 to vector<1x1x256xi32>
    %134 = arith.cmpi sle, %132, %133 : vector<1x1x256xi32>
    %135 = arith.andi %130, %134 : vector<1x1x256xi1>
    %c1_i32_64 = arith.constant 1 : i32
    %136 = vector.broadcast %c1_i32_64 : i32 to vector<1x1x256xi32>
    %137 = arith.addi %8, %136 : vector<1x1x256xi32>
    %c1_i32_65 = arith.constant 1 : i32
    %138 = vector.broadcast %c1_i32_65 : i32 to vector<1x1x256xi32>
    %139 = arith.cmpi sge, %137, %138 : vector<1x1x256xi32>
    %140 = arith.andi %135, %139 : vector<1x1x256xi1>
    %c1_i32_66 = arith.constant 1 : i32
    %141 = vector.broadcast %c1_i32_66 : i32 to vector<1x1x256xi32>
    %142 = arith.addi %8, %141 : vector<1x1x256xi32>
    %c16_i32_67 = arith.constant 16 : i32
    %143 = vector.broadcast %c16_i32_67 : i32 to vector<1x1x256xi32>
    %144 = arith.cmpi sle, %142, %143 : vector<1x1x256xi32>
    %145 = arith.andi %140, %144 : vector<1x1x256xi1>
    %cst_68 = arith.constant 0.000000e+00 : f32
    %146 = vector.shape_cast %145 : vector<1x1x256xi1> to vector<1x1x256xi1>
    %147 = vector.broadcast %146 : vector<1x1x256xi1> to vector<6x4x256xi1>
    %148 = vector.broadcast %cst_68 : f32 to vector<6x4x256xf32>
    %149 = arith.select %147, %126, %148 : vector<6x4x256xi1>, vector<6x4x256xf32>
    %c0_69 = arith.constant 0 : index
    %c16 = arith.constant 16 : index
    %150 = vector.load %arg1[%c0_69, %c16] : memref<32x36xf32, #tpu.memory_space<vmem>>, vector<32x4xf32>
    %151 = vector.shape_cast %150 : vector<32x4xf32> to vector<1x32x4xf32>
    %152 = vector.broadcast %151 : vector<1x32x4xf32> to vector<6x32x4xf32>
    "tpu.trace_start"() <{level = 10 : i32, message = "noc,ncp->nop"}> : () -> ()
    %cst_70 = arith.constant dense<0.000000e+00> : vector<6x32x256xf32>
    %153 = tpu.matmul %152, %149, %cst_70 {dimension_numbers = #tpu.dot_dimension_numbers<[2], [1], [1], [2], [0, 0, 0, 1, 1, 2], [0], [0]>} : vector<6x32x4xf32>, vector<6x4x256xf32>, vector<6x32x256xf32> -> vector<6x32x256xf32>
    "tpu.trace_stop"() : () -> ()
    %154 = arith.addf %125, %153 : vector<6x32x256xf32>
    %c0_71 = arith.constant 0 : index
    %c0_72 = arith.constant 0 : index
    %c129 = arith.constant 129 : index
    %155 = vector.load %arg8[%c0_71, %c0_72, %c129] : memref<6x4x512xf32, #tpu.memory_space<vmem>>, vector<6x4x256xf32>
    %c1_i32_73 = arith.constant 1 : i32
    %156 = vector.broadcast %c1_i32_73 : i32 to vector<1x1x256xi32>
    %157 = arith.addi %6, %156 : vector<1x1x256xi32>
    %c1_i32_74 = arith.constant 1 : i32
    %158 = vector.broadcast %c1_i32_74 : i32 to vector<1x1x256xi32>
    %159 = arith.cmpi sge, %157, %158 : vector<1x1x256xi32>
    %c1_i32_75 = arith.constant 1 : i32
    %160 = vector.broadcast %c1_i32_75 : i32 to vector<1x1x256xi32>
    %161 = arith.addi %6, %160 : vector<1x1x256xi32>
    %c16_i32_76 = arith.constant 16 : i32
    %162 = vector.broadcast %c16_i32_76 : i32 to vector<1x1x256xi32>
    %163 = arith.cmpi sle, %161, %162 : vector<1x1x256xi32>
    %164 = arith.andi %159, %163 : vector<1x1x256xi1>
    %c2_i32_77 = arith.constant 2 : i32
    %165 = vector.broadcast %c2_i32_77 : i32 to vector<1x1x256xi32>
    %166 = arith.addi %8, %165 : vector<1x1x256xi32>
    %c1_i32_78 = arith.constant 1 : i32
    %167 = vector.broadcast %c1_i32_78 : i32 to vector<1x1x256xi32>
    %168 = arith.cmpi sge, %166, %167 : vector<1x1x256xi32>
    %169 = arith.andi %164, %168 : vector<1x1x256xi1>
    %c2_i32_79 = arith.constant 2 : i32
    %170 = vector.broadcast %c2_i32_79 : i32 to vector<1x1x256xi32>
    %171 = arith.addi %8, %170 : vector<1x1x256xi32>
    %c16_i32_80 = arith.constant 16 : i32
    %172 = vector.broadcast %c16_i32_80 : i32 to vector<1x1x256xi32>
    %173 = arith.cmpi sle, %171, %172 : vector<1x1x256xi32>
    %174 = arith.andi %169, %173 : vector<1x1x256xi1>
    %cst_81 = arith.constant 0.000000e+00 : f32
    %175 = vector.shape_cast %174 : vector<1x1x256xi1> to vector<1x1x256xi1>
    %176 = vector.broadcast %175 : vector<1x1x256xi1> to vector<6x4x256xi1>
    %177 = vector.broadcast %cst_81 : f32 to vector<6x4x256xf32>
    %178 = arith.select %176, %155, %177 : vector<6x4x256xi1>, vector<6x4x256xf32>
    %c0_82 = arith.constant 0 : index
    %c20 = arith.constant 20 : index
    %179 = vector.load %arg1[%c0_82, %c20] : memref<32x36xf32, #tpu.memory_space<vmem>>, vector<32x4xf32>
    %180 = vector.shape_cast %179 : vector<32x4xf32> to vector<1x32x4xf32>
    %181 = vector.broadcast %180 : vector<1x32x4xf32> to vector<6x32x4xf32>
    "tpu.trace_start"() <{level = 10 : i32, message = "noc,ncp->nop"}> : () -> ()
    %cst_83 = arith.constant dense<0.000000e+00> : vector<6x32x256xf32>
    %182 = tpu.matmul %181, %178, %cst_83 {dimension_numbers = #tpu.dot_dimension_numbers<[2], [1], [1], [2], [0, 0, 0, 1, 1, 2], [0], [0]>} : vector<6x32x4xf32>, vector<6x4x256xf32>, vector<6x32x256xf32> -> vector<6x32x256xf32>
    "tpu.trace_stop"() : () -> ()
    %183 = arith.addf %154, %182 : vector<6x32x256xf32>
    %c0_84 = arith.constant 0 : index
    %c0_85 = arith.constant 0 : index
    %c143 = arith.constant 143 : index
    %184 = vector.load %arg8[%c0_84, %c0_85, %c143] : memref<6x4x512xf32, #tpu.memory_space<vmem>>, vector<6x4x256xf32>
    %c2_i32_86 = arith.constant 2 : i32
    %185 = vector.broadcast %c2_i32_86 : i32 to vector<1x1x256xi32>
    %186 = arith.addi %6, %185 : vector<1x1x256xi32>
    %c1_i32_87 = arith.constant 1 : i32
    %187 = vector.broadcast %c1_i32_87 : i32 to vector<1x1x256xi32>
    %188 = arith.cmpi sge, %186, %187 : vector<1x1x256xi32>
    %c2_i32_88 = arith.constant 2 : i32
    %189 = vector.broadcast %c2_i32_88 : i32 to vector<1x1x256xi32>
    %190 = arith.addi %6, %189 : vector<1x1x256xi32>
    %c16_i32_89 = arith.constant 16 : i32
    %191 = vector.broadcast %c16_i32_89 : i32 to vector<1x1x256xi32>
    %192 = arith.cmpi sle, %190, %191 : vector<1x1x256xi32>
    %193 = arith.andi %188, %192 : vector<1x1x256xi1>
    %c0_i32_90 = arith.constant 0 : i32
    %194 = vector.broadcast %c0_i32_90 : i32 to vector<1x1x256xi32>
    %195 = arith.addi %8, %194 : vector<1x1x256xi32>
    %c1_i32_91 = arith.constant 1 : i32
    %196 = vector.broadcast %c1_i32_91 : i32 to vector<1x1x256xi32>
    %197 = arith.cmpi sge, %195, %196 : vector<1x1x256xi32>
    %198 = arith.andi %193, %197 : vector<1x1x256xi1>
    %c0_i32_92 = arith.constant 0 : i32
    %199 = vector.broadcast %c0_i32_92 : i32 to vector<1x1x256xi32>
    %200 = arith.addi %8, %199 : vector<1x1x256xi32>
    %c16_i32_93 = arith.constant 16 : i32
    %201 = vector.broadcast %c16_i32_93 : i32 to vector<1x1x256xi32>
    %202 = arith.cmpi sle, %200, %201 : vector<1x1x256xi32>
    %203 = arith.andi %198, %202 : vector<1x1x256xi1>
    %cst_94 = arith.constant 0.000000e+00 : f32
    %204 = vector.shape_cast %203 : vector<1x1x256xi1> to vector<1x1x256xi1>
    %205 = vector.broadcast %204 : vector<1x1x256xi1> to vector<6x4x256xi1>
    %206 = vector.broadcast %cst_94 : f32 to vector<6x4x256xf32>
    %207 = arith.select %205, %184, %206 : vector<6x4x256xi1>, vector<6x4x256xf32>
    %c0_95 = arith.constant 0 : index
    %c24 = arith.constant 24 : index
    %208 = vector.load %arg1[%c0_95, %c24] : memref<32x36xf32, #tpu.memory_space<vmem>>, vector<32x4xf32>
    %209 = vector.shape_cast %208 : vector<32x4xf32> to vector<1x32x4xf32>
    %210 = vector.broadcast %209 : vector<1x32x4xf32> to vector<6x32x4xf32>
    "tpu.trace_start"() <{level = 10 : i32, message = "noc,ncp->nop"}> : () -> ()
    %cst_96 = arith.constant dense<0.000000e+00> : vector<6x32x256xf32>
    %211 = tpu.matmul %210, %207, %cst_96 {dimension_numbers = #tpu.dot_dimension_numbers<[2], [1], [1], [2], [0, 0, 0, 1, 1, 2], [0], [0]>} : vector<6x32x4xf32>, vector<6x4x256xf32>, vector<6x32x256xf32> -> vector<6x32x256xf32>
    "tpu.trace_stop"() : () -> ()
    %212 = arith.addf %183, %211 : vector<6x32x256xf32>
    %c0_97 = arith.constant 0 : index
    %c0_98 = arith.constant 0 : index
    %c144 = arith.constant 144 : index
    %213 = vector.load %arg8[%c0_97, %c0_98, %c144] : memref<6x4x512xf32, #tpu.memory_space<vmem>>, vector<6x4x256xf32>
    %c2_i32_99 = arith.constant 2 : i32
    %214 = vector.broadcast %c2_i32_99 : i32 to vector<1x1x256xi32>
    %215 = arith.addi %6, %214 : vector<1x1x256xi32>
    %c1_i32_100 = arith.constant 1 : i32
    %216 = vector.broadcast %c1_i32_100 : i32 to vector<1x1x256xi32>
    %217 = arith.cmpi sge, %215, %216 : vector<1x1x256xi32>
    %c2_i32_101 = arith.constant 2 : i32
    %218 = vector.broadcast %c2_i32_101 : i32 to vector<1x1x256xi32>
    %219 = arith.addi %6, %218 : vector<1x1x256xi32>
    %c16_i32_102 = arith.constant 16 : i32
    %220 = vector.broadcast %c16_i32_102 : i32 to vector<1x1x256xi32>
    %221 = arith.cmpi sle, %219, %220 : vector<1x1x256xi32>
    %222 = arith.andi %217, %221 : vector<1x1x256xi1>
    %c1_i32_103 = arith.constant 1 : i32
    %223 = vector.broadcast %c1_i32_103 : i32 to vector<1x1x256xi32>
    %224 = arith.addi %8, %223 : vector<1x1x256xi32>
    %c1_i32_104 = arith.constant 1 : i32
    %225 = vector.broadcast %c1_i32_104 : i32 to vector<1x1x256xi32>
    %226 = arith.cmpi sge, %224, %225 : vector<1x1x256xi32>
    %227 = arith.andi %222, %226 : vector<1x1x256xi1>
    %c1_i32_105 = arith.constant 1 : i32
    %228 = vector.broadcast %c1_i32_105 : i32 to vector<1x1x256xi32>
    %229 = arith.addi %8, %228 : vector<1x1x256xi32>
    %c16_i32_106 = arith.constant 16 : i32
    %230 = vector.broadcast %c16_i32_106 : i32 to vector<1x1x256xi32>
    %231 = arith.cmpi sle, %229, %230 : vector<1x1x256xi32>
    %232 = arith.andi %227, %231 : vector<1x1x256xi1>
    %cst_107 = arith.constant 0.000000e+00 : f32
    %233 = vector.shape_cast %232 : vector<1x1x256xi1> to vector<1x1x256xi1>
    %234 = vector.broadcast %233 : vector<1x1x256xi1> to vector<6x4x256xi1>
    %235 = vector.broadcast %cst_107 : f32 to vector<6x4x256xf32>
    %236 = arith.select %234, %213, %235 : vector<6x4x256xi1>, vector<6x4x256xf32>
    %c0_108 = arith.constant 0 : index
    %c28 = arith.constant 28 : index
    %237 = vector.load %arg1[%c0_108, %c28] : memref<32x36xf32, #tpu.memory_space<vmem>>, vector<32x4xf32>
    %238 = vector.shape_cast %237 : vector<32x4xf32> to vector<1x32x4xf32>
    %239 = vector.broadcast %238 : vector<1x32x4xf32> to vector<6x32x4xf32>
    "tpu.trace_start"() <{level = 10 : i32, message = "noc,ncp->nop"}> : () -> ()
    %cst_109 = arith.constant dense<0.000000e+00> : vector<6x32x256xf32>
    %240 = tpu.matmul %239, %236, %cst_109 {dimension_numbers = #tpu.dot_dimension_numbers<[2], [1], [1], [2], [0, 0, 0, 1, 1, 2], [0], [0]>} : vector<6x32x4xf32>, vector<6x4x256xf32>, vector<6x32x256xf32> -> vector<6x32x256xf32>
    "tpu.trace_stop"() : () -> ()
    %241 = arith.addf %212, %240 : vector<6x32x256xf32>
    %c0_110 = arith.constant 0 : index
    %c0_111 = arith.constant 0 : index
    %c145 = arith.constant 145 : index
    %242 = vector.load %arg8[%c0_110, %c0_111, %c145] : memref<6x4x512xf32, #tpu.memory_space<vmem>>, vector<6x4x256xf32>
    %c2_i32_112 = arith.constant 2 : i32
    %243 = vector.broadcast %c2_i32_112 : i32 to vector<1x1x256xi32>
    %244 = arith.addi %6, %243 : vector<1x1x256xi32>
    %c1_i32_113 = arith.constant 1 : i32
    %245 = vector.broadcast %c1_i32_113 : i32 to vector<1x1x256xi32>
    %246 = arith.cmpi sge, %244, %245 : vector<1x1x256xi32>
    %c2_i32_114 = arith.constant 2 : i32
    %247 = vector.broadcast %c2_i32_114 : i32 to vector<1x1x256xi32>
    %248 = arith.addi %6, %247 : vector<1x1x256xi32>
    %c16_i32_115 = arith.constant 16 : i32
    %249 = vector.broadcast %c16_i32_115 : i32 to vector<1x1x256xi32>
    %250 = arith.cmpi sle, %248, %249 : vector<1x1x256xi32>
    %251 = arith.andi %246, %250 : vector<1x1x256xi1>
    %c2_i32_116 = arith.constant 2 : i32
    %252 = vector.broadcast %c2_i32_116 : i32 to vector<1x1x256xi32>
    %253 = arith.addi %8, %252 : vector<1x1x256xi32>
    %c1_i32_117 = arith.constant 1 : i32
    %254 = vector.broadcast %c1_i32_117 : i32 to vector<1x1x256xi32>
    %255 = arith.cmpi sge, %253, %254 : vector<1x1x256xi32>
    %256 = arith.andi %251, %255 : vector<1x1x256xi1>
    %c2_i32_118 = arith.constant 2 : i32
    %257 = vector.broadcast %c2_i32_118 : i32 to vector<1x1x256xi32>
    %258 = arith.addi %8, %257 : vector<1x1x256xi32>
    %c16_i32_119 = arith.constant 16 : i32
    %259 = vector.broadcast %c16_i32_119 : i32 to vector<1x1x256xi32>
    %260 = arith.cmpi sle, %258, %259 : vector<1x1x256xi32>
    %261 = arith.andi %256, %260 : vector<1x1x256xi1>
    %cst_120 = arith.constant 0.000000e+00 : f32
    %262 = vector.shape_cast %261 : vector<1x1x256xi1> to vector<1x1x256xi1>
    %263 = vector.broadcast %262 : vector<1x1x256xi1> to vector<6x4x256xi1>
    %264 = vector.broadcast %cst_120 : f32 to vector<6x4x256xf32>
    %265 = arith.select %263, %242, %264 : vector<6x4x256xi1>, vector<6x4x256xf32>
    %c0_121 = arith.constant 0 : index
    %c32 = arith.constant 32 : index
    %266 = vector.load %arg1[%c0_121, %c32] : memref<32x36xf32, #tpu.memory_space<vmem>>, vector<32x4xf32>
    %267 = vector.shape_cast %266 : vector<32x4xf32> to vector<1x32x4xf32>
    %268 = vector.broadcast %267 : vector<1x32x4xf32> to vector<6x32x4xf32>
    "tpu.trace_start"() <{level = 10 : i32, message = "noc,ncp->nop"}> : () -> ()
    %cst_122 = arith.constant dense<0.000000e+00> : vector<6x32x256xf32>
    %269 = tpu.matmul %268, %265, %cst_122 {dimension_numbers = #tpu.dot_dimension_numbers<[2], [1], [1], [2], [0, 0, 0, 1, 1, 2], [0], [0]>} : vector<6x32x4xf32>, vector<6x4x256xf32>, vector<6x32x256xf32> -> vector<6x32x256xf32>
    "tpu.trace_stop"() : () -> ()
    %270 = arith.addf %241, %269 : vector<6x32x256xf32>
    %c0_123 = arith.constant 0 : index
    %c0_124 = arith.constant 0 : index
    %271 = vector.load %arg2[%c0_123, %c0_124] : memref<32x1xf32, #tpu.memory_space<vmem>>, vector<32x1xf32>
    %272 = vector.shape_cast %271 : vector<32x1xf32> to vector<1x32x1xf32>
    %273 = vector.broadcast %272 : vector<1x32x1xf32> to vector<6x32x256xf32>
    %274 = arith.addf %270, %273 : vector<6x32x256xf32>
    %cst_125 = arith.constant 0.000000e+00 : f32
    %275 = vector.broadcast %cst_125 : f32 to vector<6x32x256xf32>
    %276 = arith.maximumf %274, %275 : vector<6x32x256xf32>
    %cst_126 = arith.constant dense<0.000000e+00> : vector<6x32xf32>
    %277 = vector.multi_reduction <add>, %276, %cst_126 [2] : vector<6x32x256xf32> to vector<6x32xf32>
    %cst_127 = arith.constant 3.906250e-03 : f32
    %278 = vector.broadcast %cst_127 : f32 to vector<6x32xf32>
    %279 = arith.mulf %277, %278 : vector<6x32xf32>
    %280 = tpu.iota {dimensions = array<i32: 0>} : vector<2x6xi32>
    %281 = tpu.iota {dimensions = array<i32: 1>} : vector<2x6xi32>
    %c3_i32 = arith.constant 3 : i32
    %282 = vector.broadcast %c3_i32 : i32 to vector<2x6xi32>
    %283 = arith.muli %280, %282 : vector<2x6xi32>
    %284 = arith.cmpi sge, %281, %283 : vector<2x6xi32>
    %c1_i32_128 = arith.constant 1 : i32
    %285 = vector.broadcast %c1_i32_128 : i32 to vector<2x6xi32>
    %286 = arith.addi %280, %285 : vector<2x6xi32>
    %c3_i32_129 = arith.constant 3 : i32
    %287 = vector.broadcast %c3_i32_129 : i32 to vector<2x6xi32>
    %288 = arith.muli %286, %287 : vector<2x6xi32>
    %289 = arith.cmpi slt, %281, %288 : vector<2x6xi32>
    %290 = arith.andi %284, %289 : vector<2x6xi1>
    %cst_130 = arith.constant 0.333333343 : f32
    %cst_131 = arith.constant 0.000000e+00 : f32
    %291 = vector.broadcast %cst_130 : f32 to vector<2x6xf32>
    %292 = vector.broadcast %cst_131 : f32 to vector<2x6xf32>
    %293 = arith.select %290, %291, %292 : vector<2x6xi1>, vector<2x6xf32>
    %cst_132 = arith.constant dense<0.000000e+00> : vector<2x32xf32>
    %294 = tpu.matmul %293, %279, %cst_132 {dimension_numbers = #tpu.dot_dimension_numbers<[1], [0], [0], [1], [0, 0, 1, 1], [], []>} : vector<2x6xf32>, vector<6x32xf32>, vector<2x32xf32> -> vector<2x32xf32>
    %c0_133 = arith.constant 0 : index
    %c0_134 = arith.constant 0 : index
    %295 = vector.load %arg3[%c0_133, %c0_134] : memref<1x32xf32, #tpu.memory_space<vmem>>, vector<1x32xf32>
    %296 = vector.broadcast %295 : vector<1x32xf32> to vector<2x32xf32>
    %297 = arith.mulf %294, %296 : vector<2x32xf32>
    %c0_135 = arith.constant 0 : index
    %c0_136 = arith.constant 0 : index
    %298 = vector.load %arg4[%c0_135, %c0_136] : memref<1x32xf32, #tpu.memory_space<vmem>>, vector<1x32xf32>
    %299 = vector.broadcast %298 : vector<1x32xf32> to vector<2x32xf32>
    %300 = arith.addf %297, %299 : vector<2x32xf32>
    %c0_137 = arith.constant 0 : index
    %c0_138 = arith.constant 0 : index
    %301 = vector.load %arg5[%c0_137, %c0_138] : memref<32x10xf32, #tpu.memory_space<vmem>>, vector<32x10xf32>
    %cst_139 = arith.constant dense<0.000000e+00> : vector<2x10xf32>
    %302 = tpu.matmul %300, %301, %cst_139 {dimension_numbers = #tpu.dot_dimension_numbers<[1], [0], [0], [1], [0, 0, 1, 1], [], []>} : vector<2x32xf32>, vector<32x10xf32>, vector<2x10xf32> -> vector<2x10xf32>
    %c0_140 = arith.constant 0 : index
    %c0_141 = arith.constant 0 : index
    %303 = vector.load %arg6[%c0_140, %c0_141] : memref<1x10xf32, #tpu.memory_space<vmem>>, vector<1x10xf32>
    %304 = vector.broadcast %303 : vector<1x10xf32> to vector<2x10xf32>
    %305 = arith.addf %302, %304 : vector<2x10xf32>
    %c0_142 = arith.constant 0 : index
    %c0_143 = arith.constant 0 : index
    %306 = vector.load %arg7[%c0_142, %c0_143] : memref<2x10xf32, #tpu.memory_space<vmem>>, vector<2x10xf32>
    tpu.vector_store %arg7[%c0_142, %c0_143], %305 {strides = array<i32>} : memref<2x10xf32, #tpu.memory_space<vmem>>, vector<2x10xf32>,
    return
  }
}

</mosaic_0001>

<bundles_post_ra>
// kernel: multiview_forward.1
= control target key start
LH: loop header
LB: loop body
LE: loop exit
PB: predicated region body
PF: predicated region fallthrough
CT: control target
= control target key end

     0   :  { %v8140_v2 = vmov 0.0   ;;  %s10187_s0 = inlined_call_operand.vmem [shape: f32[6,4,256], index: 0, kind: input, shape index: {}]   ;;  %s10188_s1 = inlined_call_operand.vmem [shape: f32[32,36], index: 1, kind: input, shape index: {}]   ;;  %s10189_s2 = inlined_call_operand.vmem [shape: f32[32,1], index: 2, kind: input, shape index: {}]   ;;  %s10190_s3 = inlined_call_operand.vmem [shape: f32[1,32], index: 3, kind: input, shape index: {}]   ;;  %s10191_s4 = inlined_call_operand.vmem [shape: f32[1,32], index: 4, kind: input, shape index: {}]   ;;  %s10192_s5 = inlined_call_operand.vmem [shape: f32[32,10], index: 5, kind: input, shape index: {}]   ;;  %s10193_s6 = inlined_call_operand.vmem [shape: f32[1,10], index: 6, kind: input, shape index: {}]   ;;  %s10194_s7 = inlined_call_operand.hbm [shape: f32[2,10], index: 7, kind: output, shape index: {}]  }
   0x1   :  { %v8203_v0 = vld [vmem:[%s10187_s0] sm:$0xff]  ;;  %v8208_v1 = vld [vmem:[%s10187_s0 + $0x8] sm:$0xff]  ;;  %27 = vst [vmem:[#allocation2] sm:$0xff] %v8140_v2  ;;  %28 = vst [vmem:[#allocation2 + $0x8] sm:$0xff] %v8140_v2  ;;  %396 = vmatprep.mubr.f32.mxu0 %v8140_v2  ;;  %491 = vmatprep.mubr.f32.mxu1 %v8140_v2 }
   0x2   :  { %29 = vst [vmem:[#allocation2 + $0x10] sm:$0xff] %v8140_v2  ;;  %30 = vst [vmem:[#allocation2 + $0x18] sm:$0xff] %v8140_v2  ;;  %v41_v3 = vld [vmem:[%s10187_s0 + $0x10] sm:$0xff]  ;;  %v42_v4 = vld [vmem:[%s10187_s0 + $0x18] sm:$0xff] }
   0x3   :  { %31 = vst [vmem:[#allocation2 + $0x20] sm:$0xff] %v8140_v2  ;;  %32 = vst [vmem:[#allocation2 + $0x28] sm:$0xff] %v8140_v2  ;;  %v43_v5 = vld [vmem:[%s10187_s0 + $0x20] sm:$0xff]  ;;  %v44_v6 = vld [vmem:[%s10187_s0 + $0x28] sm:$0xff] }
   0x4   :  { %33 = vst [vmem:[#allocation2 + $0x30] sm:$0xff] %v8140_v2  ;;  %34 = vst [vmem:[#allocation2 + $0x38] sm:$0xff] %v8140_v2 }
   0x5   :  { %35 = vst [vmem:[#allocation2 + $0x40] sm:$0xff] %v8140_v2  ;;  %36 = vst [vmem:[#allocation2 + $0x48] sm:$0xff] %v8140_v2 }
   0x6   :  { %37 = vst [vmem:[#allocation2 + $0x50] sm:$0xff] %v8140_v2  ;;  %38 = vst [vmem:[#allocation2 + $0x58] sm:$0xff] %v8140_v2 }
   0x7   :  { %45 = vst [vmem:[#allocation2 + $0x4] sm:$0xff] %v8203_v0  ;;  %46 = vst [vmem:[#allocation2 + $0x14] sm:$0xff] %v8208_v1 }
   0x8   :  { %47 = vst [vmem:[#allocation2 + $0x24] sm:$0xff] %v41_v3  ;;  %48 = vst [vmem:[#allocation2 + $0x34] sm:$0xff] %v42_v4 }
   0x9   :  { %49 = vst [vmem:[#allocation2 + $0x44] sm:$0xff] %v43_v5 }
   0xa   :  { %12 = vsyncpa [#allocation4], 0  ;;  %50 = vst [vmem:[#allocation2 + $0x54] sm:$0xff] %v44_v6  ;;  %s8141_s13 = smov 16   ;;  %v8263_v13 = vld [vmem:[%s10188_s1 + $0x8] sm:$0xff]  ;;  %v8268_v14 = vld [vmem:[%s10188_s1] sm:$0xff]  ;;  %v51_v38 = vlaneseq }
   0xb   :  { %s8142_s17 = smov 124   ;;  %v8281_v17 = vld [vmem:[%s10188_s1 + $0x10] sm:$0xff]  ;;  %v8289_v18 = vld [vmem:[%s10188_s1 + $0x18] sm:$0xff]  ;;  %s8143_s22 = smov 17   ;;  %vm263_vm4 = vcmask 130048   ;;  %vm325_vm7 = vcmask 1043456  }
   0xc   :  { %s8144_s23 = smov 15   ;;  %s8145_s24 = smov 120   ;;  %v8362_v40 = vand.u32 127, %v51_v38  ;;  %vm316_vm8 = vcmask 31744   ;;  %vm142_vm10 = vcmask 138240   ;;  %vm1558_vm15 = vcmask 121856  }
   0xd   :  { %s8146_s25 = smov 1   ;;  %s8147_s26 = smov 116  }
   0xe   :  { %v184_v7 = vld [vmem:[#allocation2 + $0x8] sm:$0xf]  ;;  %v8238_v8 = vld [vmem:[#allocation2] sm:$0xff]  ;;  %v186_v9 = vld [vmem:[#allocation2 + $0x18] sm:$0xf]  ;;  %v8368_v42 = vadd.s32 128, %v8362_v40 }
   0xf   :  { %231 = vrot.lane.b32.xlu0 %v184_v7, %s8141_s13  ;;  %227 = vrot.lane.b32.xlu1 %v8238_v8, %s8141_s13  ;;  %v8243_v10 = vld [vmem:[#allocation2 + $0x10] sm:$0xff]  ;;  %v8247_v11 = vcombine.high %v8238_v8, %v8238_v8  ;;  %v8270_v15 = vld [vmem:[#allocation2 + $0x20] sm:$0xff]  ;;  %v188_v19 = vld [vmem:[#allocation2 + $0x28] sm:$0xf]  ;;  %v8374_v43 = vshra.s32 %v8362_v40, 4  ;;  %s8148_s27 = smov 112  }
  0x10   :  { %v8252_v12 = vcombine.high %v8243_v10, %v8243_v10  ;;  %v8276_v16 = vcombine.high %v8270_v15, %v8270_v15  ;;  %v8291_v20 = vld [vmem:[#allocation2 + $0x30] sm:$0xff]  ;;  %v190_v22 = vld [vmem:[#allocation2 + $0x38] sm:$0xf]  ;;  %v8303_v23 = vld [vmem:[#allocation2 + $0x40] sm:$0xff]  ;;  %v8377_v46 = vshra.s32 %v8368_v42, 4  ;;  %s8149_s28 = smov 127  }
  0x11   :  { %v8297_v21 = vcombine.high %v8291_v20, %v8291_v20  ;;  %v8310_v24 = vcombine.high %v8303_v23, %v8303_v23  ;;  %v192_v25 = vld [vmem:[#allocation2 + $0x48] sm:$0xf]  ;;  %v8312_v26 = vld [vmem:[#allocation2 + $0x50] sm:$0xff]  ;;  %v194_v28 = vld [vmem:[#allocation2 + $0x58] sm:$0xf]  ;;  %vm70_vm0 = vcmp.ge.s32.totalorder %v8374_v43, 1 }
  0x12   :  { %v8319_v27 = vcombine.high %v8312_v26, %v8312_v26  ;;  %v59_v29 = vld [vmem:[#allocation2 + $0x8] sm:$0xf]  ;;  %v61_v30 = vld [vmem:[#allocation2 + $0x18] sm:$0xf]  ;;  %vm72_vm1 = vcmp.le.s32.totalorder %v8374_v43, 16  ;;  %vm71_vm2 = vcmp.ge.s32.totalorder %v8377_v46, 1 }
  0x13   :  { %237 = vrot.lane.b32.xlu0 %v186_v9, %s8141_s13  ;;  %233 = vrot.lane.b32.xlu1 %v8243_v10, %s8141_s13  ;;  %v63_v31 = vld [vmem:[#allocation2 + $0x28] sm:$0xf]  ;;  %v65_v32 = vld [vmem:[#allocation2 + $0x38] sm:$0xf]  ;;  %vm73_vm3 = vcmp.le.s32.totalorder %v8377_v46, 16  ;;  %vm8387_vm5 = vmand %vm70_vm0, %vm72_vm1  ;;  %s8150_s29 = smov 108  }
  0x14   :  { %v67_v33 = vld [vmem:[#allocation2 + $0x48] sm:$0xf]  ;;  %v69_v34 = vld [vmem:[#allocation2 + $0x58] sm:$0xf]  ;;  %vm8394_vm6 = vmand %vm71_vm2, %vm73_vm3  ;;  %s8152_s15 = smov 104   ;;  %s8154_s16 = smov 111  }
  0x15   :  { %v1479_v35 = vld [vmem:[#allocation2 + $0x8] sm:$0xf]  ;;  %v1481_v36 = vld [vmem:[#allocation2 + $0x18] sm:$0xf]  ;;  %s8159_s14 = smov [#allocation3]  }
  0x16   :  { %v1483_v37 = vld [vmem:[#allocation2 + $0x28] sm:$0xf]  ;;  %v1485_v39 = vld [vmem:[#allocation2 + $0x38] sm:$0xf] }
  0x17   :  { %235 = vrot.lane.b32.xlu1 %v8252_v12, %s8141_s13  ;;  %229 = vrot.lane.b32.xlu0 %v8247_v11, %s8141_s13  ;;  %v1487_v41 = vld [vmem:[#allocation2 + $0x48] sm:$0xf]  ;;  %v1489_v47 = vld [vmem:[#allocation2 + $0x58] sm:$0xf] }
  0x18   :  { %v2238_v52 = vld [vmem:[#allocation2 + $0x8] sm:$0xf]  ;;  %v2240_v6 = vld [vmem:[#allocation2 + $0x18] sm:$0xf] }
  0x1b   :  { %310 = vrot.lane.b32.xlu1 %v8263_v13, %s8142_s17  ;;  %308 = vrot.lane.b32.xlu0 %v8268_v14, %s8142_s17 }
  0x1f   :  { %241 = vrot.lane.b32.xlu1 %v8276_v16, %s8141_s13  ;;  %312 = vrot.lane.b32.xlu0 %v8281_v17, %s8142_s17 }
  0x23   :  { %314 = vrot.lane.b32.xlu1 %v8289_v18, %s8142_s17  ;;  %243 = vrot.lane.b32.xlu0 %v188_v19, %s8141_s13  ;;  %s8155_s17 = smov 96  }
  0x27   :  { %247 = vrot.lane.b32.xlu1 %v8297_v21, %s8141_s13  ;;  %239 = vrot.lane.b32.xlu0 %v8270_v15, %s8141_s13 }
  0x2b   :  { %245 = vrot.lane.b32.xlu1 %v8291_v20, %s8141_s13  ;;  %249 = vrot.lane.b32.xlu0 %v190_v22, %s8141_s13 }
  0x2f   :  { %253 = vrot.lane.b32.xlu0 %v8310_v24, %s8141_s13  ;;  %255 = vrot.lane.b32.xlu1 %v192_v25, %s8141_s13 }
  0x33   :  { %251 = vrot.lane.b32.xlu0 %v8303_v23, %s8141_s13  ;;  %259 = vrot.lane.b32.xlu1 %v8319_v27, %s8141_s13 }
  0x37   :  { %261 = vrot.lane.b32.xlu0 %v194_v28, %s8141_s13  ;;  %257 = vrot.lane.b32.xlu1 %v8312_v26, %s8141_s13  ;;  %s8151_s13 = smov 113  }
  0x3b   :  { %108 = vrot.lane.b32.xlu0 %v8247_v11, %s8143_s22  ;;  %110 = vrot.lane.b32.xlu1 %v59_v29, %s8143_s22  ;;  %v2242_v29 = vld [vmem:[#allocation2 + $0x28] sm:$0xf] }
  0x3f   :  { %106 = vrot.lane.b32.xlu0 %v8238_v8, %s8143_s22  ;;  %114 = vrot.lane.b32.xlu1 %v8252_v12, %s8143_s22 }
  0x43   :  { %116 = vrot.lane.b32.xlu0 %v61_v30, %s8143_s22  ;;  %112 = vrot.lane.b32.xlu1 %v8243_v10, %s8143_s22 }
  0x47   :  { %120 = vrot.lane.b32.xlu0 %v8276_v16, %s8143_s22  ;;  %122 = vrot.lane.b32.xlu1 %v63_v31, %s8143_s22 }
  0x4b   :  { %118 = vrot.lane.b32.xlu0 %v8270_v15, %s8143_s22  ;;  %126 = vrot.lane.b32.xlu1 %v8297_v21, %s8143_s22 }
  0x4f   :  { %128 = vrot.lane.b32.xlu0 %v65_v32, %s8143_s22  ;;  %124 = vrot.lane.b32.xlu1 %v8291_v20, %s8143_s22 }
  0x53   :  { %132 = vrot.lane.b32.xlu0 %v8310_v24, %s8143_s22  ;;  %134 = vrot.lane.b32.xlu1 %v67_v33, %s8143_s22 }
  0x57   :  { %130 = vrot.lane.b32.xlu0 %v8303_v23, %s8143_s22  ;;  %138 = vrot.lane.b32.xlu1 %v8319_v27, %s8143_s22 }
  0x5b   :  { %140 = vrot.lane.b32.xlu0 %v69_v34, %s8143_s22  ;;  %136 = vrot.lane.b32.xlu1 %v8312_v26, %s8143_s22 }
  0x5f   :  { %1524 = vrot.lane.b32.xlu0 %v8247_v11, %s8144_s23  ;;  %1526 = vrot.lane.b32.xlu1 %v1479_v35, %s8144_s23 }
  0x63   :  { %1522 = vrot.lane.b32.xlu0 %v8238_v8, %s8144_s23  ;;  %1530 = vrot.lane.b32.xlu1 %v8252_v12, %s8144_s23 }
  0x67   :  { %1532 = vrot.lane.b32.xlu0 %v1481_v36, %s8144_s23  ;;  %1528 = vrot.lane.b32.xlu1 %v8243_v10, %s8144_s23 }
  0x6b   :  { %1603 = vrot.lane.b32.xlu0 %v8268_v14, %s8145_s24  ;;  %1605 = vrot.lane.b32.xlu1 %v8263_v13, %s8145_s24 }
  0x6f   :  { %1607 = vrot.lane.b32.xlu0 %v8281_v17, %s8145_s24  ;;  %1536 = vrot.lane.b32.xlu1 %v8276_v16, %s8144_s23 }
  0x73   :  { %1538 = vrot.lane.b32.xlu0 %v1483_v37, %s8144_s23  ;;  %1609 = vrot.lane.b32.xlu1 %v8289_v18, %s8145_s24 }
  0x77   :  { %1534 = vrot.lane.b32.xlu0 %v8270_v15, %s8144_s23  ;;  %1542 = vrot.lane.b32.xlu1 %v8297_v21, %s8144_s23 }
  0x7b   :  { %1544 = vrot.lane.b32.xlu0 %v1485_v39, %s8144_s23  ;;  %1540 = vrot.lane.b32.xlu1 %v8291_v20, %s8144_s23 }
  0x7f   :  { %1548 = vrot.lane.b32.xlu0 %v8310_v24, %s8144_s23  ;;  %1550 = vrot.lane.b32.xlu1 %v1487_v41, %s8144_s23  ;;  %v57_v41 = vand.u32 15, %v8368_v42  ;;  %v8681_v42 = vld [vmem:[#allocation2 + $0x24] sm:$0xff] }
  0x81   :  { %v232_v44 = vpop.permute.xlu0 %231  ;;  %v228_v45 = vpop.permute.xlu1 %227  ;;  %vm8510_vm9 = vcmp.ge.s32.totalorder %v57_v41, 1 }
  0x82   :  { %vm8534_vm11 = vmand %vm8394_vm6, %vm8510_vm9 }
  0x83   :  { %1546 = vrot.lane.b32.xlu0 %v8303_v23, %s8144_s23  ;;  %1554 = vrot.lane.b32.xlu1 %v8319_v27, %s8144_s23 }
  0x85   :  { %v238_v48 = vpop.permute.xlu0 %237  ;;  %v234_v49 = vpop.permute.xlu1 %233 }
  0x87   :  { %1556 = vrot.lane.b32.xlu0 %v1489_v47, %s8144_s23  ;;  %1552 = vrot.lane.b32.xlu1 %v8312_v26, %s8144_s23 }
  0x89   :  { %v236_v53 = vpop.permute.xlu1 %235  ;;  %v230_v54 = vpop.permute.xlu0 %229 }
  0x8a   :  { %v265_v55 = vsel %vm263_vm4, %v230_v54, %v232_v44  ;;  %v267_v56 = vsel %vm263_vm4, %v236_v53, %v238_v48  ;;  %v266_v57 = vsel %vm263_vm4, %v234_v49, %v236_v53  ;;  %v264_v58 = vsel %vm263_vm4, %v228_v45, %v230_v54  ;;  %v2244_v44 = vld [vmem:[#allocation2 + $0x38] sm:$0xf]  ;;  %v2246_v54 = vld [vmem:[#allocation2 + $0x48] sm:$0xf] }
  0x8b   :  { %v289_v59 = vsel %vm8394_vm6, %v265_v55, 0.0  ;;  %v291_v60 = vsel %vm8394_vm6, %v267_v56, 0.0  ;;  %v290_v61 = vsel %vm8387_vm5, %v266_v57, 0.0  ;;  %v288_v62 = vsel %vm8387_vm5, %v264_v58, 0.0  ;;  %2285 = vrot.lane.b32.xlu0 %v8247_v11, %s8146_s25  ;;  %2287 = vrot.lane.b32.xlu1 %v2238_v52, %s8146_s25 }
  0x8c   :  { %7277 = vmatprep.subr.msk.mxu0 %vm325_vm7, %v289_v59  ;;  %7283 = vmatprep.subr.msk.mxu1 %vm325_vm7, %v291_v60  ;;  %v56_v49 = vand.u32 15, %v8362_v40 }
  0x8d   :  { %7284 = vmatpush1.msk.msra.mxu1 %vm325_vm7, %v290_v61  ;;  %v8416_v63 = vpop.permute.xlu1 %310  ;;  %7278 = vmatpush1.msk.msra.mxu0 %vm325_vm7, %v288_v62  ;;  %v8419_v3 = vpop.permute.xlu0 %308  ;;  %v8731_v61 = vld [vmem:[#allocation2 + $0x34] sm:$0xff] }
  0x8e   :  { %7279 = vmatmul.mubr.msk.f32.vlgmr.msra.gmra.mrb[0].mxu0 %vm316_vm8, %v8419_v3  ;;  %7285 = vmatmul.mubr.msk.f32.vlgmr.msra.gmra.mrb[0].mxu1 %vm316_vm8, %v8419_v3  ;;  %vm8543_vm12 = vcmp.ge.s32.totalorder %v56_v49, 1 }
  0x8f   :  { %402 = vmatprep.mubr.f32.mxu0 %v8140_v2  ;;  %497 = vmatprep.mubr.f32.mxu1 %v8140_v2  ;;  %vm8561_vm13 = vmand %vm8387_vm5, %vm8543_vm12 }
  0x90   :  { %2283 = vrot.lane.b32.xlu0 %v8238_v8, %s8146_s25  ;;  %2291 = vrot.lane.b32.xlu1 %v8252_v12, %s8146_s25 }
  0x91   :  { %v242_v4 = vpop.permute.xlu1 %241  ;;  %v8431_v5 = vpop.permute.xlu0 %312 }
  0x92   :  { %7280 = vmatmul.mubr.msk.f32.gmra.mrb[2].mxu0 %vm316_vm8, %v8416_v63  ;;  %7286 = vmatmul.mubr.msk.f32.gmra.mrb[2].mxu1 %vm316_vm8, %v8416_v63 }
  0x93   :  { %408 = vmatprep.mubr.f32.mxu0 %v8140_v2  ;;  %503 = vmatprep.mubr.f32.mxu1 %v8140_v2 }
  0x94   :  { %2293 = vrot.lane.b32.xlu0 %v2240_v6, %s8146_s25  ;;  %2289 = vrot.lane.b32.xlu1 %v8243_v10, %s8146_s25  ;;  %v2248_v6 = vld [vmem:[#allocation2 + $0x58] sm:$0xf] }
  0x95   :  { %v8442_v7 = vpop.permute.xlu1 %314  ;;  %v244_v8 = vpop.permute.xlu0 %243 }
  0x96   :  { %v269_v9 = vsel %vm263_vm4, %v242_v4, %v244_v8  ;;  %7281 = vmatmul.mubr.msk.f32.gmra.mrb[4].mxu0 %vm316_vm8, %v8431_v5  ;;  %7287 = vmatmul.mubr.msk.f32.gmra.mrb[4].mxu1 %vm316_vm8, %v8431_v5 }
  0x97   :  { %v293_v11 = vsel %vm8394_vm6, %v269_v9, 0.0  ;;  %414 = vmatprep.mubr.f32.mxu0 %v8140_v2  ;;  %509 = vmatprep.mubr.f32.mxu1 %v8140_v2 }
  0x98   :  { %7289 = vmatprep.subr.msk.mxu0 %vm325_vm7, %v293_v11  ;;  %2364 = vrot.lane.b32.xlu0 %v8268_v14, %s8147_s26 }
  0x99   :  { %v248_v10 = vpop.permute.xlu1 %247  ;;  %v240_v12 = vpop.permute.xlu0 %239  ;;  %2366 = vrot.lane.b32.xlu1 %v8263_v13, %s8147_s26 }
  0x9a   :  { %v268_v19 = vsel %vm263_vm4, %v240_v12, %v242_v4  ;;  %7282 = vmatmul.mubr.msk.f32.gmra.mrb[6].mxu0 %vm316_vm8, %v8442_v7  ;;  %7288 = vmatmul.mubr.msk.f32.gmra.mrb[6].mxu1 %vm316_vm8, %v8442_v7 }
  0x9b   :  { %v292_v22 = vsel %vm8387_vm5, %v268_v19, 0.0  ;;  %586 = vmatprep.mubr.f32.mxu0 %v8140_v2  ;;  %681 = vmatprep.mubr.f32.mxu1 %v8140_v2 }
  0x9c   :  { %7290 = vmatpush1.msk.msra.mxu0 %vm325_vm7, %v292_v22  ;;  %2368 = vrot.lane.b32.xlu0 %v8281_v17, %s8147_s26  ;;  %v3685_v22 = vld [vmem:[#allocation2 + $0xc] sm:$0xf] }
  0x9d   :  { %v246_v25 = vpop.permute.xlu1 %245  ;;  %v250_v28 = vpop.permute.xlu0 %249  ;;  %2297 = vrot.lane.b32.xlu1 %v8276_v16, %s8146_s25 }
  0x9e   :  { %v270_v30 = vsel %vm263_vm4, %v246_v25, %v248_v10  ;;  %v271_v31 = vsel %vm263_vm4, %v248_v10, %v250_v28  ;;  %7291 = vmatmul.mubr.msk.f32.vlgmr.msra.gmra.mrb[8].mxu0 %vm316_vm8, %v8419_v3  ;;  %v3687_v25 = vld [vmem:[#allocation2 + $0x1c] sm:$0xf] }
  0x9f   :  { %v294_v32 = vsel %vm8387_vm5, %v270_v30, 0.0  ;;  %v295_v33 = vsel %vm8394_vm6, %v271_v31, 0.0  ;;  %592 = vmatprep.mubr.f32.mxu0 %v8140_v2  ;;  %v8040_v31 = vpack.i.bf16 %v3687_v25, %v3685_v22 }
  0xa0   :  { %7295 = vmatprep.subr.msk.mxu1 %vm325_vm7, %v295_v33  ;;  %2299 = vrot.lane.b32.xlu0 %v2242_v29, %s8146_s25  ;;  %v3716_v29 = vcombine.high %v8203_v0, %v8203_v0 }
  0xa1   :  { %7296 = vmatpush1.msk.msra.mxu1 %vm325_vm7, %v294_v32  ;;  %v254_v16 = vpop.permute.xlu0 %253  ;;  %v256_v34 = vpop.permute.xlu1 %255  ;;  %2370 = vrot.lane.b32.xlu1 %v8289_v18, %s8147_s26 }
  0xa2   :  { %v273_v35 = vsel %vm263_vm4, %v254_v16, %v256_v34  ;;  %7292 = vmatmul.mubr.msk.f32.gmra.mrb[10].mxu0 %vm316_vm8, %v8416_v63  ;;  %7297 = vmatmul.mubr.msk.f32.vlgmr.msra.gmra.mrb[8].mxu1 %vm316_vm8, %v8419_v3 }
  0xa3   :  { %v297_v36 = vsel %vm8394_vm6, %v273_v35, 0.0  ;;  %598 = vmatprep.mubr.f32.mxu0 %v8140_v2  ;;  %687 = vmatprep.mubr.f32.mxu1 %v8140_v2 }
  0xa4   :  { %7301 = vmatprep.subr.msk.mxu0 %vm325_vm7, %v297_v36  ;;  %2295 = vrot.lane.b32.xlu0 %v8270_v15, %s8146_s25 }
  0xa5   :  { %v252_v37 = vpop.permute.xlu0 %251  ;;  %v260_v39 = vpop.permute.xlu1 %259  ;;  %2303 = vrot.lane.b32.xlu1 %v8297_v21, %s8146_s25 }
  0xa6   :  { %v272_v45 = vsel %vm263_vm4, %v252_v37, %v254_v16  ;;  %7293 = vmatmul.mubr.msk.f32.gmra.mrb[12].mxu0 %vm316_vm8, %v8431_v5  ;;  %7298 = vmatmul.mubr.msk.f32.gmra.mrb[10].mxu1 %vm316_vm8, %v8416_v63 }
  0xa7   :  { %v296_v47 = vsel %vm8387_vm5, %v272_v45, 0.0  ;;  %604 = vmatprep.mubr.f32.mxu0 %v8140_v2  ;;  %693 = vmatprep.mubr.f32.mxu1 %v8140_v2 }
  0xa8   :  { %7302 = vmatpush1.msk.msra.mxu0 %vm325_vm7, %v296_v47  ;;  %2305 = vrot.lane.b32.xlu0 %v2244_v44, %s8146_s25 }
  0xa9   :  { %v262_v15 = vpop.permute.xlu0 %261  ;;  %v258_v21 = vpop.permute.xlu1 %257  ;;  %2301 = vrot.lane.b32.xlu1 %v8291_v20, %s8146_s25  ;;  %v8729_v20 = vld [vmem:[%s10188_s1 + $0x18] sm:$0xff] }
  0xaa   :  { %v275_v52 = vsel %vm263_vm4, %v260_v39, %v262_v15  ;;  %v274_v53 = vsel %vm263_vm4, %v258_v21, %v260_v39  ;;  %7294 = vmatmul.mubr.msk.f32.gmra.mrb[14].mxu0 %vm316_vm8, %v8442_v7  ;;  %7299 = vmatmul.mubr.msk.f32.gmra.mrb[12].mxu1 %vm316_vm8, %v8431_v5 }
  0xab   :  { %v299_v55 = vsel %vm8394_vm6, %v275_v52, 0.0  ;;  %v298_v56 = vsel %vm8387_vm5, %v274_v53, 0.0  ;;  %699 = vmatprep.mubr.f32.mxu1 %v8140_v2  ;;  %776 = vmatprep.mubr.f32.mxu0 %v8140_v2  ;;  %v8662_v52 = vadd.s32 2, %v57_v41  ;;  %v8669_v53 = vld [vmem:[%s10188_s1 + $0x8] sm:$0xff] }
  0xac   :  { %7307 = vmatprep.subr.msk.mxu1 %vm325_vm7, %v299_v55  ;;  %2309 = vrot.lane.b32.xlu0 %v8310_v24, %s8146_s25  ;;  %v3689_v41 = vld [vmem:[#allocation2 + $0x2c] sm:$0xf]  ;;  %v3691_v55 = vld [vmem:[#allocation2 + $0x3c] sm:$0xf] }
  0xad   :  { %7308 = vmatpush1.msk.msra.mxu1 %vm325_vm7, %v298_v56  ;;  %v109_v57 = vpop.permute.xlu0 %108  ;;  %v111_v58 = vpop.permute.xlu1 %110  ;;  %2311 = vrot.lane.b32.xlu1 %v2246_v54, %s8146_s25  ;;  %v8674_v54 = vld [vmem:[%s10188_s1 + $0x10] sm:$0xff]  ;;  %vm1497_vm14 = vcmp.le.s32.totalorder %v8662_v52, 16 }
  0xae   :  { %7300 = vmatmul.mubr.msk.f32.gmra.mrb[14].mxu1 %vm316_vm8, %v8442_v7  ;;  %7303 = vmatmul.mubr.msk.f32.vlgmr.msra.gmra.mrb[16].mxu0 %vm316_vm8, %v8419_v3  ;;  %v144_v24 = vsel %vm142_vm10, %v109_v57, %v111_v58  ;;  %vm8712_vm0 = vmand %vm8394_vm6, %vm1497_vm14  ;;  %vm2319_vm6 = vcmask 7168  }
  0xaf   :  { %782 = vmatprep.mubr.f32.mxu0 %v8140_v2  ;;  %871 = vmatprep.mubr.f32.mxu1 %v8140_v2  ;;  %v168_v60 = vsel %vm8534_vm11, %v144_v24, 0.0  ;;  %v8694_v24 = vcombine.high %v8681_v42, %v8681_v42 }
  0xb0   :  { %7313 = vmatprep.subr.msk.mxu0 %vm325_vm7, %v168_v60  ;;  %2307 = vrot.lane.b32.xlu0 %v8303_v23, %s8146_s25  ;;  %v8045_v60 = vpack.i.bf16 %v3691_v55, %v3689_v41  ;;  %v8842_v41 = vld [vmem:[#allocation2 + $0x14] sm:$0xff] }
  0xb1   :  { %v107_v62 = vpop.permute.xlu0 %106  ;;  %v115_v4 = vpop.permute.xlu1 %114  ;;  %2315 = vrot.lane.b32.xlu1 %v8319_v27, %s8146_s25 }
  0xb2   :  { %7304 = vmatmul.mubr.msk.f32.gmra.mrb[18].mxu0 %vm316_vm8, %v8416_v63  ;;  %7309 = vmatmul.mubr.msk.f32.vlgmr.msra.gmra.mrb[16].mxu1 %vm316_vm8, %v8419_v3  ;;  %v143_v8 = vsel %vm142_vm10, %v107_v62, %v109_v57 }
  0xb3   :  { %788 = vmatprep.mubr.f32.mxu0 %v8140_v2  ;;  %877 = vmatprep.mubr.f32.mxu1 %v8140_v2  ;;  %v167_v23 = vsel %vm8561_vm13, %v143_v8, 0.0 }
  0xb4   :  { %7314 = vmatpush1.msk.msra.mxu0 %vm325_vm7, %v167_v23  ;;  %2317 = vrot.lane.b32.xlu0 %v2248_v6, %s8146_s25 }
  0xb5   :  { %v117_v27 = vpop.permute.xlu0 %116  ;;  %v113_v9 = vpop.permute.xlu1 %112  ;;  %2313 = vrot.lane.b32.xlu1 %v8312_v26, %s8146_s25 }
  0xb6   :  { %7305 = vmatmul.mubr.msk.f32.gmra.mrb[20].mxu0 %vm316_vm8, %v8431_v5  ;;  %7310 = vmatmul.mubr.msk.f32.gmra.mrb[18].mxu1 %vm316_vm8, %v8416_v63  ;;  %v146_v3 = vsel %vm142_vm10, %v115_v4, %v117_v27  ;;  %v145_v11 = vsel %vm142_vm10, %v113_v9, %v115_v4 }
  0xb7   :  { %794 = vmatprep.mubr.f32.mxu0 %v8140_v2  ;;  %883 = vmatprep.mubr.f32.mxu1 %v8140_v2  ;;  %v170_v10 = vsel %vm8534_vm11, %v146_v3, 0.0  ;;  %v169_v26 = vsel %vm8561_vm13, %v145_v11, 0.0  ;;  %v8739_v11 = vadd.s32 2, %v56_v49  ;;  %v8755_v49 = vld [vmem:[#allocation2 + $0x44] sm:$0xff] }
  0xb8   :  { %7319 = vmatprep.subr.msk.mxu1 %vm325_vm7, %v170_v10  ;;  %3050 = vrot.lane.b32.xlu0 %v8268_v14, %s8148_s27 }
  0xb9   :  { %7320 = vmatpush1.msk.msra.mxu1 %vm325_vm7, %v169_v26  ;;  %v121_v63 = vpop.permute.xlu0 %120  ;;  %v123_v12 = vpop.permute.xlu1 %122  ;;  %3052 = vrot.lane.b32.xlu1 %v8263_v13, %s8148_s27  ;;  %vm1496_vm1 = vcmp.le.s32.totalorder %v8739_v11, 16 }
  0xba   :  { %7306 = vmatmul.mubr.msk.f32.gmra.mrb[22].mxu0 %vm316_vm8, %v8442_v7  ;;  %7311 = vmatmul.mubr.msk.f32.gmra.mrb[20].mxu1 %vm316_vm8, %v8431_v5  ;;  %v148_v19 = vsel %vm142_vm10, %v121_v63, %v123_v12  ;;  %v3693_v12 = vld [vmem:[#allocation2 + $0x4c] sm:$0xf]  ;;  %vm8776_vm2 = vmand %vm8387_vm5, %vm1496_vm1 }
  0xbb   :  { %889 = vmatprep.mubr.f32.mxu1 %v8140_v2  ;;  %978 = vmatprep.mubr.f32.mxu0 %v8140_v2  ;;  %v172_v28 = vsel %vm8534_vm11, %v148_v19, 0.0  ;;  %v3695_v19 = vld [vmem:[#allocation2 + $0x5c] sm:$0xf] }
  0xbc   :  { %7325 = vmatprep.subr.msk.mxu0 %vm325_vm7, %v172_v28  ;;  %3054 = vrot.lane.b32.xlu0 %v8281_v17, %s8148_s27  ;;  %v8766_v28 = vcombine.high %v8755_v49, %v8755_v49 }
  0xbd   :  { %v119_v5 = vpop.permute.xlu0 %118  ;;  %v127_v30 = vpop.permute.xlu1 %126  ;;  %3056 = vrot.lane.b32.xlu1 %v8289_v18, %s8148_s27 }
  0xbe   :  { %7312 = vmatmul.mubr.msk.f32.gmra.mrb[22].mxu1 %vm316_vm8, %v8442_v7  ;;  %7315 = vmatmul.mubr.msk.f32.vlgmr.msra.gmra.mrb[0].mxu0 %vm316_vm8, %v8268_v14  ;;  %v147_v32 = vsel %vm142_vm10, %v119_v5, %v121_v63  ;;  %v3717_v7 = vcombine.high %v8208_v1, %v8208_v1  ;;  %v8749_v63 = vcombine.high %v8731_v61, %v8731_v61 }
  0xbf   :  { %984 = vmatprep.mubr.f32.mxu0 %v8140_v2  ;;  %1073 = vmatprep.mubr.f32.mxu1 %v8140_v2  ;;  %v171_v33 = vsel %vm8561_vm13, %v147_v32, 0.0  ;;  %v8782_v32 = vld [vmem:[#allocation2 + $0x54] sm:$0xff] }
  0xc0   :  { %7326 = vmatpush1.msk.msra.mxu0 %vm325_vm7, %v171_v33  ;;  %3724 = vrot.lane.b32.xlu0 %v3716_v29, %s8149_s28  ;;  %v8050_v29 = vpack.i.bf16 %v3695_v19, %v3693_v12  ;;  %v4444_v12 = vld [vmem:[#allocation2 + $0x3c] sm:$0xf] }
  0xc1   :  { %v129_v16 = vpop.permute.xlu0 %128  ;;  %v125_v34 = vpop.permute.xlu1 %124  ;;  %8041 = vrot.lane.b32.xlu1 %v8040_v31, %s8149_s28 }
  0xc2   :  { %7316 = vmatmul.mubr.msk.f32.gmra.mrb[2].mxu0 %vm316_vm8, %v8263_v13  ;;  %7321 = vmatmul.mubr.msk.f32.vlgmr.msra.gmra.mrb[0].mxu1 %vm316_vm8, %v8268_v14  ;;  %v150_v35 = vsel %vm142_vm10, %v127_v30, %v129_v16  ;;  %v149_v36 = vsel %vm142_vm10, %v125_v34, %v127_v30 }
  0xc3   :  { %990 = vmatprep.mubr.f32.mxu0 %v8140_v2  ;;  %1079 = vmatprep.mubr.f32.mxu1 %v8140_v2  ;;  %v174_v37 = vsel %vm8534_vm11, %v150_v35, 0.0  ;;  %v173_v39 = vsel %vm8561_vm13, %v149_v36, 0.0  ;;  %v8807_v36 = vld [vmem:[#allocation2 + $0x4] sm:$0xff] }
  0xc4   :  { %7331 = vmatprep.subr.msk.mxu1 %vm325_vm7, %v174_v37  ;;  %3722 = vrot.lane.b32.xlu0 %v8203_v0, %s8149_s28 }
  0xc5   :  { %7332 = vmatpush1.msk.msra.mxu1 %vm325_vm7, %v173_v39  ;;  %v133_v44 = vpop.permute.xlu0 %132  ;;  %v135_v45 = vpop.permute.xlu1 %134  ;;  %3730 = vrot.lane.b32.xlu1 %v3717_v7, %s8149_s28  ;;  %v8800_v7 = vcombine.high %v8782_v32, %v8782_v32 }
  0xc6   :  { %7317 = vmatmul.mubr.msk.f32.gmra.mrb[4].mxu0 %vm316_vm8, %v8281_v17  ;;  %7322 = vmatmul.mubr.msk.f32.gmra.mrb[2].mxu1 %vm316_vm8, %v8263_v13  ;;  %v152_v47 = vsel %vm142_vm10, %v133_v44, %v135_v45  ;;  %v8822_v45 = vcombine.high %v8807_v36, %v8807_v36 }
  0xc7   :  { %996 = vmatprep.mubr.f32.mxu0 %v8140_v2  ;;  %1085 = vmatprep.mubr.f32.mxu1 %v8140_v2  ;;  %v176_v0 = vsel %vm8534_vm11, %v152_v47, 0.0  ;;  %v4438_v47 = vld [vmem:[#allocation2 + $0xc] sm:$0xf] }
  0xc8   :  { %7337 = vmatprep.subr.msk.mxu0 %vm325_vm7, %v176_v0  ;;  %3728 = vrot.lane.b32.xlu0 %v8208_v1, %s8149_s28  ;;  %v4440_v0 = vld [vmem:[#allocation2 + $0x1c] sm:$0xf] }
  0xc9   :  { %v131_v15 = vpop.permute.xlu0 %130  ;;  %v139_v21 = vpop.permute.xlu1 %138  ;;  %3803 = vrot.lane.b32.xlu1 %v8268_v14, %s8150_s29 }
  0xca   :  { %7318 = vmatmul.mubr.msk.f32.gmra.mrb[6].mxu0 %vm316_vm8, %v8289_v18  ;;  %7323 = vmatmul.mubr.msk.f32.gmra.mrb[4].mxu1 %vm316_vm8, %v8281_v17  ;;  %v151_v1 = vsel %vm142_vm10, %v131_v15, %v133_v44 }
  0xcb   :  { %1091 = vmatprep.mubr.f32.mxu1 %v8140_v2  ;;  %1168 = vmatprep.mubr.f32.mxu0 %v8140_v2  ;;  %v175_v56 = vsel %vm8561_vm13, %v151_v1, 0.0  ;;  %v8055_v1 = vpack.i.bf16 %v4440_v0, %v4438_v47 }
  0xcc   :  { %3805 = vrot.lane.b32.xlu0 %v8669_v53, %s8150_s29 }
  0xcd   :  { %v141_v57 = vpop.permute.xlu0 %140  ;;  %v137_v58 = vpop.permute.xlu1 %136  ;;  %3807 = vrot.lane.b32.xlu1 %v8674_v54, %s8150_s29 }
  0xce   :  { %7324 = vmatmul.mubr.msk.f32.gmra.mrb[6].mxu1 %vm316_vm8, %v8289_v18  ;;  %7327 = vmatmul.mubr.msk.f32.vlgmr.msra.gmra.mrb[8].mxu0 %vm316_vm8, %v8268_v14  ;;  %v154_v62 = vsel %vm142_vm10, %v139_v21, %v141_v57  ;;  %v153_v4 = vsel %vm142_vm10, %v137_v58, %v139_v21 }
  0xcf   :  { %1174 = vmatprep.mubr.f32.mxu0 %v8140_v2  ;;  %1263 = vmatprep.mubr.f32.mxu1 %v8140_v2  ;;  %v178_v6 = vsel %vm8534_vm11, %v154_v62, 0.0  ;;  %v177_v23 = vsel %vm8561_vm13, %v153_v4, 0.0 }
  0xd0   :  { %7338 = vmatpush1.msk.msra.mxu0 %vm325_vm7, %v175_v56  ;;  %7343 = vmatprep.subr.msk.mxu1 %vm325_vm7, %v178_v6 }
  0xd1   :  { %v1525_v27 = vpop.permute.xlu0 %1524  ;;  %v1527_v9 = vpop.permute.xlu1 %1526  ;;  %3736 = vrot.lane.b32.xlu0 %v8694_v24, %s8149_s28  ;;  %8046 = vrot.lane.b32.xlu1 %v8045_v60, %s8149_s28 }
  0xd2   :  { %7328 = vmatmul.mubr.msk.f32.gmra.mrb[10].mxu0 %vm316_vm8, %v8263_v13  ;;  %7333 = vmatmul.mubr.msk.f32.vlgmr.msra.gmra.mrb[8].mxu1 %vm316_vm8, %v8268_v14  ;;  %v1560_v51 = vsel %vm1558_vm15, %v1525_v27, %v1527_v9 }
  0xd3   :  { %1180 = vmatprep.mubr.f32.mxu0 %v8140_v2  ;;  %1269 = vmatprep.mubr.f32.mxu1 %v8140_v2  ;;  %v1584_v3 = vsel %vm8712_vm0, %v1560_v51, 0.0 }
  0xd4   :  { %7344 = vmatpush1.msk.msra.mxu1 %vm325_vm7, %v177_v23  ;;  %7349 = vmatprep.subr.msk.mxu0 %vm325_vm7, %v1584_v3  ;;  %v8878_v23 = vld [vmem:[%s10188_s1] sm:$0xff]  ;;  %s8153_s1 = smov 100  }
  0xd5   :  { %v1523_v10 = vpop.permute.xlu0 %1522  ;;  %v1531_v26 = vpop.permute.xlu1 %1530  ;;  %3809 = vrot.lane.b32.xlu0 %v8729_v20, %s8150_s29  ;;  %3734 = vrot.lane.b32.xlu1 %v8681_v42, %s8149_s28 }
  0xd6   :  { %7329 = vmatmul.mubr.msk.f32.gmra.mrb[12].mxu0 %vm316_vm8, %v8281_v17  ;;  %7334 = vmatmul.mubr.msk.f32.gmra.mrb[10].mxu1 %vm316_vm8, %v8263_v13  ;;  %v1559_v30 = vsel %vm1558_vm15, %v1523_v10, %v1525_v27  ;;  %v2250_v10 = vadd.s32 1, %v8377_v46 }
  0xd7   :  { %1186 = vmatprep.mubr.f32.mxu0 %v8140_v2  ;;  %1275 = vmatprep.mubr.f32.mxu1 %v8140_v2  ;;  %v1583_v50 = vsel %vm8776_vm2, %v1559_v30, 0.0 }
  0xd8   :  { %vm2252_vm3 = vcmp.ge.s32.totalorder %v2250_v10, 1  ;;  %vm2254_vm4 = vcmp.le.s32.totalorder %v2250_v10, 16 }
  0xd9   :  { %v1533_v22 = vpop.permute.xlu0 %1532  ;;  %v1529_v25 = vpop.permute.xlu1 %1528  ;;  %3742 = vrot.lane.b32.xlu0 %v8749_v63, %s8149_s28  ;;  %3740 = vrot.lane.b32.xlu1 %v8731_v61, %s8149_s28  ;;  %vm8911_vm5 = vmand %vm2252_vm3, %vm2254_vm4 }
  0xda   :  { %7330 = vmatmul.mubr.msk.f32.gmra.mrb[14].mxu0 %vm316_vm8, %v8289_v18  ;;  %7335 = vmatmul.mubr.msk.f32.gmra.mrb[12].mxu1 %vm316_vm8, %v8281_v17  ;;  %v1562_v31 = vsel %vm1558_vm15, %v1531_v26, %v1533_v22  ;;  %v1561_v35 = vsel %vm1558_vm15, %v1529_v25, %v1531_v26  ;;  %v4442_v26 = vld [vmem:[#allocation2 + $0x2c] sm:$0xf]  ;;  %vm8932_vm10 = vmand %vm8911_vm5, %vm8510_vm9 }
  0xdb   :  { %1281 = vmatprep.mubr.f32.mxu1 %v8140_v2  ;;  %1358 = vmatprep.mubr.f32.mxu0 %v8140_v2  ;;  %v1586_v33 = vsel %vm8712_vm0, %v1562_v31, 0.0  ;;  %v1585_v37 = vsel %vm8776_vm2, %v1561_v35, 0.0  ;;  %vm9309_vm3 = vmand %vm8911_vm5, %vm1497_vm14 }
  0xdc   :  { %7355 = vmatprep.subr.msk.mxu1 %vm325_vm7, %v1586_v33 }
  0xdd   :  { %v8791_v16 = vpop.permute.xlu0 %1603  ;;  %v8793_v34 = vpop.permute.xlu1 %1605  ;;  %3748 = vrot.lane.b32.xlu0 %v8766_v28, %s8149_s28  ;;  %8051 = vrot.lane.b32.xlu1 %v8050_v29, %s8149_s28  ;;  %v8060_v29 = vpack.i.bf16 %v4444_v12, %v4442_v26 }
  0xde   :  { %7336 = vmatmul.mubr.msk.f32.gmra.mrb[14].mxu1 %vm316_vm8, %v8289_v18  ;;  %7339 = vmatmul.mubr.msk.f32.vlgmr.msra.gmra.mrb[16].mxu0 %vm316_vm8, %v8268_v14 }
  0xdf   :  { %1364 = vmatprep.mubr.f32.mxu0 %v8140_v2  ;;  %1453 = vmatprep.mubr.f32.mxu1 %v8140_v2 }
  0xe0   :  { %7350 = vmatpush1.msk.msra.mxu0 %vm325_vm7, %v1583_v50 }
  0xe1   :  { %v8814_v39 = vpop.permute.xlu0 %1607  ;;  %v1537_v44 = vpop.permute.xlu1 %1536  ;;  %3746 = vrot.lane.b32.xlu0 %v8755_v49, %s8149_s28  ;;  %3754 = vrot.lane.b32.xlu1 %v8800_v7, %s8149_s28 }
  0xe2   :  { %7340 = vmatmul.mubr.msk.f32.gmra.mrb[18].mxu0 %vm316_vm8, %v8263_v13  ;;  %7345 = vmatmul.mubr.msk.f32.vlgmr.msra.gmra.mrb[16].mxu1 %vm316_vm8, %v8268_v14 }
  0xe3   :  { %1370 = vmatprep.mubr.f32.mxu0 %v8140_v2  ;;  %1459 = vmatprep.mubr.f32.mxu1 %v8140_v2 }
  0xe4   :  { %7356 = vmatpush1.msk.msra.mxu1 %vm325_vm7, %v1585_v37 }
  0xe5   :  { %v1539_v15 = vpop.permute.xlu0 %1538  ;;  %v8831_v21 = vpop.permute.xlu1 %1609  ;;  %3752 = vrot.lane.b32.xlu0 %v8782_v32, %s8149_s28  ;;  %4485 = vrot.lane.b32.xlu1 %v8822_v45, %s8151_s13 }
  0xe6   :  { %7341 = vmatmul.mubr.msk.f32.gmra.mrb[20].mxu0 %vm316_vm8, %v8281_v17  ;;  %7346 = vmatmul.mubr.msk.f32.gmra.mrb[18].mxu1 %vm316_vm8, %v8263_v13  ;;  %v1564_v14 = vsel %vm1558_vm15, %v1537_v44, %v1539_v15  ;;  %v8854_v13 = vcombine.high %v8842_v41, %v8842_v41 }
  0xe7   :  { %1376 = vmatprep.mubr.f32.mxu0 %v8140_v2  ;;  %1465 = vmatprep.mubr.f32.mxu1 %v8140_v2  ;;  %v1588_v55 = vsel %vm8712_vm0, %v1564_v14, 0.0  ;;  %v4446_v14 = vld [vmem:[#allocation2 + $0x4c] sm:$0xf] }
  0xe8   :  { %7361 = vmatprep.subr.msk.mxu0 %vm325_vm7, %v1588_v55  ;;  %v4448_v55 = vld [vmem:[#allocation2 + $0x5c] sm:$0xf] }
  0xe9   :  { %v1535_v56 = vpop.permute.xlu0 %1534  ;;  %v1543_v57 = vpop.permute.xlu1 %1542  ;;  %8056 = vrot.lane.b32.xlu0 %v8055_v1, %s8151_s13  ;;  %4483 = vrot.lane.b32.xlu1 %v8807_v36, %s8151_s13 }
  0xea   :  { %7342 = vmatmul.mubr.msk.f32.gmra.mrb[22].mxu0 %vm316_vm8, %v8289_v18  ;;  %7347 = vmatmul.mubr.msk.f32.gmra.mrb[20].mxu1 %vm316_vm8, %v8281_v17  ;;  %v1563_v58 = vsel %vm1558_vm15, %v1535_v56, %v1537_v44 }
  0xeb   :  { %1471 = vmatprep.mubr.f32.mxu1 %v8140_v2  ;;  %1689 = vmatprep.mubr.f32.mxu0 %v8140_v2  ;;  %v1587_v60 = vsel %vm8776_vm2, %v1563_v58, 0.0 }
  0xed   :  { %v1545_v62 = vpop.permute.xlu0 %1544  ;;  %v1541_v4 = vpop.permute.xlu1 %1540  ;;  %4491 = vrot.lane.b32.xlu0 %v8854_v13, %s8151_s13  ;;  %4489 = vrot.lane.b32.xlu1 %v8842_v41, %s8151_s13 }
  0xee   :  { %7348 = vmatmul.mubr.msk.f32.gmra.mrb[22].mxu1 %vm316_vm8, %v8289_v18  ;;  %7351 = vmatmul.mubr.msk.f32.vlgmr.msra.gmra.mrb[0].mxu0 %vm316_vm8, %v8791_v16  ;;  %v1566_v17 = vsel %vm1558_vm15, %v1543_v57, %v1545_v62  ;;  %v1565_v6 = vsel %vm1558_vm15, %v1541_v4, %v1543_v57  ;;  %v2249_v57 = vadd.s32 1, %v8374_v43 }
  0xef   :  { %1695 = vmatprep.mubr.f32.mxu0 %v8140_v2  ;;  %1784 = vmatprep.mubr.f32.mxu1 %v8140_v2  ;;  %v1590_v27 = vsel %vm8712_vm0, %v1566_v17, 0.0  ;;  %v1589_v18 = vsel %vm8776_vm2, %v1565_v6, 0.0 }
  0xf0   :  { %7362 = vmatpush1.msk.msra.mxu0 %vm325_vm7, %v1587_v60  ;;  %7367 = vmatprep.subr.msk.mxu1 %vm325_vm7, %v1590_v27  ;;  %v8065_v60 = vpack.i.bf16 %v4448_v55, %v4446_v14  ;;  %vm2251_vm11 = vcmp.ge.s32.totalorder %v2249_v57, 1  ;;  %vm2253_vm13 = vcmp.le.s32.totalorder %v2249_v57, 16 }
  0xf1   :  { %v1549_v9 = vpop.permute.xlu0 %1548  ;;  %v1551_v51 = vpop.permute.xlu1 %1550  ;;  %4564 = vrot.lane.b32.xlu0 %v8878_v23, %s8152_s15  ;;  %4566 = vrot.lane.b32.xlu1 %v8669_v53, %s8152_s15 }
  0xf2   :  { %7352 = vmatmul.mubr.msk.f32.gmra.mrb[2].mxu0 %vm316_vm8, %v8793_v34  ;;  %7357 = vmatmul.mubr.msk.f32.vlgmr.msra.gmra.mrb[0].mxu1 %vm316_vm8, %v8791_v16  ;;  %v1568_v3 = vsel %vm1558_vm15, %v1549_v9, %v1551_v51  ;;  %v5201_v51 = vld [vmem:[#allocation2 + $0x1c] sm:$0xf] }
  0xf3   :  { %1701 = vmatprep.mubr.f32.mxu0 %v8140_v2  ;;  %1790 = vmatprep.mubr.f32.mxu1 %v8140_v2  ;;  %v1592_v19 = vsel %vm8712_vm0, %v1568_v3, 0.0 }
  0xf4   :  { %7368 = vmatpush1.msk.msra.mxu1 %vm325_vm7, %v1589_v18  ;;  %7373 = vmatprep.subr.msk.mxu0 %vm325_vm7, %v1592_v19 }
  0xf5   :  { %v1547_v22 = vpop.permute.xlu0 %1546  ;;  %v1555_v25 = vpop.permute.xlu1 %1554  ;;  %4568 = vrot.lane.b32.xlu0 %v8674_v54, %s8152_s15  ;;  %4497 = vrot.lane.b32.xlu1 %v8694_v24, %s8151_s13 }
  0xf6   :  { %7353 = vmatmul.mubr.msk.f32.gmra.mrb[4].mxu0 %vm316_vm8, %v8814_v39  ;;  %7358 = vmatmul.mubr.msk.f32.gmra.mrb[2].mxu1 %vm316_vm8, %v8793_v34  ;;  %v1567_v50 = vsel %vm1558_vm15, %v1547_v22, %v1549_v9  ;;  %v5199_v9 = vld [vmem:[#allocation2 + $0xc] sm:$0xf] }
  0xf7   :  { %1707 = vmatprep.mubr.f32.mxu0 %v8140_v2  ;;  %1796 = vmatprep.mubr.f32.mxu1 %v8140_v2  ;;  %v1591_v47 = vsel %vm8776_vm2, %v1567_v50, 0.0  ;;  %v8070_v19 = vpack.i.bf16 %v5201_v51, %v5199_v9  ;;  %v5207_v9 = vld [vmem:[#allocation2 + $0x4c] sm:$0xf]  ;;  %v5209_v51 = vld [vmem:[#allocation2 + $0x5c] sm:$0xf] }
  0xf9   :  { %v1557_v30 = vpop.permute.xlu0 %1556  ;;  %v1553_v31 = vpop.permute.xlu1 %1552  ;;  %8061 = vrot.lane.b32.xlu0 %v8060_v29, %s8151_s13  ;;  %4570 = vrot.lane.b32.xlu1 %v8729_v20, %s8152_s15  ;;  %s7269_s15 = sshll.u32 %s8159_s14, 4  ;;  %s7270_s15 = int_to_ptr.vmem [resolvable:$true] %s7269_s15 }
  0xfa   :  { %7354 = vmatmul.mubr.msk.f32.gmra.mrb[6].mxu0 %vm316_vm8, %v8831_v21  ;;  %7359 = vmatmul.mubr.msk.f32.gmra.mrb[4].mxu1 %vm316_vm8, %v8814_v39  ;;  %v1570_v35 = vsel %vm1558_vm15, %v1555_v25, %v1557_v30  ;;  %v1569_v8 = vsel %vm1558_vm15, %v1553_v31, %v1555_v25  ;;  %vm8975_vm15 = vmand %vm2251_vm11, %vm2253_vm13  ;;  %p8121_p1 = scmp.lt.s32.totalorder %s7270_s15, %s7270_s15 }
  0xfb   :  { %1802 = vmatprep.mubr.f32.mxu1 %v8140_v2  ;;  %1879 = vmatprep.mubr.f32.mxu0 %v8140_v2  ;;  %v1594_v37 = vsel %vm8712_vm0, %v1570_v35, 0.0  ;;  %v1593_v58 = vsel %vm8776_vm2, %v1569_v8, 0.0  ;;  %vm8995_vm0 = vmand %vm8975_vm15, %vm8543_vm12  ;;  %v5205_v8 = vld [vmem:[#allocation2 + $0x3c] sm:$0xf]  ;;  %vm3758_vm2 = vcmask 1039360  }
  0xfc   :  { %7379 = vmatprep.subr.msk.mxu1 %vm325_vm7, %v1594_v37  ;;  %vm9361_vm4 = vmand %vm8975_vm15, %vm1496_vm1 }
  0xfd   :  { %v2286_v0 = vpop.permute.xlu0 %2285  ;;  %v2288_v15 = vpop.permute.xlu1 %2287  ;;  %4495 = vrot.lane.b32.xlu0 %v8681_v42, %s8151_s13  ;;  %4503 = vrot.lane.b32.xlu1 %v8749_v63, %s8151_s13 }
  0xfe   :  { %7360 = vmatmul.mubr.msk.f32.gmra.mrb[6].mxu1 %vm316_vm8, %v8831_v21  ;;  %7363 = vmatmul.mubr.msk.f32.vlgmr.msra.gmra.mrb[8].mxu0 %vm316_vm8, %v8791_v16  ;;  %v2321_v1 = vsel %vm2319_vm6, %v2286_v0, %v2288_v15  ;;  %v5203_v15 = vld [vmem:[#allocation2 + $0x2c] sm:$0xf] }
  0xff   :  { %1885 = vmatprep.mubr.f32.mxu0 %v8140_v2  ;;  %1974 = vmatprep.mubr.f32.mxu1 %v8140_v2  ;;  %v2345_v56 = vsel %vm8932_vm10, %v2321_v1, 0.0  ;;  %v8075_v57 = vpack.i.bf16 %v5205_v8, %v5203_v15 }
 0x100   :  { %7374 = vmatpush1.msk.msra.mxu0 %vm325_vm7, %v1591_v47 }
 0x101   :  { %7385 = vmatprep.subr.msk.mxu0 %vm325_vm7, %v2345_v56  ;;  %4501 = vrot.lane.b32.xlu0 %v8731_v61, %s8151_s13 }
 0x102   :  { %7364 = vmatmul.mubr.msk.f32.gmra.mrb[10].mxu0 %vm316_vm8, %v8793_v34  ;;  %7369 = vmatmul.mubr.msk.f32.vlgmr.msra.gmra.mrb[8].mxu1 %vm316_vm8, %v8791_v16  ;;  %v2284_v62 = vpop.permute.xlu0 %2283  ;;  %v2292_v4 = vpop.permute.xlu1 %2291 }
 0x103   :  { %1891 = vmatprep.mubr.f32.mxu0 %v8140_v2  ;;  %1980 = vmatprep.mubr.f32.mxu1 %v8140_v2  ;;  %v2320_v10 = vsel %vm2319_vm6, %v2284_v62, %v2286_v0 }
 0x104   :  { %7380 = vmatpush1.msk.msra.mxu1 %vm325_vm7, %v1593_v58  ;;  %4509 = vrot.lane.b32.xlu1 %v8766_v28, %s8151_s13  ;;  %v2344_v22 = vsel %vm8995_vm0, %v2320_v10, 0.0 }
 0x105   :  { %8066 = vrot.lane.b32.xlu0 %v8065_v60, %s8151_s13 }
 0x106   :  { %7365 = vmatmul.mubr.msk.f32.gmra.mrb[12].mxu0 %vm316_vm8, %v8814_v39  ;;  %7370 = vmatmul.mubr.msk.f32.gmra.mrb[10].mxu1 %vm316_vm8, %v8793_v34  ;;  %v2294_v5 = vpop.permute.xlu0 %2293  ;;  %v2290_v17 = vpop.permute.xlu1 %2289 }
 0x107   :  { %1897 = vmatprep.mubr.f32.mxu0 %v8140_v2  ;;  %1986 = vmatprep.mubr.f32.mxu1 %v8140_v2  ;;  %v2323_v27 = vsel %vm2319_vm6, %v2292_v4, %v2294_v5  ;;  %v2322_v25 = vsel %vm2319_vm6, %v2290_v17, %v2292_v4 }
 0x108   :  { %v2347_v18 = vsel %vm8932_vm10, %v2323_v27, 0.0  ;;  %4507 = vrot.lane.b32.xlu1 %v8755_v49, %s8151_s13  ;;  %v2346_v31 = vsel %vm8995_vm0, %v2322_v25, 0.0 }
 0x109   :  { %7391 = vmatprep.subr.msk.mxu1 %vm325_vm7, %v2347_v18  ;;  %4515 = vrot.lane.b32.xlu0 %v8800_v7, %s8151_s13 }
 0x10a   :  { %7366 = vmatmul.mubr.msk.f32.gmra.mrb[14].mxu0 %vm316_vm8, %v8831_v21  ;;  %7371 = vmatmul.mubr.msk.f32.gmra.mrb[12].mxu1 %vm316_vm8, %v8814_v39  ;;  %v9000_v26 = vpop.permute.xlu0 %2364 }
 0x10b   :  { %1992 = vmatprep.mubr.f32.mxu1 %v8140_v2  ;;  %2069 = vmatprep.mubr.f32.mxu0 %v8140_v2  ;;  %v9004_v12 = vpop.permute.xlu1 %2366 }
 0x10c   :  { %4513 = vrot.lane.b32.xlu1 %v8782_v32, %s8151_s13 }
 0x10d   :  { %5238 = vrot.lane.b32.xlu0 %v8822_v45, %s8148_s27 }
 0x10e   :  { %7372 = vmatmul.mubr.msk.f32.gmra.mrb[14].mxu1 %vm316_vm8, %v8831_v21  ;;  %7375 = vmatmul.mubr.msk.f32.vlgmr.msra.gmra.mrb[16].mxu0 %vm316_vm8, %v8791_v16  ;;  %v9017_v29 = vpop.permute.xlu0 %2368 }
 0x10f   :  { %2075 = vmatprep.mubr.f32.mxu0 %v8140_v2  ;;  %2164 = vmatprep.mubr.f32.mxu1 %v8140_v2  ;;  %v2298_v30 = vpop.permute.xlu1 %2297 }
 0x110   :  { %7386 = vmatpush1.msk.msra.mxu0 %vm325_vm7, %v2344_v22  ;;  %8071 = vrot.lane.b32.xlu1 %v8070_v19, %s8148_s27  ;;  %v8080_v22 = vpack.i.bf16 %v5209_v51, %v5207_v9 }
 0x111   :  { %5236 = vrot.lane.b32.xlu0 %v8807_v36, %s8148_s27 }
 0x112   :  { %7376 = vmatmul.mubr.msk.f32.gmra.mrb[18].mxu0 %vm316_vm8, %v8793_v34  ;;  %7381 = vmatmul.mubr.msk.f32.vlgmr.msra.gmra.mrb[16].mxu1 %vm316_vm8, %v8791_v16  ;;  %v2300_v50 = vpop.permute.xlu0 %2299 }
 0x113   :  { %2081 = vmatprep.mubr.f32.mxu0 %v8140_v2  ;;  %2170 = vmatprep.mubr.f32.mxu1 %v8140_v2  ;;  %v2325_v35 = vsel %vm2319_vm6, %v2298_v30, %v2300_v50  ;;  %v9034_v37 = vpop.permute.xlu1 %2370  ;;  %v3031_v50 = vsel %vm8911_vm5, %v8822_v45, 0.0 }
 0x114   :  { %7392 = vmatpush1.msk.msra.mxu1 %vm325_vm7, %v2346_v31  ;;  %v2349_v47 = vsel %vm8932_vm10, %v2325_v35, 0.0  ;;  %5244 = vrot.lane.b32.xlu1 %v8854_v13, %s8148_s27 }
 0x115   :  { %7397 = vmatprep.subr.msk.mxu0 %vm325_vm7, %v2349_v47  ;;  %5242 = vrot.lane.b32.xlu0 %v8842_v41, %s8148_s27  ;;  %v5952_v47 = vld [vmem:[#allocation2 + $0xc] sm:$0xf] }
 0x116   :  { %7377 = vmatmul.mubr.msk.f32.gmra.mrb[20].mxu0 %vm316_vm8, %v8814_v39  ;;  %7382 = vmatmul.mubr.msk.f32.gmra.mrb[18].mxu1 %vm316_vm8, %v8793_v34  ;;  %v2296_v16 = vpop.permute.xlu0 %2295 }
 0x117   :  { %2087 = vmatprep.mubr.f32.mxu0 %v8140_v2  ;;  %2176 = vmatprep.mubr.f32.mxu1 %v8140_v2  ;;  %v2304_v0 = vpop.permute.xlu1 %2303  ;;  %v2324_v34 = vsel %vm2319_vm6, %v2296_v16, %v2298_v30  ;;  %v5954_v16 = vld [vmem:[#allocation2 + $0x1c] sm:$0xf] }
 0x118   :  { %5317 = vrot.lane.b32.xlu1 %v8878_v23, %s8153_s1  ;;  %v8085_v3 = vpack.i.bf16 %v5954_v16, %v5952_v47 }
 0x119   :  { %5319 = vrot.lane.b32.xlu0 %v8669_v53, %s8153_s1 }
 0x11a   :  { %7378 = vmatmul.mubr.msk.f32.gmra.mrb[22].mxu0 %vm316_vm8, %v8831_v21  ;;  %7383 = vmatmul.mubr.msk.f32.gmra.mrb[20].mxu1 %vm316_vm8, %v8814_v39  ;;  %v2306_v1 = vpop.permute.xlu0 %2305  ;;  %v2348_v39 = vsel %vm8995_vm0, %v2324_v34, 0.0  ;;  %v3030_v34 = vsel %vm8975_vm15, %v8807_v36, 0.0 }
 0x11b   :  { %2182 = vmatprep.mubr.f32.mxu1 %v8140_v2  ;;  %2450 = vmatprep.mubr.f32.mxu0 %v8140_v2  ;;  %v2327_v14 = vsel %vm2319_vm6, %v2304_v0, %v2306_v1  ;;  %v2302_v55 = vpop.permute.xlu1 %2301  ;;  %v3035_v1 = vsel %vm8911_vm5, %v8694_v24, 0.0 }
 0x11c   :  { %v2351_v56 = vsel %vm8932_vm10, %v2327_v14, 0.0  ;;  %5321 = vrot.lane.b32.xlu1 %v8674_v54, %s8153_s1  ;;  %v2326_v58 = vsel %vm2319_vm6, %v2302_v55, %v2304_v0  ;;  %v3033_v0 = vsel %vm8911_vm5, %v8854_v13, 0.0  ;;  %v5956_v55 = vld [vmem:[#allocation2 + $0x2c] sm:$0xf] }
 0x11d   :  { %7403 = vmatprep.subr.msk.mxu1 %vm325_vm7, %v2351_v56  ;;  %5250 = vrot.lane.b32.xlu0 %v8694_v24, %s8148_s27  ;;  %v5958_v56 = vld [vmem:[#allocation2 + $0x3c] sm:$0xf] }
 0x11e   :  { %7384 = vmatmul.mubr.msk.f32.gmra.mrb[22].mxu1 %vm316_vm8, %v8831_v21  ;;  %7387 = vmatmul.mubr.msk.f32.vlgmr.msra.gmra.mrb[0].mxu0 %vm316_vm8, %v9000_v26  ;;  %v2310_v60 = vpop.permute.xlu0 %2309  ;;  %v2350_v21 = vsel %vm8995_vm0, %v2326_v58, 0.0  ;;  %v3041_v58 = vsel %vm8911_vm5, %v8800_v7, 0.0 }
 0x11f   :  { %2456 = vmatprep.mubr.f32.mxu0 %v8140_v2  ;;  %2545 = vmatprep.mubr.f32.mxu1 %v8140_v2  ;;  %v2312_v62 = vpop.permute.xlu1 %2311 }
 0x120   :  { %7398 = vmatpush1.msk.msra.mxu0 %vm325_vm7, %v2348_v39  ;;  %v2329_v4 = vsel %vm2319_vm6, %v2310_v60, %v2312_v62  ;;  %8076 = vrot.lane.b32.xlu1 %v8075_v57, %s8148_s27  ;;  %v8090_v57 = vpack.i.bf16 %v5958_v56, %v5956_v55  ;;  %v3036_v39 = vsel %vm8975_vm15, %v8731_v61, 0.0 }
 0x121   :  { %v2353_v5 = vsel %vm8932_vm10, %v2329_v4, 0.0  ;;  %5323 = vrot.lane.b32.xlu0 %v8729_v20, %s8153_s1 }
 0x122   :  { %7388 = vmatmul.mubr.msk.f32.gmra.mrb[2].mxu0 %vm316_vm8, %v9004_v12  ;;  %7393 = vmatmul.mubr.msk.f32.vlgmr.msra.gmra.mrb[0].mxu1 %vm316_vm8, %v9000_v26  ;;  %v2308_v17 = vpop.permute.xlu0 %2307 }
 0x123   :  { %2462 = vmatprep.mubr.f32.mxu0 %v8140_v2  ;;  %2551 = vmatprep.mubr.f32.mxu1 %v8140_v2  ;;  %v2316_v27 = vpop.permute.xlu1 %2315  ;;  %v2328_v25 = vsel %vm2319_vm6, %v2308_v17, %v2310_v60  ;;  %v3038_v17 = vsel %vm8975_vm15, %v8755_v49, 0.0 }
 0x124   :  { %7404 = vmatpush1.msk.msra.mxu1 %vm325_vm7, %v2350_v21  ;;  %7409 = vmatprep.subr.msk.mxu0 %vm325_vm7, %v2353_v5  ;;  %v2352_v30 = vsel %vm8995_vm0, %v2328_v25, 0.0 }
 0x125   :  { %5248 = vrot.lane.b32.xlu1 %v8681_v42, %s8148_s27  ;;  %5256 = vrot.lane.b32.xlu0 %v8749_v63, %s8148_s27 }
 0x126   :  { %7389 = vmatmul.mubr.msk.f32.gmra.mrb[4].mxu0 %vm316_vm8, %v9017_v29  ;;  %7394 = vmatmul.mubr.msk.f32.gmra.mrb[2].mxu1 %vm316_vm8, %v9004_v12  ;;  %v2318_v18 = vpop.permute.xlu0 %2317 }
 0x127   :  { %2468 = vmatprep.mubr.f32.mxu0 %v8140_v2  ;;  %2557 = vmatprep.mubr.f32.mxu1 %v8140_v2  ;;  %v2331_v10 = vsel %vm2319_vm6, %v2316_v27, %v2318_v18  ;;  %v2314_v44 = vpop.permute.xlu1 %2313 }
 0x128   :  { %v2355_v19 = vsel %vm8932_vm10, %v2331_v10, 0.0  ;;  %v2330_v31 = vsel %vm2319_vm6, %v2314_v44, %v2316_v27  ;;  %vm4519_vm10 = vcmask 924672  }
 0x129   :  { %7415 = vmatprep.subr.msk.mxu1 %vm325_vm7, %v2355_v19  ;;  %5254 = vrot.lane.b32.xlu1 %v8731_v61, %s8148_s27  ;;  %v2354_v35 = vsel %vm8995_vm0, %v2330_v31, 0.0 }
 0x12a   :  { %7390 = vmatmul.mubr.msk.f32.gmra.mrb[6].mxu0 %vm316_vm8, %v9034_v37  ;;  %7395 = vmatmul.mubr.msk.f32.gmra.mrb[4].mxu1 %vm316_vm8, %v9017_v29  ;;  %v9160_v15 = vpop.permute.xlu0 %3050 }
 0x12b   :  { %2563 = vmatprep.mubr.f32.mxu1 %v8140_v2  ;;  %2640 = vmatprep.mubr.f32.mxu0 %v8140_v2  ;;  %v9175_v8 = vpop.permute.xlu1 %3052 }
 0x12c   :  { %5262 = vrot.lane.b32.xlu0 %v8766_v28, %s8148_s27 }
 0x12d   :  { %8081 = vrot.lane.b32.xlu1 %v8080_v22, %s8148_s27 }
 0x12e   :  { %7396 = vmatmul.mubr.msk.f32.gmra.mrb[6].mxu1 %vm316_vm8, %v9034_v37  ;;  %7399 = vmatmul.mubr.msk.f32.vlgmr.msra.gmra.mrb[8].mxu0 %vm316_vm8, %v9000_v26 }
 0x12f   :  { %2646 = vmatprep.mubr.f32.mxu0 %v8140_v2  ;;  %2735 = vmatprep.mubr.f32.mxu1 %v8140_v2 }
 0x130   :  { %7410 = vmatpush1.msk.msra.mxu0 %vm325_vm7, %v2352_v30  ;;  %5260 = vrot.lane.b32.xlu0 %v8755_v49, %s8148_s27 }
 0x131   :  { %7421 = vmatprep.subr.msk.mxu0 %vm325_vm7, %v3031_v50  ;;  %5268 = vrot.lane.b32.xlu1 %v8800_v7, %s8148_s27 }
 0x132   :  { %7400 = vmatmul.mubr.msk.f32.gmra.mrb[10].mxu0 %vm316_vm8, %v9004_v12  ;;  %7405 = vmatmul.mubr.msk.f32.vlgmr.msra.gmra.mrb[8].mxu1 %vm316_vm8, %v9000_v26 }
 0x133   :  { %2652 = vmatprep.mubr.f32.mxu0 %v8140_v2  ;;  %2741 = vmatprep.mubr.f32.mxu1 %v8140_v2 }
 0x134   :  { %7416 = vmatpush1.msk.msra.mxu1 %vm325_vm7, %v2354_v35  ;;  %5266 = vrot.lane.b32.xlu0 %v8782_v32, %s8148_s27 }
 0x135   :  { %7427 = vmatprep.subr.msk.mxu1 %vm325_vm7, %v3033_v0  ;;  %5991 = vrot.lane.b32.xlu1 %v8822_v45, %s8154_s16  ;;  %v9171_v45 = vpop.permute.xlu0 %3054 }
 0x136   :  { %7401 = vmatmul.mubr.msk.f32.gmra.mrb[12].mxu0 %vm316_vm8, %v9017_v29  ;;  %7406 = vmatmul.mubr.msk.f32.gmra.mrb[10].mxu1 %vm316_vm8, %v9004_v12 }
 0x137   :  { %2658 = vmatprep.mubr.f32.mxu0 %v8140_v2  ;;  %2747 = vmatprep.mubr.f32.mxu1 %v8140_v2 }
 0x138   :  { %8086 = vrot.lane.b32.xlu0 %v8085_v3, %s8154_s16 }
 0x139   :  { %5989 = vrot.lane.b32.xlu1 %v8807_v36, %s8154_s16  ;;  %v9191_v14 = vpop.permute.xlu0 %3724  ;;  %v9196_v36 = vpop.permute.xlu1 %3056 }
 0x13a   :  { %7402 = vmatmul.mubr.msk.f32.gmra.mrb[14].mxu0 %vm316_vm8, %v9034_v37  ;;  %7407 = vmatmul.mubr.msk.f32.gmra.mrb[12].mxu1 %vm316_vm8, %v9017_v29 }
 0x13b   :  { %2753 = vmatprep.mubr.f32.mxu1 %v8140_v2  ;;  %2830 = vmatprep.mubr.f32.mxu0 %v8140_v2 }
 0x13c   :  { %5997 = vrot.lane.b32.xlu0 %v8854_v13, %s8154_s16  ;;  %v3032_v13 = vsel %vm8975_vm15, %v8842_v41, 0.0 }
 0x13d   :  { %5995 = vrot.lane.b32.xlu1 %v8842_v41, %s8154_s16  ;;  %v9214_v41 = vpop.permute.xlu1 %8041 }
 0x13e   :  { %7408 = vmatmul.mubr.msk.f32.gmra.mrb[14].mxu1 %vm316_vm8, %v9034_v37  ;;  %7411 = vmatmul.mubr.msk.f32.vlgmr.msra.gmra.mrb[16].mxu0 %vm316_vm8, %v9000_v26  ;;  %v8043_v60 = vunpack.i.l.bf16 %v9214_v41  ;;  %v8044_v62 = vunpack.i.h.bf16 %v9214_v41 }
 0x13f   :  { %2836 = vmatprep.mubr.f32.mxu0 %v8140_v2  ;;  %2925 = vmatprep.mubr.f32.mxu1 %v8140_v2 }
 0x140   :  { %7422 = vmatpush1.msk.msra.mxu0 %vm325_vm7, %v3030_v34  ;;  %6070 = vrot.lane.b32.xlu0 %v8878_v23, %s8155_s17  ;;  %v3037_v23 = vsel %vm8911_vm5, %v8749_v63, 0.0  ;;  %v3760_v4 = vsel %vm3758_vm2, %v9191_v14, %v8043_v60 }
 0x141   :  { %7433 = vmatprep.subr.msk.mxu0 %vm325_vm7, %v3035_v1  ;;  %6072 = vrot.lane.b32.xlu1 %v8669_v53, %s8155_s17  ;;  %v9216_v53 = vpop.permute.xlu0 %3722  ;;  %v3784_v33 = vsel %vm9309_vm3, %v3760_v4, 0.0 }
 0x142   :  { %7412 = vmatmul.mubr.msk.f32.gmra.mrb[18].mxu0 %vm316_vm8, %v9004_v12  ;;  %7417 = vmatmul.mubr.msk.f32.vlgmr.msra.gmra.mrb[16].mxu1 %vm316_vm8, %v9000_v26  ;;  %v5960_v26 = vld [vmem:[#allocation2 + $0x4c] sm:$0xf]  ;;  %v3759_v25 = vsel %vm3758_vm2, %v9216_v53, %v9191_v14 }
 0x143   :  { %2842 = vmatprep.mubr.f32.mxu0 %v8140_v2  ;;  %2931 = vmatprep.mubr.f32.mxu1 %v8140_v2  ;;  %v3783_v6 = vsel %vm9361_vm4, %v3759_v25, 0.0 }
 0x144   :  { %7428 = vmatpush1.msk.msra.mxu1 %vm325_vm7, %v3032_v13  ;;  %6074 = vrot.lane.b32.xlu0 %v8674_v54, %s8155_s17  ;;  %v9234_v54 = vpop.permute.xlu1 %3730 }
 0x145   :  { %7439 = vmatprep.subr.msk.mxu1 %vm325_vm7, %v3037_v23  ;;  %6003 = vrot.lane.b32.xlu1 %v8694_v24, %s8154_s16  ;;  %v9236_v24 = vpop.permute.xlu0 %3728  ;;  %v3762_v27 = vsel %vm3758_vm2, %v9234_v54, %v8044_v62 }
 0x146   :  { %7413 = vmatmul.mubr.msk.f32.gmra.mrb[20].mxu0 %vm316_vm8, %v9017_v29  ;;  %7418 = vmatmul.mubr.msk.f32.gmra.mrb[18].mxu1 %vm316_vm8, %v9004_v12  ;;  %v5962_v12 = vld [vmem:[#allocation2 + $0x5c] sm:$0xf]  ;;  %v3786_v18 = vsel %vm9309_vm3, %v3762_v27, 0.0  ;;  %v3761_v35 = vsel %vm3758_vm2, %v9236_v24, %v9234_v54  ;;  %v4449_v27 = vadd.s32 2, %v8374_v43 }
 0x147   :  { %2848 = vmatprep.mubr.f32.mxu0 %v8140_v2  ;;  %2937 = vmatprep.mubr.f32.mxu1 %v8140_v2  ;;  %v3785_v34 = vsel %vm9361_vm4, %v3761_v35, 0.0 }
 0x148   :  { %8091 = vrot.lane.b32.xlu0 %v8090_v57, %s8154_s16 }
 0x149   :  { %6076 = vrot.lane.b32.xlu1 %v8729_v20, %s8155_s17  ;;  %v3034_v20 = vsel %vm8975_vm15, %v8681_v42, 0.0 }
 0x14a   :  { %7414 = vmatmul.mubr.msk.f32.gmra.mrb[22].mxu0 %vm316_vm8, %v9034_v37  ;;  %7419 = vmatmul.mubr.msk.f32.gmra.mrb[20].mxu1 %vm316_vm8, %v9017_v29  ;;  %v3039_v29 = vsel %vm8911_vm5, %v8766_v28, 0.0 }
 0x14b   :  { %2943 = vmatprep.mubr.f32.mxu1 %v8140_v2  ;;  %3136 = vmatprep.mubr.f32.mxu0 %v8140_v2 }
 0x14c   :  { %6001 = vrot.lane.b32.xlu0 %v8681_v42, %s8154_s16  ;;  %v9257_v42 = vpop.permute.xlu1 %3803 }
 0x14d   :  { %6009 = vrot.lane.b32.xlu1 %v8749_v63, %s8154_s16  ;;  %v9259_v63 = vpop.permute.xlu0 %3805 }
 0x14e   :  { %7420 = vmatmul.mubr.msk.f32.gmra.mrb[22].mxu1 %vm316_vm8, %v9034_v37  ;;  %7423 = vmatmul.mubr.msk.f32.vlgmr.msra.gmra.mrb[0].mxu0 %vm316_vm8, %v9160_v15  ;;  %v8095_v37 = vpack.i.bf16 %v5962_v12, %v5960_v26 }
 0x14f   :  { %3142 = vmatprep.mubr.f32.mxu0 %v8140_v2  ;;  %3231 = vmatprep.mubr.f32.mxu1 %v8140_v2 }
 0x150   :  { %7434 = vmatpush1.msk.msra.mxu0 %vm325_vm7, %v3034_v20  ;;  %6007 = vrot.lane.b32.xlu0 %v8731_v61, %s8154_s16  ;;  %v9287_v61 = vpop.permute.xlu1 %3807  ;;  %v4450_v20 = vadd.s32 2, %v8377_v46 }
 0x151   :  { %7445 = vmatprep.subr.msk.mxu0 %vm325_vm7, %v3039_v29  ;;  %6015 = vrot.lane.b32.xlu1 %v8766_v28, %s8154_s16  ;;  %v9289_v28 = vpop.permute.xlu0 %3736 }
 0x152   :  { %7424 = vmatmul.mubr.msk.f32.gmra.mrb[2].mxu0 %vm316_vm8, %v9175_v8  ;;  %7429 = vmatmul.mubr.msk.f32.vlgmr.msra.gmra.mrb[0].mxu1 %vm316_vm8, %v9160_v15  ;;  %vm4452_vm5 = vcmp.ge.s32.totalorder %v4450_v20, 1  ;;  %vm4454_vm6 = vcmp.le.s32.totalorder %v4450_v20, 16 }
 0x153   :  { %3148 = vmatprep.mubr.f32.mxu0 %v8140_v2  ;;  %3237 = vmatprep.mubr.f32.mxu1 %v8140_v2  ;;  %vm9471_vm11 = vmand %vm4452_vm5, %vm4454_vm6  ;;  %vm6976_vm5 = vcmask 261312   ;;  %vm7073_vm6 = vcmask 1041409  }
 0x154   :  { %7440 = vmatpush1.msk.msra.mxu1 %vm325_vm7, %v3036_v39  ;;  %8096 = vrot.lane.b32.xlu0 %v8095_v37, %s8154_s16  ;;  %v8047_v21 = vpop.permute.xlu1 %8046  ;;  %vm9493_vm13 = vmand %vm9471_vm11, %vm8510_vm9  ;;  %vm4451_vm9 = vcmp.ge.s32.totalorder %v4449_v27, 1 }
 0x155   :  { %7451 = vmatprep.subr.msk.mxu1 %vm325_vm7, %v3041_v58  ;;  %6013 = vrot.lane.b32.xlu1 %v8755_v49, %s8154_s16  ;;  %v9315_v5 = vpop.permute.xlu0 %3809  ;;  %v3040_v49 = vsel %vm8975_vm15, %v8782_v32, 0.0  ;;  %v8048_v19 = vunpack.i.l.bf16 %v8047_v21  ;;  %v8049_v30 = vunpack.i.h.bf16 %v8047_v21  ;;  %vm4453_vm15 = vcmp.le.s32.totalorder %v4449_v27, 16 }
 0x156   :  { %7425 = vmatmul.mubr.msk.f32.gmra.mrb[4].mxu0 %vm316_vm8, %v9171_v45  ;;  %7430 = vmatmul.mubr.msk.f32.gmra.mrb[2].mxu1 %vm316_vm8, %v9175_v8  ;;  %vm9537_vm0 = vmand %vm4451_vm9, %vm4453_vm15  ;;  %vm7077_vm9 = vcmask 1043459   ;;  %vm7079_vm15 = vcmask 1044484  }
 0x157   :  { %3154 = vmatprep.mubr.f32.mxu0 %v8140_v2  ;;  %3243 = vmatprep.mubr.f32.mxu1 %v8140_v2  ;;  %v3764_v31 = vsel %vm3758_vm2, %v9289_v28, %v8048_v19 }
 0x158   :  { %6021 = vrot.lane.b32.xlu0 %v8800_v7, %s8154_s16  ;;  %v3735_v9 = vpop.permute.xlu1 %3734  ;;  %v3788_v47 = vsel %vm9309_vm3, %v3764_v31, 0.0 }
 0x159   :  { %6019 = vrot.lane.b32.xlu1 %v8782_v32, %s8154_s16  ;;  %v3743_v51 = vpop.permute.xlu0 %3742  ;;  %v3763_v56 = vsel %vm3758_vm2, %v3735_v9, %v9289_v28 }
 0x15a   :  { %7426 = vmatmul.mubr.msk.f32.gmra.mrb[6].mxu0 %vm316_vm8, %v9196_v36  ;;  %7431 = vmatmul.mubr.msk.f32.gmra.mrb[4].mxu1 %vm316_vm8, %v9171_v45  ;;  %v3766_v0 = vsel %vm3758_vm2, %v3743_v51, %v8049_v30  ;;  %v3787_v53 = vsel %vm9361_vm4, %v3763_v56, 0.0 }
 0x15b   :  { %3249 = vmatprep.mubr.f32.mxu1 %v8140_v2  ;;  %3326 = vmatprep.mubr.f32.mxu0 %v8140_v2  ;;  %v3790_v1 = vsel %vm9309_vm3, %v3766_v0, 0.0 }
 0x15c   :  { %v3741_v32 = vpop.permute.xlu1 %3740 }
 0x15d   :  { %v9349_v10 = vpop.permute.xlu0 %3748 }
 0x15e   :  { %7432 = vmatmul.mubr.msk.f32.gmra.mrb[6].mxu1 %vm316_vm8, %v9196_v36  ;;  %7435 = vmatmul.mubr.msk.f32.vlgmr.msra.gmra.mrb[8].mxu0 %vm316_vm8, %v9160_v15 }
 0x15f   :  { %3332 = vmatprep.mubr.f32.mxu0 %v8140_v2  ;;  %3421 = vmatprep.mubr.f32.mxu1 %v8140_v2 }
 0x160   :  { %7446 = vmatpush1.msk.msra.mxu0 %vm325_vm7, %v3038_v17  ;;  %v8052_v44 = vpop.permute.xlu1 %8051 }
 0x161   :  { %7457 = vmatprep.subr.msk.mxu0 %vm325_vm7, %v3784_v33  ;;  %v9372_v50 = vpop.permute.xlu0 %3746  ;;  %v8053_v13 = vunpack.i.l.bf16 %v8052_v44 }
 0x162   :  { %7436 = vmatmul.mubr.msk.f32.gmra.mrb[10].mxu0 %vm316_vm8, %v9175_v8  ;;  %7441 = vmatmul.mubr.msk.f32.vlgmr.msra.gmra.mrb[8].mxu1 %vm316_vm8, %v9160_v15  ;;  %v3767_v58 = vsel %vm3758_vm2, %v9372_v50, %v9349_v10 }
 0x163   :  { %3338 = vmatprep.mubr.f32.mxu0 %v8140_v2  ;;  %3427 = vmatprep.mubr.f32.mxu1 %v8140_v2  ;;  %v3768_v23 = vsel %vm3758_vm2, %v9349_v10, %v8053_v13  ;;  %v3791_v4 = vsel %vm9361_vm4, %v3767_v58, 0.0 }
 0x164   :  { %7452 = vmatpush1.msk.msra.mxu1 %vm325_vm7, %v3040_v49  ;;  %v9385_v16 = vpop.permute.xlu1 %3754  ;;  %v3792_v57 = vsel %vm9309_vm3, %v3768_v23, 0.0 }
 0x165   :  { %7463 = vmatprep.subr.msk.mxu1 %vm325_vm7, %v3786_v18  ;;  %v9391_v3 = vpop.permute.xlu0 %3752 }
 0x166   :  { %7437 = vmatmul.mubr.msk.f32.gmra.mrb[12].mxu0 %vm316_vm8, %v9171_v45  ;;  %7442 = vmatmul.mubr.msk.f32.gmra.mrb[10].mxu1 %vm316_vm8, %v9175_v8  ;;  %v3769_v48 = vsel %vm3758_vm2, %v9391_v3, %v9385_v16 }
 0x167   :  { %3344 = vmatprep.mubr.f32.mxu0 %v8140_v2  ;;  %3433 = vmatprep.mubr.f32.mxu1 %v8140_v2  ;;  %v3793_v18 = vsel %vm9361_vm4, %v3769_v48, 0.0 }
 0x168   :  { %v9402_v14 = vpop.permute.xlu1 %4485 }
 0x16a   :  { %7438 = vmatmul.mubr.msk.f32.gmra.mrb[14].mxu0 %vm316_vm8, %v9196_v36  ;;  %7443 = vmatmul.mubr.msk.f32.gmra.mrb[12].mxu1 %vm316_vm8, %v9171_v45 }
 0x16b   :  { %3439 = vmatprep.mubr.f32.mxu1 %v8140_v2  ;;  %3516 = vmatprep.mubr.f32.mxu0 %v8140_v2 }
 0x16c   :  { %v9416_v55 = vpop.permute.xlu1 %4483 }
 0x16d   :  { %v4520_v25 = vsel %vm4519_vm10, %v9416_v55, %v9402_v14 }
 0x16e   :  { %7444 = vmatmul.mubr.msk.f32.gmra.mrb[14].mxu1 %vm316_vm8, %v9196_v36  ;;  %7447 = vmatmul.mubr.msk.f32.vlgmr.msra.gmra.mrb[16].mxu0 %vm316_vm8, %v9160_v15 }
 0x16f   :  { %3522 = vmatprep.mubr.f32.mxu0 %v8140_v2  ;;  %3611 = vmatprep.mubr.f32.mxu1 %v8140_v2 }
 0x170   :  { %7458 = vmatpush1.msk.msra.mxu0 %vm325_vm7, %v3783_v6  ;;  %v9439_v54 = vpop.permute.xlu1 %4489 }
 0x171   :  { %7469 = vmatprep.subr.msk.mxu0 %vm325_vm7, %v3788_v47 }
 0x172   :  { %7448 = vmatmul.mubr.msk.f32.gmra.mrb[18].mxu0 %vm316_vm8, %v9175_v8  ;;  %7453 = vmatmul.mubr.msk.f32.vlgmr.msra.gmra.mrb[16].mxu1 %vm316_vm8, %v9160_v15  ;;  %v9412_v15 = vpop.permute.xlu0 %8056 }
 0x173   :  { %3528 = vmatprep.mubr.f32.mxu0 %v8140_v2  ;;  %3617 = vmatprep.mubr.f32.mxu1 %v8140_v2  ;;  %v8058_v46 = vunpack.i.l.bf16 %v9412_v15  ;;  %v8059_v60 = vunpack.i.h.bf16 %v9412_v15 }
 0x174   :  { %7464 = vmatpush1.msk.msra.mxu1 %vm325_vm7, %v3785_v34  ;;  %v9461_v29 = vpop.permute.xlu1 %4566 }
 0x175   :  { %7475 = vmatprep.subr.msk.mxu1 %vm325_vm7, %v3790_v1  ;;  %v4521_v7 = vsel %vm4519_vm10, %v9402_v14, %v8058_v46 }
 0x176   :  { %7449 = vmatmul.mubr.msk.f32.gmra.mrb[20].mxu0 %vm316_vm8, %v9171_v45  ;;  %7454 = vmatmul.mubr.msk.f32.gmra.mrb[18].mxu1 %vm316_vm8, %v9175_v8  ;;  %v8054_v8 = vunpack.i.h.bf16 %v8052_v44  ;;  %v9428_v41 = vpop.permute.xlu0 %4491  ;;  %v4545_v21 = vsel %vm9493_vm13, %v4521_v7, 0.0 }
 0x177   :  { %3534 = vmatprep.mubr.f32.mxu0 %v8140_v2  ;;  %3623 = vmatprep.mubr.f32.mxu1 %v8140_v2  ;;  %v4523_v33 = vsel %vm4519_vm10, %v9428_v41, %v8059_v60  ;;  %v4522_v6 = vsel %vm4519_vm10, %v9439_v54, %v9428_v41 }
 0x178   :  { %v3770_v24 = vsel %vm3758_vm2, %v9385_v16, %v8054_v8  ;;  %v9484_v28 = vpop.permute.xlu1 %4497  ;;  %v4547_v9 = vsel %vm9493_vm13, %v4523_v33, 0.0 }
 0x179   :  { %v3794_v26 = vsel %vm9309_vm3, %v3770_v24, 0.0  ;;  %vm6025_vm3 = vcmask 908288  }
 0x17a   :  { %7450 = vmatmul.mubr.msk.f32.gmra.mrb[22].mxu0 %vm316_vm8, %v9196_v36  ;;  %7455 = vmatmul.mubr.msk.f32.gmra.mrb[20].mxu1 %vm316_vm8, %v9171_v45  ;;  %v3765_v45 = vsel %vm3758_vm2, %v3741_v32, %v3743_v51  ;;  %v9456_v12 = vpop.permute.xlu0 %4564  ;;  %vm9549_vm2 = vmand %vm9537_vm0, %vm8543_vm12  ;;  %vm5272_vm12 = vcmask 916480  }
 0x17b   :  { %3629 = vmatprep.mubr.f32.mxu1 %v8140_v2  ;;  %3889 = vmatprep.mubr.f32.mxu0 %v8140_v2  ;;  %v4544_v50 = vsel %vm9549_vm2, %v4520_v25, 0.0  ;;  %v4546_v3 = vsel %vm9549_vm2, %v4522_v6, 0.0 }
 0x17c   :  { %v9516_v49 = vpop.permute.xlu1 %4570 }
 0x17e   :  { %7456 = vmatmul.mubr.msk.f32.gmra.mrb[22].mxu1 %vm316_vm8, %v9196_v36  ;;  %7459 = vmatmul.mubr.msk.f32.vlgmr.msra.gmra.mrb[0].mxu0 %vm316_vm8, %v9257_v42  ;;  %v3789_v36 = vsel %vm9361_vm4, %v3765_v45, 0.0  ;;  %v9475_v39 = vpop.permute.xlu0 %4568  ;;  %vm9826_vm4 = vmand %vm9471_vm11, %vm1497_vm14 }
 0x17f   :  { %3895 = vmatprep.mubr.f32.mxu0 %v8140_v2  ;;  %3984 = vmatprep.mubr.f32.mxu1 %v8140_v2  ;;  %vm9877_vm14 = vmand %vm9537_vm0, %vm1496_vm1  ;;  %vm6969_vm1 = vcmask 195712  }
 0x180   :  { %7470 = vmatpush1.msk.msra.mxu0 %vm325_vm7, %v3787_v53  ;;  %v4504_v51 = vpop.permute.xlu1 %4503 }
 0x181   :  { %7481 = vmatprep.subr.msk.mxu0 %vm325_vm7, %v3792_v57 }
 0x182   :  { %7460 = vmatmul.mubr.msk.f32.gmra.mrb[2].mxu0 %vm316_vm8, %v9259_v63  ;;  %7465 = vmatmul.mubr.msk.f32.vlgmr.msra.gmra.mrb[0].mxu1 %vm316_vm8, %v9257_v42  ;;  %v8062_v17 = vpop.permute.xlu0 %8061 }
 0x183   :  { %3901 = vmatprep.mubr.f32.mxu0 %v8140_v2  ;;  %3990 = vmatprep.mubr.f32.mxu1 %v8140_v2  ;;  %v8063_v10 = vunpack.i.l.bf16 %v8062_v17  ;;  %v8064_v30 = vunpack.i.h.bf16 %v8062_v17 }
 0x184   :  { %7476 = vmatpush1.msk.msra.mxu1 %vm325_vm7, %v3789_v36  ;;  %v9556_v44 = vpop.permute.xlu1 %4509 }
 0x185   :  { %7487 = vmatprep.subr.msk.mxu1 %vm325_vm7, %v3794_v26  ;;  %v4525_v59 = vsel %vm4519_vm10, %v9484_v28, %v8063_v10  ;;  %v4527_v47 = vsel %vm4519_vm10, %v4504_v51, %v8064_v30 }
 0x186   :  { %7461 = vmatmul.mubr.msk.f32.gmra.mrb[4].mxu0 %vm316_vm8, %v9287_v61  ;;  %7466 = vmatmul.mubr.msk.f32.gmra.mrb[2].mxu1 %vm316_vm8, %v9259_v63  ;;  %v4496_v43 = vpop.permute.xlu0 %4495  ;;  %v4549_v35 = vsel %vm9493_vm13, %v4525_v59, 0.0  ;;  %v4551_v34 = vsel %vm9493_vm13, %v4527_v47, 0.0 }
 0x187   :  { %3907 = vmatprep.mubr.f32.mxu0 %v8140_v2  ;;  %3996 = vmatprep.mubr.f32.mxu1 %v8140_v2  ;;  %v4524_v15 = vsel %vm4519_vm10, %v4496_v43, %v9484_v28  ;;  %v6707_v43 = vld [vmem:[%s10189_s2 + $0x18] sm:$0xff] }
 0x188   :  { %v4508_v16 = vpop.permute.xlu1 %4507  ;;  %v4548_v8 = vsel %vm9549_vm2, %v4524_v15, 0.0 }
 0x189   :  { %v4528_v20 = vsel %vm4519_vm10, %v4508_v16, %v9556_v44 }
 0x18a   :  { %7462 = vmatmul.mubr.msk.f32.gmra.mrb[6].mxu0 %vm316_vm8, %v9315_v5  ;;  %7467 = vmatmul.mubr.msk.f32.gmra.mrb[4].mxu1 %vm316_vm8, %v9287_v61  ;;  %v4502_v19 = vpop.permute.xlu0 %4501  ;;  %v4552_v60 = vsel %vm9549_vm2, %v4528_v20, 0.0 }
 0x18b   :  { %4002 = vmatprep.mubr.f32.mxu1 %v8140_v2  ;;  %4079 = vmatprep.mubr.f32.mxu0 %v8140_v2 }
 0x18c   :  { %v4514_v1 = vpop.permute.xlu1 %4513 }
 0x18e   :  { %7468 = vmatmul.mubr.msk.f32.gmra.mrb[6].mxu1 %vm316_vm8, %v9315_v5  ;;  %7471 = vmatmul.mubr.msk.f32.vlgmr.msra.gmra.mrb[8].mxu0 %vm316_vm8, %v9257_v42  ;;  %v8067_v31 = vpop.permute.xlu0 %8066 }
 0x18f   :  { %4085 = vmatprep.mubr.f32.mxu0 %v8140_v2  ;;  %4174 = vmatprep.mubr.f32.mxu1 %v8140_v2 }
 0x190   :  { %7482 = vmatpush1.msk.msra.mxu0 %vm325_vm7, %v3791_v4  ;;  %v8072_v13 = vpop.permute.xlu1 %8071  ;;  %v6704_v4 = vld [vmem:[%s10189_s2] sm:$0xff] }
 0x191   :  { %7493 = vmatprep.subr.msk.mxu0 %vm325_vm7, %v4545_v21  ;;  %v8073_v36 = vunpack.i.l.bf16 %v8072_v13  ;;  %v8074_v26 = vunpack.i.h.bf16 %v8072_v13  ;;  %v8156_v21 = vmov 0  }
 0x192   :  { %7472 = vmatmul.mubr.msk.f32.gmra.mrb[10].mxu0 %vm316_vm8, %v9259_v63  ;;  %7477 = vmatmul.mubr.msk.f32.vlgmr.msra.gmra.mrb[8].mxu1 %vm316_vm8, %v9257_v42  ;;  %v9577_v0 = vpop.permute.xlu0 %4515 }
 0x193   :  { %4091 = vmatprep.mubr.f32.mxu0 %v8140_v2  ;;  %4180 = vmatprep.mubr.f32.mxu1 %v8140_v2  ;;  %v4530_v62 = vsel %vm4519_vm10, %v4514_v1, %v9577_v0 }
 0x194   :  { %7488 = vmatpush1.msk.msra.mxu1 %vm325_vm7, %v3793_v18  ;;  %v9626_v53 = vpop.permute.xlu1 %5244  ;;  %8100 = vset.pattern.permute.xlu0 %v8156_v21  ;;  %v4554_v17 = vsel %vm9549_vm2, %v4530_v62, 0.0 }
 0x195   :  { %7499 = vmatprep.subr.msk.mxu1 %vm325_vm7, %v4547_v9  ;;  %v5276_v48 = vsel %vm5272_vm12, %v9626_v53, %v8074_v26  ;;  %6710 = vperm.xlu0 %8100, %v6704_v4   ;;  %v6705_v9 = vld [vmem:[%s10189_s2 + $0x8] sm:$0xff] }
 0x196   :  { %7473 = vmatmul.mubr.msk.f32.gmra.mrb[12].mxu0 %vm316_vm8, %v9287_v61  ;;  %7478 = vmatmul.mubr.msk.f32.gmra.mrb[10].mxu1 %vm316_vm8, %v9259_v63  ;;  %v9591_v14 = vpop.permute.xlu0 %5238  ;;  %v5300_v33 = vsel %vm9471_vm11, %v5276_v48, 0.0 }
 0x197   :  { %4097 = vmatprep.mubr.f32.mxu0 %v8140_v2  ;;  %4186 = vmatprep.mubr.f32.mxu1 %v8140_v2  ;;  %v5274_v46 = vsel %vm5272_vm12, %v9591_v14, %v8073_v36 }
 0x198   :  { %v9647_v54 = vpop.permute.xlu1 %5317  ;;  %v5298_v7 = vsel %vm9471_vm11, %v5274_v46, 0.0  ;;  %8101 = vset.pattern.permute.xlu1 %v8156_v21 }
 0x199   :  { %6715 = vperm.xlu1 %8101, %v6705_v9   ;;  %6725 = vperm.xlu0 %8100, %v6707_v43  }
 0x19a   :  { %7474 = vmatmul.mubr.msk.f32.gmra.mrb[14].mxu0 %vm316_vm8, %v9315_v5  ;;  %7479 = vmatmul.mubr.msk.f32.gmra.mrb[12].mxu1 %vm316_vm8, %v9287_v61  ;;  %v9606_v55 = vpop.permute.xlu0 %5236 }
 0x19b   :  { %4192 = vmatprep.mubr.f32.mxu1 %v8140_v2  ;;  %4269 = vmatprep.mubr.f32.mxu0 %v8140_v2  ;;  %v5273_v25 = vsel %vm5272_vm12, %v9606_v55, %v9591_v14 }
 0x19c   :  { %v9663_v58 = vpop.permute.xlu1 %5321 }
 0x19e   :  { %7480 = vmatmul.mubr.msk.f32.gmra.mrb[14].mxu1 %vm316_vm8, %v9315_v5  ;;  %7483 = vmatmul.mubr.msk.f32.vlgmr.msra.gmra.mrb[16].mxu0 %vm316_vm8, %v9257_v42 }
 0x19f   :  { %4275 = vmatprep.mubr.f32.mxu0 %v8140_v2  ;;  %4364 = vmatprep.mubr.f32.mxu1 %v8140_v2 }
 0x1a0   :  { %7494 = vmatpush1.msk.msra.mxu0 %vm325_vm7, %v4544_v50  ;;  %v8077_v27 = vpop.permute.xlu1 %8076  ;;  %v5297_v50 = vsel %vm9537_vm0, %v5273_v25, 0.0 }
 0x1a1   :  { %7505 = vmatprep.subr.msk.mxu0 %vm325_vm7, %v4549_v35  ;;  %v8078_v10 = vunpack.i.l.bf16 %v8077_v27 }
 0x1a2   :  { %7484 = vmatmul.mubr.msk.f32.gmra.mrb[18].mxu0 %vm316_vm8, %v9259_v63  ;;  %7489 = vmatmul.mubr.msk.f32.vlgmr.msra.gmra.mrb[16].mxu1 %vm316_vm8, %v9257_v42  ;;  %v8068_v42 = vunpack.i.l.bf16 %v8067_v31 }
 0x1a3   :  { %4281 = vmatprep.mubr.f32.mxu0 %v8140_v2  ;;  %4370 = vmatprep.mubr.f32.mxu1 %v8140_v2 }
 0x1a4   :  { %7500 = vmatpush1.msk.msra.mxu1 %vm325_vm7, %v4546_v3  ;;  %v4529_v56 = vsel %vm4519_vm10, %v9556_v44, %v8068_v42  ;;  %v8079_v44 = vunpack.i.h.bf16 %v8077_v27 }
 0x1a5   :  { %7511 = vmatprep.subr.msk.mxu1 %vm325_vm7, %v4551_v34  ;;  %v4553_v23 = vsel %vm9493_vm13, %v4529_v56, 0.0 }
 0x1a6   :  { %7485 = vmatmul.mubr.msk.f32.gmra.mrb[20].mxu0 %vm316_vm8, %v9287_v61  ;;  %7490 = vmatmul.mubr.msk.f32.gmra.mrb[18].mxu1 %vm316_vm8, %v9259_v63  ;;  %v8069_v63 = vunpack.i.h.bf16 %v8067_v31 }
 0x1a7   :  { %4287 = vmatprep.mubr.f32.mxu0 %v8140_v2  ;;  %4376 = vmatprep.mubr.f32.mxu1 %v8140_v2 }
 0x1a8   :  { %v4531_v41 = vsel %vm4519_vm10, %v9577_v0, %v8069_v63 }
 0x1a9   :  { %v4555_v57 = vsel %vm9493_vm13, %v4531_v41, 0.0  ;;  %vm7075_vm13 = vcmask 1042434  }
 0x1aa   :  { %7486 = vmatmul.mubr.msk.f32.gmra.mrb[22].mxu0 %vm316_vm8, %v9315_v5  ;;  %7491 = vmatmul.mubr.msk.f32.gmra.mrb[20].mxu1 %vm316_vm8, %v9287_v61  ;;  %v4526_v61 = vsel %vm4519_vm10, %v4502_v19, %v4504_v51  ;;  %v6706_v51 = vld [vmem:[%s10189_s2 + $0x10] sm:$0xff]  ;;  %v5249_v19 = vpop.permute.xlu1 %5248 }
 0x1ab   :  { %4382 = vmatprep.mubr.f32.mxu1 %v8140_v2  ;;  %4650 = vmatprep.mubr.f32.mxu0 %v8140_v2  ;;  %v4550_v45 = vsel %vm9549_vm2, %v4526_v61, 0.0  ;;  %vm7081_vm2 = vcmask 1045509  }
 0x1ac   :  { %6720 = vperm.xlu1 %8101, %v6706_v51  }
 0x1ae   :  { %7492 = vmatmul.mubr.msk.f32.gmra.mrb[22].mxu1 %vm316_vm8, %v9315_v5  ;;  %7495 = vmatmul.mubr.msk.f32.vlgmr.msra.gmra.mrb[0].mxu0 %vm316_vm8, %v9456_v12  ;;  %v9628_v5 = vpop.permute.xlu0 %5242  ;;  %v5255_v59 = vpop.permute.xlu1 %5254 }
 0x1af   :  { %4745 = vmatprep.mubr.f32.mxu1 %v8140_v2  ;;  %4656 = vmatprep.mubr.f32.mxu0 %v8140_v2  ;;  %v5275_v6 = vsel %vm5272_vm12, %v9628_v5, %v9626_v53 }
 0x1b0   :  { %7506 = vmatpush1.msk.msra.mxu0 %vm325_vm7, %v4548_v8  ;;  %v5299_v0 = vsel %vm9537_vm0, %v5275_v6, 0.0 }
 0x1b1   :  { %7517 = vmatprep.subr.msk.mxu0 %vm325_vm7, %v4553_v23 }
 0x1b2   :  { %7496 = vmatmul.mubr.msk.f32.gmra.mrb[2].mxu0 %vm316_vm8, %v9461_v29  ;;  %7501 = vmatmul.mubr.msk.f32.vlgmr.msra.gmra.mrb[0].mxu1 %vm316_vm8, %v9456_v12  ;;  %v9649_v24 = vpop.permute.xlu0 %5319  ;;  %v8082_v16 = vpop.permute.xlu1 %8081 }
 0x1b3   :  { %4662 = vmatprep.mubr.f32.mxu0 %v8140_v2  ;;  %4751 = vmatprep.mubr.f32.mxu1 %v8140_v2  ;;  %v8083_v14 = vunpack.i.l.bf16 %v8082_v16 }
 0x1b4   :  { %7512 = vmatpush1.msk.msra.mxu1 %vm325_vm7, %v4550_v45 }
 0x1b5   :  { %7523 = vmatprep.subr.msk.mxu1 %vm325_vm7, %v4555_v57 }
 0x1b6   :  { %7497 = vmatmul.mubr.msk.f32.gmra.mrb[4].mxu0 %vm316_vm8, %v9475_v39  ;;  %7502 = vmatmul.mubr.msk.f32.gmra.mrb[2].mxu1 %vm316_vm8, %v9461_v29  ;;  %v9665_v28 = vpop.permute.xlu0 %5250  ;;  %v5269_v1 = vpop.permute.xlu1 %5268 }
 0x1b7   :  { %4668 = vmatprep.mubr.f32.mxu0 %v8140_v2  ;;  %4757 = vmatprep.mubr.f32.mxu1 %v8140_v2  ;;  %v5278_v30 = vsel %vm5272_vm12, %v9665_v28, %v8078_v10  ;;  %v5277_v15 = vsel %vm5272_vm12, %v5249_v19, %v9665_v28 }
 0x1b8   :  { %v5302_v35 = vsel %vm9471_vm11, %v5278_v30, 0.0  ;;  %v5301_v63 = vsel %vm9537_vm0, %v5277_v15, 0.0 }
 0x1ba   :  { %7498 = vmatmul.mubr.msk.f32.gmra.mrb[6].mxu0 %vm316_vm8, %v9516_v49  ;;  %7503 = vmatmul.mubr.msk.f32.gmra.mrb[4].mxu1 %vm316_vm8, %v9475_v39  ;;  %v9694_v18 = vpop.permute.xlu0 %5323  ;;  %v9762_v42 = vpop.permute.xlu1 %5991 }
 0x1bb   :  { %4763 = vmatprep.mubr.f32.mxu1 %v8140_v2  ;;  %4840 = vmatprep.mubr.f32.mxu0 %v8140_v2 }
 0x1be   :  { %7504 = vmatmul.mubr.msk.f32.gmra.mrb[6].mxu1 %vm316_vm8, %v9516_v49  ;;  %7507 = vmatmul.mubr.msk.f32.vlgmr.msra.gmra.mrb[8].mxu0 %vm316_vm8, %v9456_v12  ;;  %v5257_v22 = vpop.permute.xlu0 %5256  ;;  %v9783_v8 = vpop.permute.xlu1 %5989 }
 0x1bf   :  { %4846 = vmatprep.mubr.f32.mxu0 %v8140_v2  ;;  %4935 = vmatprep.mubr.f32.mxu1 %v8140_v2  ;;  %v5280_v47 = vsel %vm5272_vm12, %v5257_v22, %v8079_v44  ;;  %v6026_v9 = vsel %vm6025_vm3, %v9783_v8, %v9762_v42 }
 0x1c0   :  { %7518 = vmatpush1.msk.msra.mxu0 %vm325_vm7, %v4552_v60  ;;  %v5304_v3 = vsel %vm9471_vm11, %v5280_v47, 0.0  ;;  %v6050_v11 = vsel %vm9877_vm14, %v6026_v9, 0.0 }
 0x1c1   :  { %7529 = vmatprep.subr.msk.mxu0 %vm325_vm7, %v5298_v7 }
 0x1c2   :  { %7508 = vmatmul.mubr.msk.f32.gmra.mrb[10].mxu0 %vm316_vm8, %v9461_v29  ;;  %7513 = vmatmul.mubr.msk.f32.vlgmr.msra.gmra.mrb[8].mxu1 %vm316_vm8, %v9456_v12  ;;  %v9726_v31 = vpop.permute.xlu0 %5262  ;;  %v5996_v53 = vpop.permute.xlu1 %5995 }
 0x1c3   :  { %4852 = vmatprep.mubr.f32.mxu0 %v8140_v2  ;;  %4941 = vmatprep.mubr.f32.mxu1 %v8140_v2  ;;  %v5282_v13 = vsel %vm5272_vm12, %v9726_v31, %v8083_v14 }
 0x1c4   :  { %7524 = vmatpush1.msk.msra.mxu1 %vm325_vm7, %v4554_v17  ;;  %v5306_v56 = vsel %vm9471_vm11, %v5282_v13, 0.0 }
 0x1c5   :  { %7535 = vmatprep.subr.msk.mxu1 %vm325_vm7, %v5300_v33 }
 0x1c6   :  { %7509 = vmatmul.mubr.msk.f32.gmra.mrb[12].mxu0 %vm316_vm8, %v9475_v39  ;;  %7514 = vmatmul.mubr.msk.f32.gmra.mrb[10].mxu1 %vm316_vm8, %v9461_v29  ;;  %v5261_v34 = vpop.permute.xlu0 %5260  ;;  %v9818_v36 = vpop.permute.xlu1 %6072 }
 0x1c7   :  { %4858 = vmatprep.mubr.f32.mxu0 %v8140_v2  ;;  %4947 = vmatprep.mubr.f32.mxu1 %v8140_v2  ;;  %v5281_v57 = vsel %vm5272_vm12, %v5261_v34, %v9726_v31 }
 0x1c8   :  { %v5305_v28 = vsel %vm9537_vm0, %v5281_v57, 0.0 }
 0x1ca   :  { %7510 = vmatmul.mubr.msk.f32.gmra.mrb[14].mxu0 %vm316_vm8, %v9516_v49  ;;  %7515 = vmatmul.mubr.msk.f32.gmra.mrb[12].mxu1 %vm316_vm8, %v9475_v39  ;;  %v6004_v7 = vpop.permute.xlu1 %6003 }
 0x1cb   :  { %4953 = vmatprep.mubr.f32.mxu1 %v8140_v2  ;;  %5030 = vmatprep.mubr.f32.mxu0 %v8140_v2 }
 0x1ce   :  { %7516 = vmatmul.mubr.msk.f32.gmra.mrb[14].mxu1 %vm316_vm8, %v9516_v49  ;;  %7519 = vmatmul.mubr.msk.f32.vlgmr.msra.gmra.mrb[16].mxu0 %vm316_vm8, %v9456_v12  ;;  %v9865_v17 = vpop.permute.xlu1 %6076 }
 0x1cf   :  { %5036 = vmatprep.mubr.f32.mxu0 %v8140_v2  ;;  %5125 = vmatprep.mubr.f32.mxu1 %v8140_v2 }
 0x1d0   :  { %7530 = vmatpush1.msk.msra.mxu0 %vm325_vm7, %v5297_v50 }
 0x1d1   :  { %7541 = vmatprep.subr.msk.mxu0 %vm325_vm7, %v5302_v35 }
 0x1d2   :  { %7520 = vmatmul.mubr.msk.f32.gmra.mrb[18].mxu0 %vm316_vm8, %v9461_v29  ;;  %7525 = vmatmul.mubr.msk.f32.vlgmr.msra.gmra.mrb[16].mxu1 %vm316_vm8, %v9456_v12  ;;  %v5267_v12 = vpop.permute.xlu0 %5266  ;;  %v6010_v19 = vpop.permute.xlu1 %6009 }
 0x1d3   :  { %5042 = vmatprep.mubr.f32.mxu0 %v8140_v2  ;;  %5131 = vmatprep.mubr.f32.mxu1 %v8140_v2  ;;  %v5283_v52 = vsel %vm5272_vm12, %v5267_v12, %v5269_v1 }
 0x1d4   :  { %7536 = vmatpush1.msk.msra.mxu1 %vm325_vm7, %v5299_v0  ;;  %v5307_v4 = vsel %vm9537_vm0, %v5283_v52, 0.0 }
 0x1d5   :  { %7547 = vmatprep.subr.msk.mxu1 %vm325_vm7, %v5304_v3 }
 0x1d6   :  { %7521 = vmatmul.mubr.msk.f32.gmra.mrb[20].mxu0 %vm316_vm8, %v9475_v39  ;;  %7526 = vmatmul.mubr.msk.f32.gmra.mrb[18].mxu1 %vm316_vm8, %v9461_v29  ;;  %v8084_v29 = vunpack.i.h.bf16 %v8082_v16  ;;  %v8087_v55 = vpop.permute.xlu0 %8086  ;;  %v6016_v6 = vpop.permute.xlu1 %6015 }
 0x1d7   :  { %5048 = vmatprep.mubr.f32.mxu0 %v8140_v2  ;;  %5137 = vmatprep.mubr.f32.mxu1 %v8140_v2  ;;  %v8088_v5 = vunpack.i.l.bf16 %v8087_v55  ;;  %v8089_v20 = vunpack.i.h.bf16 %v8087_v55 }
 0x1d8   :  { %v5284_v61 = vsel %vm5272_vm12, %v5269_v1, %v8084_v29 }
 0x1d9   :  { %v5308_v23 = vsel %vm9471_vm11, %v5284_v61, 0.0  ;;  %v6027_v46 = vsel %vm6025_vm3, %v9762_v42, %v8088_v5 }
 0x1da   :  { %7522 = vmatmul.mubr.msk.f32.gmra.mrb[22].mxu0 %vm316_vm8, %v9516_v49  ;;  %7527 = vmatmul.mubr.msk.f32.gmra.mrb[20].mxu1 %vm316_vm8, %v9475_v39  ;;  %v5279_v39 = vsel %vm5272_vm12, %v5255_v59, %v5257_v22  ;;  %v9798_v41 = vpop.permute.xlu0 %5997  ;;  %v6051_v37 = vsel %vm9826_vm4, %v6027_v46, 0.0  ;;  %v6014_v1 = vpop.permute.xlu1 %6013  ;;  %vm7087_vm12 = vcmask 1045504  }
 0x1db   :  { %5143 = vmatprep.mubr.f32.mxu1 %v8140_v2  ;;  %5403 = vmatprep.mubr.f32.mxu0 %v8140_v2  ;;  %v6029_v62 = vsel %vm6025_vm3, %v9798_v41, %v8089_v20  ;;  %v6028_v32 = vsel %vm6025_vm3, %v5996_v53, %v9798_v41  ;;  %v6034_v12 = vsel %vm6025_vm3, %v6014_v1, %v6016_v6 }
 0x1dc   :  { %v6053_v48 = vsel %vm9826_vm4, %v6029_v62, 0.0  ;;  %v6052_v30 = vsel %vm9877_vm14, %v6028_v32, 0.0  ;;  %v6058_v42 = vsel %vm9877_vm14, %v6034_v12, 0.0 }
 0x1de   :  { %7528 = vmatmul.mubr.msk.f32.gmra.mrb[22].mxu1 %vm316_vm8, %v9516_v49  ;;  %7531 = vmatmul.mubr.msk.f32.vlgmr.msra.gmra.mrb[0].mxu0 %vm316_vm8, %v9647_v54  ;;  %v5303_v49 = vsel %vm9537_vm0, %v5279_v39, 0.0  ;;  %v9810_v45 = vpop.permute.xlu0 %6070  ;;  %v6020_v14 = vpop.permute.xlu1 %6019 }
 0x1df   :  { %5409 = vmatprep.mubr.f32.mxu0 %v8140_v2  ;;  %5498 = vmatprep.mubr.f32.mxu1 %v8140_v2 }
 0x1e0   :  { %7542 = vmatpush1.msk.msra.mxu0 %vm325_vm7, %v5301_v63 }
 0x1e1   :  { %7553 = vmatprep.subr.msk.mxu0 %vm325_vm7, %v5306_v56 }
 0x1e2   :  { %7532 = vmatmul.mubr.msk.f32.gmra.mrb[2].mxu0 %vm316_vm8, %v9649_v24  ;;  %7537 = vmatmul.mubr.msk.f32.vlgmr.msra.gmra.mrb[0].mxu1 %vm316_vm8, %v9647_v54  ;;  %v9841_v60 = vpop.permute.xlu0 %6074 }
 0x1e3   :  { %5415 = vmatprep.mubr.f32.mxu0 %v8140_v2  ;;  %5504 = vmatprep.mubr.f32.mxu1 %v8140_v2 }
 0x1e4   :  { %7548 = vmatpush1.msk.msra.mxu1 %vm325_vm7, %v5303_v49 }
 0x1e5   :  { %7559 = vmatprep.subr.msk.mxu1 %vm325_vm7, %v5308_v23 }
 0x1e6   :  { %7533 = vmatmul.mubr.msk.f32.gmra.mrb[4].mxu0 %vm316_vm8, %v9663_v58  ;;  %7538 = vmatmul.mubr.msk.f32.gmra.mrb[2].mxu1 %vm316_vm8, %v9649_v24  ;;  %v8092_v21 = vpop.permute.xlu0 %8091 }
 0x1e7   :  { %5421 = vmatprep.mubr.f32.mxu0 %v8140_v2  ;;  %5510 = vmatprep.mubr.f32.mxu1 %v8140_v2  ;;  %v8093_v33 = vunpack.i.l.bf16 %v8092_v21  ;;  %v8094_v43 = vunpack.i.h.bf16 %v8092_v21 }
 0x1e9   :  { %v6031_v51 = vsel %vm6025_vm3, %v6004_v7, %v8093_v33  ;;  %v6033_v25 = vsel %vm6025_vm3, %v6010_v19, %v8094_v43 }
 0x1ea   :  { %7534 = vmatmul.mubr.msk.f32.gmra.mrb[6].mxu0 %vm316_vm8, %v9694_v18  ;;  %7539 = vmatmul.mubr.msk.f32.gmra.mrb[4].mxu1 %vm316_vm8, %v9663_v58  ;;  %v6002_v10 = vpop.permute.xlu0 %6001  ;;  %v6055_v22 = vsel %vm9826_vm4, %v6031_v51, 0.0  ;;  %v6057_v59 = vsel %vm9826_vm4, %v6033_v25, 0.0 }
 0x1eb   :  { %5516 = vmatprep.mubr.f32.mxu1 %v8140_v2  ;;  %5593 = vmatprep.mubr.f32.mxu0 %v8140_v2  ;;  %v6030_v50 = vsel %vm6025_vm3, %v6002_v10, %v6004_v7 }
 0x1ec   :  { %v6054_v16 = vsel %vm9877_vm14, %v6030_v50, 0.0 }
 0x1ee   :  { %7540 = vmatmul.mubr.msk.f32.gmra.mrb[6].mxu1 %vm316_vm8, %v9694_v18  ;;  %7543 = vmatmul.mubr.msk.f32.vlgmr.msra.gmra.mrb[8].mxu0 %vm316_vm8, %v9647_v54  ;;  %v6008_v44 = vpop.permute.xlu0 %6007 }
 0x1ef   :  { %5599 = vmatprep.mubr.f32.mxu0 %v8140_v2  ;;  %5688 = vmatprep.mubr.f32.mxu1 %v8140_v2 }
 0x1f0   :  { %7554 = vmatpush1.msk.msra.mxu0 %vm325_vm7, %v5305_v28 }
 0x1f1   :  { %7565 = vmatprep.subr.msk.mxu0 %vm325_vm7, %v6051_v37 }
 0x1f2   :  { %7544 = vmatmul.mubr.msk.f32.gmra.mrb[10].mxu0 %vm316_vm8, %v9649_v24  ;;  %7549 = vmatmul.mubr.msk.f32.vlgmr.msra.gmra.mrb[8].mxu1 %vm316_vm8, %v9647_v54  ;;  %v8097_v31 = vpop.permute.xlu0 %8096 }
 0x1f3   :  { %5605 = vmatprep.mubr.f32.mxu0 %v8140_v2  ;;  %5694 = vmatprep.mubr.f32.mxu1 %v8140_v2  ;;  %v8099_v35 = vunpack.i.h.bf16 %v8097_v31 }
 0x1f4   :  { %7560 = vmatpush1.msk.msra.mxu1 %vm325_vm7, %v5307_v4 }
 0x1f5   :  { %7571 = vmatprep.subr.msk.mxu1 %vm325_vm7, %v6053_v48 }
 0x1f6   :  { %7545 = vmatmul.mubr.msk.f32.gmra.mrb[12].mxu0 %vm316_vm8, %v9663_v58  ;;  %7550 = vmatmul.mubr.msk.f32.gmra.mrb[10].mxu1 %vm316_vm8, %v9649_v24  ;;  %v6022_v47 = vpop.permute.xlu0 %6021 }
 0x1f7   :  { %5611 = vmatprep.mubr.f32.mxu0 %v8140_v2  ;;  %5700 = vmatprep.mubr.f32.mxu1 %v8140_v2  ;;  %v6037_v3 = vsel %vm6025_vm3, %v6022_v47, %v8099_v35  ;;  %v6036_v15 = vsel %vm6025_vm3, %v6020_v14, %v6022_v47 }
 0x1f8   :  { %v6060_v29 = vsel %vm9877_vm14, %v6036_v15, 0.0 }
 0x1fa   :  { %7546 = vmatmul.mubr.msk.f32.gmra.mrb[14].mxu0 %vm316_vm8, %v9694_v18  ;;  %7551 = vmatmul.mubr.msk.f32.gmra.mrb[12].mxu1 %vm316_vm8, %v9663_v58 }
 0x1fb   :  { %5706 = vmatprep.mubr.f32.mxu1 %v8140_v2  ;;  %5783 = vmatprep.mubr.f32.mxu0 %v8140_v2 }
 0x1fe   :  { %7552 = vmatmul.mubr.msk.f32.gmra.mrb[14].mxu1 %vm316_vm8, %v9694_v18  ;;  %7555 = vmatmul.mubr.msk.f32.vlgmr.msra.gmra.mrb[16].mxu0 %vm316_vm8, %v9647_v54 }
 0x1ff   :  { %5789 = vmatprep.mubr.f32.mxu0 %v8140_v2  ;;  %5878 = vmatprep.mubr.f32.mxu1 %v8140_v2 }
 0x200   :  { %7566 = vmatpush1.msk.msra.mxu0 %vm325_vm7, %v6050_v11 }
 0x201   :  { %7577 = vmatprep.subr.msk.mxu0 %vm325_vm7, %v6055_v22 }
 0x202   :  { %7556 = vmatmul.mubr.msk.f32.gmra.mrb[18].mxu0 %vm316_vm8, %v9649_v24  ;;  %7561 = vmatmul.mubr.msk.f32.vlgmr.msra.gmra.mrb[16].mxu1 %vm316_vm8, %v9647_v54  ;;  %v8098_v54 = vunpack.i.l.bf16 %v8097_v31 }
 0x203   :  { %5795 = vmatprep.mubr.f32.mxu0 %v8140_v2  ;;  %5884 = vmatprep.mubr.f32.mxu1 %v8140_v2 }
 0x204   :  { %7572 = vmatpush1.msk.msra.mxu1 %vm325_vm7, %v6052_v30 }
 0x205   :  { %7583 = vmatprep.subr.msk.mxu1 %vm325_vm7, %v6057_v59 }
 0x206   :  { %7557 = vmatmul.mubr.msk.f32.gmra.mrb[20].mxu0 %vm316_vm8, %v9663_v58  ;;  %7562 = vmatmul.mubr.msk.f32.gmra.mrb[18].mxu1 %vm316_vm8, %v9649_v24  ;;  %v6035_v24 = vsel %vm6025_vm3, %v6016_v6, %v8098_v54 }
 0x207   :  { %5801 = vmatprep.mubr.f32.mxu0 %v8140_v2  ;;  %5890 = vmatprep.mubr.f32.mxu1 %v8140_v2  ;;  %v6059_v0 = vsel %vm9826_vm4, %v6035_v24, 0.0 }
 0x20a   :  { %7558 = vmatmul.mubr.msk.f32.gmra.mrb[22].mxu0 %vm316_vm8, %v9694_v18  ;;  %7563 = vmatmul.mubr.msk.f32.gmra.mrb[20].mxu1 %vm316_vm8, %v9663_v58  ;;  %v6032_v58 = vsel %vm6025_vm3, %v6008_v44, %v6010_v19  ;;  %vm7083_vm3 = vcmask 48128  }
 0x20b   :  { %5896 = vmatprep.mubr.f32.mxu1 %v8140_v2  ;;  %6156 = vmatprep.mubr.f32.mxu0 %v8140_v2  ;;  %v6056_v34 = vsel %vm9877_vm14, %v6032_v58, 0.0  ;;  %vm7261_vm14 = vcmask 74752  }
 0x20e   :  { %7564 = vmatmul.mubr.msk.f32.gmra.mrb[22].mxu1 %vm316_vm8, %v9694_v18  ;;  %7567 = vmatmul.mubr.msk.f32.vlgmr.msra.gmra.mrb[0].mxu0 %vm316_vm8, %v9810_v45  ;;  %v6061_v18 = vsel %vm9826_vm4, %v6037_v3, 0.0  ;;  %vm7187_vm4 = vcmask 261120  }
 0x20f   :  { %6162 = vmatprep.mubr.f32.mxu0 %v8140_v2  ;;  %6251 = vmatprep.mubr.f32.mxu1 %v8140_v2 }
 0x210   :  { %7578 = vmatpush1.msk.msra.mxu0 %vm325_vm7, %v6054_v16 }
 0x211   :  { %7589 = vmatprep.subr.msk.mxu0 %vm325_vm7, %v6059_v0 }
 0x212   :  { %7568 = vmatmul.mubr.msk.f32.gmra.mrb[2].mxu0 %vm316_vm8, %v9818_v36  ;;  %7573 = vmatmul.mubr.msk.f32.vlgmr.msra.gmra.mrb[0].mxu1 %vm316_vm8, %v9810_v45 }
 0x213   :  { %6168 = vmatprep.mubr.f32.mxu0 %v8140_v2  ;;  %6257 = vmatprep.mubr.f32.mxu1 %v8140_v2 }
 0x214   :  { %7584 = vmatpush1.msk.msra.mxu1 %vm325_vm7, %v6056_v34  ;;  %v10024_v13 = vpop.permute.xlu0 %6710 }
 0x215   :  { %7595 = vmatprep.subr.msk.mxu1 %vm325_vm7, %v6061_v18 }
 0x216   :  { %7569 = vmatmul.mubr.msk.f32.gmra.mrb[4].mxu0 %vm316_vm8, %v9841_v60  ;;  %7574 = vmatmul.mubr.msk.f32.gmra.mrb[2].mxu1 %vm316_vm8, %v9818_v36 }
 0x217   :  { %6174 = vmatprep.mubr.f32.mxu0 %v8140_v2  ;;  %6263 = vmatprep.mubr.f32.mxu1 %v8140_v2 }
 0x218   :  { %v10026_v63 = vpop.permute.xlu1 %6715  ;;  %v10040_v51 = vpop.permute.xlu0 %6725 }
 0x21a   :  { %7570 = vmatmul.mubr.msk.f32.gmra.mrb[6].mxu0 %vm316_vm8, %v9865_v17  ;;  %7575 = vmatmul.mubr.msk.f32.gmra.mrb[4].mxu1 %vm316_vm8, %v9841_v60 }
 0x21b   :  { %6269 = vmatprep.mubr.f32.mxu1 %v8140_v2  ;;  %6346 = vmatprep.mubr.f32.mxu0 %v8140_v2 }
 0x21e   :  { %7576 = vmatmul.mubr.msk.f32.gmra.mrb[6].mxu1 %vm316_vm8, %v9865_v17  ;;  %7579 = vmatmul.mubr.msk.f32.vlgmr.msra.gmra.mrb[8].mxu0 %vm316_vm8, %v9810_v45 }
 0x21f   :  { %6352 = vmatprep.mubr.f32.mxu0 %v8140_v2  ;;  %6441 = vmatprep.mubr.f32.mxu1 %v8140_v2 }
 0x220   :  { %7590 = vmatpush1.msk.msra.mxu0 %vm325_vm7, %v6058_v42 }
 0x221   :  { %7614 = vmatprep.subr.mxu0 %v8140_v2 }
 0x222   :  { %7580 = vmatmul.mubr.msk.f32.gmra.mrb[10].mxu0 %vm316_vm8, %v9818_v36  ;;  %7585 = vmatmul.mubr.msk.f32.vlgmr.msra.gmra.mrb[8].mxu1 %vm316_vm8, %v9810_v45 }
 0x223   :  { %6358 = vmatprep.mubr.f32.mxu0 %v8140_v2  ;;  %6447 = vmatprep.mubr.f32.mxu1 %v8140_v2 }
 0x224   :  { %7596 = vmatpush1.msk.msra.mxu1 %vm325_vm7, %v6060_v29  ;;  %vm8157_vm7 = vmmov 0  }
 0x226   :  { %7581 = vmatmul.mubr.msk.f32.gmra.mrb[12].mxu0 %vm316_vm8, %v9841_v60  ;;  %7586 = vmatmul.mubr.msk.f32.gmra.mrb[10].mxu1 %vm316_vm8, %v9818_v36 }
 0x227   :  { %6364 = vmatprep.mubr.f32.mxu0 %v8140_v2  ;;  %6453 = vmatprep.mubr.f32.mxu1 %v8140_v2 }
 0x22a   :  { %7582 = vmatmul.mubr.msk.f32.gmra.mrb[14].mxu0 %vm316_vm8, %v9865_v17  ;;  %7587 = vmatmul.mubr.msk.f32.gmra.mrb[12].mxu1 %vm316_vm8, %v9841_v60 }
 0x22b   :  { %6459 = vmatprep.mubr.f32.mxu1 %v8140_v2  ;;  %6536 = vmatprep.mubr.f32.mxu0 %v8140_v2  ;;  %v10034_v46 = vpop.permute.xlu1 %6720 }
 0x22e   :  { %7588 = vmatmul.mubr.msk.f32.gmra.mrb[14].mxu1 %vm316_vm8, %v9865_v17  ;;  %7591 = vmatmul.mubr.msk.f32.vlgmr.msra.gmra.mrb[16].mxu0 %vm316_vm8, %v9810_v45 }
 0x22f   :  { %6542 = vmatprep.mubr.f32.mxu0 %v8140_v2  ;;  %6631 = vmatprep.mubr.f32.mxu1 %v8140_v2 }
 0x232   :  { %7592 = vmatmul.mubr.msk.f32.gmra.mrb[18].mxu0 %vm316_vm8, %v9818_v36  ;;  %7597 = vmatmul.mubr.msk.f32.vlgmr.msra.gmra.mrb[16].mxu1 %vm316_vm8, %v9810_v45 }
 0x233   :  { %6548 = vmatprep.mubr.f32.mxu0 %v8140_v2  ;;  %6637 = vmatprep.mubr.f32.mxu1 %v8140_v2 }
 0x236   :  { %7593 = vmatmul.mubr.msk.f32.gmra.mrb[20].mxu0 %vm316_vm8, %v9841_v60  ;;  %7598 = vmatmul.mubr.msk.f32.gmra.mrb[18].mxu1 %vm316_vm8, %v9818_v36 }
 0x237   :  { %6554 = vmatprep.mubr.f32.mxu0 %v8140_v2  ;;  %6643 = vmatprep.mubr.f32.mxu1 %v8140_v2 }
 0x23a   :  { %7594 = vmatmul.mubr.msk.f32.gmra.mrb[22].mxu0 %vm316_vm8, %v9865_v17  ;;  %7599 = vmatmul.mubr.msk.f32.gmra.mrb[20].mxu1 %vm316_vm8, %v9841_v60 }
 0x23b   :  { %6649 = vmatprep.mubr.f32.mxu1 %v8140_v2  ;;  %7616 = vmatprep.mubr.msk.f32.mxu0 %vm8157_vm7, %v8140_v2 }
 0x23e   :  { %7600 = vmatmul.mubr.msk.f32.gmra.mrb[22].mxu1 %vm316_vm8, %v9865_v17  ;;  %vm6962_vm8 = vcmask 130112  }
 0x23f   :  { %7627 = vmatprep.mubr.msk.f32.mxu1 %vm8157_vm7, %v8140_v2 }
 0x2e1   :  { %v6158_v55 = vpop.f32.mrb[0].mxu0 }
 0x2e2   :  { %v6728_v39 = vadd.f32 %v10024_v13, %v6158_v55  ;;  %v6160_v56 = vpop.f32.mrb[1].mxu0 }
 0x2e3   :  { %v6729_v8 = vadd.f32 %v10024_v13, %v6160_v56 }
 0x2e4   :  { %v6776_v61 = vmax.f32 %v6728_v39, 0.0 }
 0x2e5   :  { %v6777_v49 = vmax.f32 %v6729_v8, 0.0  ;;  %v6164_v23 = vpop.f32.mrb[2].mxu0  ;;  %v6253_v41 = vpop.f32.mrb[0].mxu1 }
 0x2e6   :  { %v6730_v53 = vadd.f32 %v10026_v63, %v6164_v23  ;;  %v6736_v5 = vadd.f32 %v10024_v13, %v6253_v41  ;;  %v6166_v45 = vpop.f32.mrb[3].mxu0  ;;  %v6255_v57 = vpop.f32.mrb[1].mxu1 }
 0x2e7   :  { %v6824_v36 = vadd.f32 %v6777_v49, %v6776_v61  ;;  %v6731_v20 = vadd.f32 %v10026_v63, %v6166_v45  ;;  %v6737_v26 = vadd.f32 %v10024_v13, %v6255_v57 }
 0x2e8   :  { %v6778_v28 = vmax.f32 %v6730_v53, 0.0  ;;  %v6784_v52 = vmax.f32 %v6736_v5, 0.0 }
 0x2e9   :  { %v6779_v37 = vmax.f32 %v6731_v20, 0.0  ;;  %v6785_v60 = vmax.f32 %v6737_v26, 0.0  ;;  %v6259_v62 = vpop.f32.mrb[2].mxu1  ;;  %6825 = vadd.xlane.f32.xlu1 %v6824_v36  ;;  %v6170_v7 = vpop.f32.mrb[4].mxu0 }
 0x2ea   :  { %v6738_v4 = vadd.f32 %v10026_v63, %v6259_v62  ;;  %v6732_v48 = vadd.f32 %v10034_v46, %v6170_v7  ;;  %v6172_v21 = vpop.f32.mrb[5].mxu0  ;;  %v6261_v17 = vpop.f32.mrb[3].mxu1 }
 0x2eb   :  { %v6827_v33 = vadd.f32 %v6779_v37, %v6778_v28  ;;  %v6836_v27 = vadd.f32 %v6785_v60, %v6784_v52  ;;  %v6733_v9 = vadd.f32 %v10034_v46, %v6172_v21  ;;  %v6739_v43 = vadd.f32 %v10026_v63, %v6261_v17 }
 0x2ec   :  { %v6786_v10 = vmax.f32 %v6738_v4, 0.0  ;;  %v6780_v19 = vmax.f32 %v6732_v48, 0.0 }
 0x2ed   :  { %v6781_v11 = vmax.f32 %v6733_v9, 0.0  ;;  %v6787_v32 = vmax.f32 %v6739_v43, 0.0  ;;  %6837 = vadd.xlane.f32.xlu0 %v6836_v27  ;;  %v6176_v22 = vpop.f32.mrb[6].mxu0  ;;  %v6265_v25 = vpop.f32.mrb[4].mxu1 }
 0x2ee   :  { %v6734_v44 = vadd.f32 %v10040_v51, %v6176_v22  ;;  %v6740_v30 = vadd.f32 %v10034_v46, %v6265_v25  ;;  %v6178_v59 = vpop.f32.mrb[7].mxu0  ;;  %v6267_v31 = vpop.f32.mrb[5].mxu1 }
 0x2ef   :  { %v6830_v54 = vadd.f32 %v6781_v11, %v6780_v19  ;;  %v6839_v50 = vadd.f32 %v6787_v32, %v6786_v10  ;;  %v6735_v6 = vadd.f32 %v10040_v51, %v6178_v59  ;;  %v6741_v35 = vadd.f32 %v10034_v46, %v6267_v31 }
 0x2f0   :  { %v6782_v24 = vmax.f32 %v6734_v44, 0.0  ;;  %v6788_v47 = vmax.f32 %v6740_v30, 0.0 }
 0x2f1   :  { %v6783_v16 = vmax.f32 %v6735_v6, 0.0  ;;  %v6789_v58 = vmax.f32 %v6741_v35, 0.0  ;;  %v6271_v0 = vpop.f32.mrb[6].mxu1  ;;  %6840 = vadd.xlane.f32.xlu1 %v6839_v50  ;;  %6828 = vadd.xlane.f32.xlu0 %v6827_v33  ;;  %v6348_v3 = vpop.f32.mrb[8].mxu0 }
 0x2f2   :  { %v6742_v34 = vadd.f32 %v10040_v51, %v6271_v0  ;;  %v6744_v18 = vadd.f32 %v10024_v13, %v6348_v3  ;;  %v6273_v1 = vpop.f32.mrb[7].mxu1  ;;  %v6350_v12 = vpop.f32.mrb[9].mxu0 }
 0x2f3   :  { %v6833_v14 = vadd.f32 %v6783_v16, %v6782_v24  ;;  %v6842_v42 = vadd.f32 %v6789_v58, %v6788_v47  ;;  %v6743_v15 = vadd.f32 %v10040_v51, %v6273_v1  ;;  %v6745_v29 = vadd.f32 %v10024_v13, %v6350_v12 }
 0x2f4   :  { %v6790_v55 = vmax.f32 %v6742_v34, 0.0  ;;  %v6792_v39 = vmax.f32 %v6744_v18, 0.0 }
 0x2f5   :  { %v6791_v56 = vmax.f32 %v6743_v15, 0.0  ;;  %v6793_v8 = vmax.f32 %v6745_v29, 0.0  ;;  %v6443_v61 = vpop.f32.mrb[8].mxu1  ;;  %6843 = vadd.xlane.f32.xlu1 %v6842_v42  ;;  %6831 = vadd.xlane.f32.xlu0 %v6830_v54  ;;  %v6354_v49 = vpop.f32.mrb[10].mxu0 }
 0x2f6   :  { %v6752_v23 = vadd.f32 %v10024_v13, %v6443_v61  ;;  %v6746_v41 = vadd.f32 %v10026_v63, %v6354_v49  ;;  %v6356_v53 = vpop.f32.mrb[11].mxu0  ;;  %v6445_v5 = vpop.f32.mrb[9].mxu1 }
 0x2f7   :  { %v6845_v45 = vadd.f32 %v6791_v56, %v6790_v55  ;;  %v6848_v57 = vadd.f32 %v6793_v8, %v6792_v39  ;;  %v6747_v36 = vadd.f32 %v10026_v63, %v6356_v53  ;;  %v6753_v20 = vadd.f32 %v10024_v13, %v6445_v5 }
 0x2f8   :  { %v6800_v26 = vmax.f32 %v6752_v23, 0.0  ;;  %v6794_v28 = vmax.f32 %v6746_v41, 0.0 }
 0x2f9   :  { %v6795_v52 = vmax.f32 %v6747_v36, 0.0  ;;  %v6801_v37 = vmax.f32 %v6753_v20, 0.0  ;;  %v6449_v60 = vpop.f32.mrb[10].mxu1  ;;  %6846 = vadd.xlane.f32.xlu1 %v6845_v45  ;;  %6834 = vadd.xlane.f32.xlu0 %v6833_v14  ;;  %v6360_v62 = vpop.f32.mrb[12].mxu0 }
 0x2fa   :  { %v6754_v7 = vadd.f32 %v10026_v63, %v6449_v60  ;;  %v6748_v4 = vadd.f32 %v10034_v46, %v6360_v62  ;;  %v6362_v48 = vpop.f32.mrb[13].mxu0  ;;  %v6451_v21 = vpop.f32.mrb[11].mxu1 }
 0x2fb   :  { %v6851_v17 = vadd.f32 %v6795_v52, %v6794_v28  ;;  %v6860_v33 = vadd.f32 %v6801_v37, %v6800_v26  ;;  %v6749_v27 = vadd.f32 %v10034_v46, %v6362_v48  ;;  %v6755_v9 = vadd.f32 %v10026_v63, %v6451_v21 }
 0x2fc   :  { %v6802_v43 = vmax.f32 %v6754_v7, 0.0  ;;  %v6796_v10 = vmax.f32 %v6748_v4, 0.0 }
 0x2fd   :  { %v6797_v19 = vmax.f32 %v6749_v27, 0.0  ;;  %v6803_v11 = vmax.f32 %v6755_v9, 0.0  ;;  %v6455_v32 = vpop.f32.mrb[12].mxu1  ;;  %6861 = vadd.xlane.f32.xlu1 %v6860_v33  ;;  %6849 = vadd.xlane.f32.xlu0 %v6848_v57  ;;  %v6366_v22 = vpop.f32.mrb[14].mxu0 }
 0x2fe   :  { %v6756_v25 = vadd.f32 %v10034_v46, %v6455_v32  ;;  %v6750_v44 = vadd.f32 %v10040_v51, %v6366_v22  ;;  %v6368_v30 = vpop.f32.mrb[15].mxu0  ;;  %v6457_v59 = vpop.f32.mrb[13].mxu1 }
 0x2ff   :  { %v6854_v31 = vadd.f32 %v6797_v19, %v6796_v10  ;;  %v6863_v54 = vadd.f32 %v6803_v11, %v6802_v43  ;;  %v6751_v50 = vadd.f32 %v10040_v51, %v6368_v30  ;;  %v6757_v6 = vadd.f32 %v10034_v46, %v6457_v59 }
 0x300   :  { %v6804_v35 = vmax.f32 %v6756_v25, 0.0  ;;  %v6798_v24 = vmax.f32 %v6750_v44, 0.0 }
 0x301   :  { %v6799_v47 = vmax.f32 %v6751_v50, 0.0  ;;  %v6805_v16 = vmax.f32 %v6757_v6, 0.0  ;;  %v6461_v58 = vpop.f32.mrb[14].mxu1  ;;  %6864 = vadd.xlane.f32.xlu0 %v6863_v54  ;;  %6852 = vadd.xlane.f32.xlu1 %v6851_v17  ;;  %v6538_v0 = vpop.f32.mrb[16].mxu0 }
 0x302   :  { %v6758_v3 = vadd.f32 %v10040_v51, %v6461_v58  ;;  %v6760_v34 = vadd.f32 %v10024_v13, %v6538_v0  ;;  %v6463_v18 = vpop.f32.mrb[15].mxu1  ;;  %v6540_v1 = vpop.f32.mrb[17].mxu0 }
 0x303   :  { %v6857_v12 = vadd.f32 %v6799_v47, %v6798_v24  ;;  %v6866_v14 = vadd.f32 %v6805_v16, %v6804_v35  ;;  %v6759_v42 = vadd.f32 %v10040_v51, %v6463_v18  ;;  %v6761_v15 = vadd.f32 %v10024_v13, %v6540_v1 }
 0x304   :  { %v6806_v29 = vmax.f32 %v6758_v3, 0.0  ;;  %v6808_v55 = vmax.f32 %v6760_v34, 0.0 }
 0x305   :  { %v6807_v39 = vmax.f32 %v6759_v42, 0.0  ;;  %v6809_v56 = vmax.f32 %v6761_v15, 0.0  ;;  %v6633_v8 = vpop.f32.mrb[16].mxu1  ;;  %6855 = vadd.xlane.f32.xlu0 %v6854_v31  ;;  %6858 = vadd.xlane.f32.xlu1 %v6857_v12  ;;  %v6544_v61 = vpop.f32.mrb[18].mxu0  ;;  %v7178_v12 = vld [vmem:[%s10192_s5 + $0x10] sm:$0xff]  ;;  %v7179_v15 = vld [vmem:[%s10192_s5 + $0x18] sm:$0xff] }
 0x306   :  { %v6768_v49 = vadd.f32 %v10024_v13, %v6633_v8  ;;  %v6762_v23 = vadd.f32 %v10026_v63, %v6544_v61  ;;  %v6546_v41 = vpop.f32.mrb[19].mxu0  ;;  %v6635_v53 = vpop.f32.mrb[17].mxu1 }
 0x307   :  { %v6869_v5 = vadd.f32 %v6807_v39, %v6806_v29  ;;  %v6872_v45 = vadd.f32 %v6809_v56, %v6808_v55  ;;  %v6763_v57 = vadd.f32 %v10026_v63, %v6546_v41  ;;  %v6769_v36 = vadd.f32 %v10024_v13, %v6635_v53 }
 0x308   :  { %v6816_v20 = vmax.f32 %v6768_v49, 0.0  ;;  %v6810_v26 = vmax.f32 %v6762_v23, 0.0  ;;  %v7634_v29 = vpack.c.bf16 %v7179_v15, %v7178_v12 }
 0x309   :  { %v6811_v28 = vmax.f32 %v6763_v57, 0.0  ;;  %v6817_v52 = vmax.f32 %v6769_v36, 0.0  ;;  %v6639_v37 = vpop.f32.mrb[18].mxu1  ;;  %6867 = vadd.xlane.f32.xlu0 %v6866_v14  ;;  %6870 = vadd.xlane.f32.xlu1 %v6869_v5  ;;  %v6550_v60 = vpop.f32.mrb[20].mxu0  ;;  %v8158_v14 = vmov 0.0|0.0   ;;  %v6957_v36 = vadd.s32 4294967288, %v8362_v40 }
 0x30a   :  { %v6770_v62 = vadd.f32 %v10026_v63, %v6639_v37  ;;  %v6764_v7 = vadd.f32 %v10034_v46, %v6550_v60  ;;  %v6552_v4 = vpop.f32.mrb[21].mxu0  ;;  %v6641_v48 = vpop.f32.mrb[19].mxu1  ;;  %7630 = vmatprep.subr.bf16.mxu1 %v8158_v14  ;;  %v6971_v37 = vadd.s32 4294967272, %v8362_v40 }
 0x30b   :  { %v6875_v21 = vadd.f32 %v6811_v28, %v6810_v26  ;;  %v6884_v17 = vadd.f32 %v6817_v52, %v6816_v20  ;;  %v6765_v33 = vadd.f32 %v10034_v46, %v6552_v4  ;;  %v6771_v13 = vadd.f32 %v10026_v63, %v6641_v48 }
 0x30c   :  { %v6818_v27 = vmax.f32 %v6770_v62, 0.0  ;;  %v6812_v9 = vmax.f32 %v6764_v7, 0.0  ;;  %v6921_v28 = vshrl.u32 %v51_v38, 7  ;;  %v6964_v52 = vadd.s32 4294967280, %v8362_v40 }
 0x30d   :  { %v6813_v43 = vmax.f32 %v6765_v33, 0.0  ;;  %v6819_v10 = vmax.f32 %v6771_v13, 0.0  ;;  %v6645_v19 = vpop.f32.mrb[20].mxu1  ;;  %6873 = vadd.xlane.f32.xlu1 %v6872_v45  ;;  %6876 = vadd.xlane.f32.xlu0 %v6875_v21  ;;  %v6556_v11 = vpop.f32.mrb[22].mxu0 }
 0x30e   :  { %v6772_v32 = vadd.f32 %v10034_v46, %v6645_v19  ;;  %v6766_v22 = vadd.f32 %v10040_v51, %v6556_v11  ;;  %v6558_v25 = vpop.f32.mrb[23].mxu0  ;;  %v6647_v44 = vpop.f32.mrb[21].mxu1  ;;  %v10098_v60 = vsub.s32 %v6957_v36, %v6921_v28  ;;  %v6924_v21 = vadd.s32 1, %v6921_v28 }
 0x30f   :  { %v6878_v30 = vadd.f32 %v6813_v43, %v6812_v9  ;;  %v6887_v59 = vadd.f32 %v6819_v10, %v6818_v27  ;;  %v6767_v31 = vadd.f32 %v10040_v51, %v6558_v25  ;;  %v6773_v63 = vadd.f32 %v10034_v46, %v6647_v44  ;;  %v7176_v46 = vld [vmem:[%s10192_s5] sm:$0xff] }
 0x310   :  { %v6820_v54 = vmax.f32 %v6772_v32, 0.0  ;;  %v6814_v50 = vmax.f32 %v6766_v22, 0.0  ;;  %v10103_v13 = vsub.s32 %v6964_v52, %v6921_v28  ;;  %v10105_v38 = vsub.s32 %v6971_v37, %v6921_v28 }
 0x311   :  { %v6815_v6 = vmax.f32 %v6767_v31, 0.0  ;;  %v6821_v35 = vmax.f32 %v6773_v63, 0.0  ;;  %v6651_v24 = vpop.f32.mrb[22].mxu1  ;;  %6885 = vadd.xlane.f32.xlu1 %v6884_v17  ;;  %6888 = vadd.xlane.f32.xlu0 %v6887_v59  ;;  %v10101_v17 = vsub.s32 %v8362_v40, %v6921_v28  ;;  %v6922_v32 = vmul.u32 3, %v6921_v28 }
 0x312   :  { %v6774_v47 = vadd.f32 %v10040_v51, %v6651_v24  ;;  %v6653_v16 = vpop.f32.mrb[23].mxu1  ;;  %v6925_v22 = vmul.u32 3, %v6924_v21 }
 0x313   :  { %v6881_v58 = vadd.f32 %v6815_v6, %v6814_v50  ;;  %v6890_v0 = vadd.f32 %v6821_v35, %v6820_v54  ;;  %v6775_v3 = vadd.f32 %v10040_v51, %v6653_v16  ;;  %v7177_v51 = vld [vmem:[%s10192_s5 + $0x8] sm:$0xff]  ;;  %vm10115_vm10 = vcmp.ge.s32.totalorder %v8362_v40, %v6922_v32 }
 0x314   :  { %v6822_v34 = vmax.f32 %v6774_v47, 0.0  ;;  %v7631_v42 = vpack.c.bf16 %v7177_v51, %v7176_v46  ;;  %vm10120_vm11 = vcmp.lt.s32.totalorder %v8362_v40, %v6925_v22 }
 0x315   :  { %v6823_v18 = vmax.f32 %v6775_v3, 0.0  ;;  %6879 = vadd.xlane.f32.xlu0 %v6878_v30  ;;  %6882 = vadd.xlane.f32.xlu1 %v6881_v58  ;;  %vm6927_vm0 = vmand %vm10115_vm10, %vm10120_vm11 }
 0x316   :  { %7632 = vmatpush3.bf16.msra.mxu1 %v7631_v42 }
 0x317   :  { %v6893_v1 = vadd.f32 %v6823_v18, %v6822_v34  ;;  %7633 = vmatprep.subr.bf16.mxu1 %v8158_v14 }
 0x319   :  { %6891 = vadd.xlane.f32.xlu0 %v6890_v0  ;;  %6894 = vadd.xlane.f32.xlu1 %v6893_v1 }
 0x31a   :  { %7635 = vmatpush3.bf16.msra.mxu1 %v7634_v29 }
 0x376   :  { %v6826_v55 = vpop.xlane.xlu1 %6825 }
 0x377   :  { %v6896_v33 = vmul.f32 0.00390625, %v6826_v55 }
 0x379   :  { %v6956_v25 = vrot.slane %v6896_v33, %v10101_v17 }
 0x37a   :  { %v6838_v39 = vpop.xlane.xlu0 %6837 }
 0x37b   :  { %v6900_v9 = vmul.f32 0.00390625, %v6838_v39 }
 0x37d   :  { %v6981_v31 = vrot.slane %v6900_v9, %v10101_v17 }
 0x37e   :  { %v6841_v56 = vpop.xlane.xlu1 %6840  ;;  %v6829_v8 = vpop.xlane.xlu0 %6828 }
 0x37f   :  { %v6901_v62 = vmul.f32 0.00390625, %v6841_v56  ;;  %v6897_v7 = vmul.f32 0.00390625, %v6829_v8 }
 0x381   :  { %v6985_v43 = vrot.slane %v6901_v62, %v10098_v60  ;;  %v6961_v10 = vrot.slane %v6897_v7, %v10098_v60 }
 0x382   :  { %v6844_v61 = vpop.xlane.xlu1 %6843  ;;  %v6832_v49 = vpop.xlane.xlu0 %6831 }
 0x383   :  { %v6902_v27 = vmul.f32 0.00390625, %v6844_v61  ;;  %v6898_v30 = vmul.f32 0.00390625, %v6832_v49  ;;  %v6986_v16 = vsel %vm6962_vm8, %v6985_v43, %v6981_v31  ;;  %v6963_v58 = vsel %vm6962_vm8, %v6961_v10, %v6956_v25 }
 0x385   :  { %v6990_v44 = vrot.slane %v6902_v27, %v10103_v13  ;;  %v6968_v12 = vrot.slane %v6898_v30, %v10103_v13 }
 0x386   :  { %v6847_v23 = vpop.xlane.xlu1 %6846  ;;  %v6835_v41 = vpop.xlane.xlu0 %6834 }
 0x387   :  { %v6903_v63 = vmul.f32 0.00390625, %v6847_v23  ;;  %v6899_v6 = vmul.f32 0.00390625, %v6835_v41  ;;  %v6991_v51 = vsel %vm6969_vm1, %v6990_v44, %v6986_v16  ;;  %v6970_v28 = vsel %vm6969_vm1, %v6968_v12, %v6963_v58  ;;  %v7604_v16 = vld [vmem:[%s10191_s4] ss:$0 sm:$0xff] }
 0x389   :  { %v6995_v15 = vrot.slane %v6903_v63, %v10105_v38  ;;  %v6975_v40 = vrot.slane %v6899_v6, %v10105_v38 }
 0x38a   :  { %v6862_v53 = vpop.xlane.xlu1 %6861  ;;  %v6850_v5 = vpop.xlane.xlu0 %6849 }
 0x38b   :  { %v6908_v35 = vmul.f32 0.00390625, %v6862_v53  ;;  %v6904_v24 = vmul.f32 0.00390625, %v6850_v5  ;;  %v6996_v7 = vsel %vm6976_vm5, %v6995_v15, %v6991_v51  ;;  %v6977_v33 = vsel %vm6976_vm5, %v6975_v40, %v6970_v28 }
 0x38c   :  { %v7074_v30 = vsel %vm7073_vm6, %v6996_v7, %v6977_v33 }
 0x38d   :  { %v7019_v56 = vrot.slane %v6908_v35, %v10101_v17  ;;  %v7000_v8 = vrot.slane %v6904_v24, %v10101_v17  ;;  %v7603_v24 = vld [vmem:[%s10190_s3] ss:$0 sm:$0xff]  ;;  %s8116_s3 = scalar_lea.vmem %s7270_s15, 32 }
 0x38e   :  { %v6865_v45 = vpop.xlane.xlu0 %6864  ;;  %v6853_v57 = vpop.xlane.xlu1 %6852  ;;  %p8117_p0 = scmp.ne.s32.totalorder %s7270_s15, %s8116_s3  ;;  %p8122_p2 = scmp.lt.s32.totalorder %s8116_s3, %s8116_s3 }
 0x38f   :  { %v6905_v59 = vmul.f32 0.00390625, %v6853_v57  ;;  %v6909_v54 = vmul.f32 0.00390625, %v6865_v45 }
 0x390   :  { %p8123_p3 = por %p8122_p2, %p8121_p1 }
 0x391   :  { %v7004_v14 = vrot.slane %v6905_v59, %v10098_v60  ;;  %v7023_v29 = vrot.slane %v6909_v54, %v10098_v60 }
 0x392   :  { %v6856_v20 = vpop.xlane.xlu0 %6855  ;;  %v6859_v26 = vpop.xlane.xlu1 %6858  ;;  %p8124_p4 = pnand %p8123_p3, %p8117_p0 }
 0x393   :  { %v6906_v50 = vmul.f32 0.00390625, %v6856_v20  ;;  %v6907_v42 = vmul.f32 0.00390625, %v6859_v26  ;;  %v7005_v57 = vsel %vm6962_vm8, %v7004_v14, %v7000_v8  ;;  %v7024_v52 = vsel %vm6962_vm8, %v7023_v29, %v7019_v56 }
 0x395   :  { %v7009_v55 = vrot.slane %v6906_v50, %v10103_v13  ;;  %v7014_v36 = vrot.slane %v6907_v42, %v10105_v38 }
 0x396   :  { %v6868_v4 = vpop.xlane.xlu0 %6867  ;;  %v6871_v48 = vpop.xlane.xlu1 %6870 }
 0x397   :  { %v6910_v47 = vmul.f32 0.00390625, %v6868_v4  ;;  %v6911_v39 = vmul.f32 0.00390625, %v6871_v48  ;;  %v7010_v37 = vsel %vm6969_vm1, %v7009_v55, %v7005_v57 }
 0x399   :  { %v7028_v61 = vrot.slane %v6910_v47, %v10103_v13  ;;  %v7033_v62 = vrot.slane %v6911_v39, %v10105_v38 }
 0x39a   :  { %v6874_v19 = vpop.xlane.xlu1 %6873  ;;  %v6877_v11 = vpop.xlane.xlu0 %6876 }
 0x39b   :  { %v6912_v0 = vmul.f32 0.00390625, %v6874_v19  ;;  %v6913_v3 = vmul.f32 0.00390625, %v6877_v11  ;;  %v7029_v4 = vsel %vm6969_vm1, %v7028_v61, %v7024_v52  ;;  %v7015_v11 = vsel %vm6976_vm5, %v7014_v36, %v7010_v37 }
 0x39c   :  { %v7034_v44 = vsel %vm6976_vm5, %v7033_v62, %v7029_v4  ;;  %v7076_v31 = vsel %vm7075_vm13, %v7015_v11, %v7074_v30 }
 0x39d   :  { %v7038_v49 = vrot.slane %v6912_v0, %v10101_v17  ;;  %v7042_v23 = vrot.slane %v6913_v3, %v10098_v60  ;;  %v7078_v54 = vsel %vm7077_vm9, %v7034_v44, %v7076_v31 }
 0x39e   :  { %v6886_v34 = vpop.xlane.xlu1 %6885  ;;  %v6889_v18 = vpop.xlane.xlu0 %6888 }
 0x39f   :  { %v6916_v41 = vmul.f32 0.00390625, %v6886_v34  ;;  %v6917_v53 = vmul.f32 0.00390625, %v6889_v18  ;;  %v7043_v27 = vsel %vm6962_vm8, %v7042_v23, %v7038_v49 }
 0x3a1   :  { %v7057_v9 = vrot.slane %v6916_v41, %v10101_v17  ;;  %v7061_v43 = vrot.slane %v6917_v53, %v10098_v60 }
 0x3a2   :  { %v6880_v5 = vpop.xlane.xlu0 %6879  ;;  %v6883_v45 = vpop.xlane.xlu1 %6882 }
 0x3a3   :  { %v6914_v20 = vmul.f32 0.00390625, %v6880_v5  ;;  %v6915_v26 = vmul.f32 0.00390625, %v6883_v45  ;;  %v7062_v63 = vsel %vm6962_vm8, %v7061_v43, %v7057_v9 }
 0x3a5   :  { %v7047_v48 = vrot.slane %v6914_v20, %v10103_v13  ;;  %v7052_v21 = vrot.slane %v6915_v26, %v10105_v38 }
 0x3a6   :  { %v6892_v10 = vpop.xlane.xlu0 %6891  ;;  %v6895_v19 = vpop.xlane.xlu1 %6894 }
 0x3a7   :  { %v7048_v32 = vsel %vm6969_vm1, %v7047_v48, %v7043_v27  ;;  %v6918_v22 = vmul.f32 0.00390625, %v6892_v10  ;;  %v6919_v25 = vmul.f32 0.00390625, %v6895_v19 }
 0x3a8   :  { %v7053_v59 = vsel %vm6976_vm5, %v7052_v21, %v7048_v32 }
 0x3a9   :  { %v7066_v17 = vrot.slane %v6918_v22, %v10103_v13  ;;  %v7071_v60 = vrot.slane %v6919_v25, %v10105_v38  ;;  %v7080_v35 = vsel %vm7079_vm15, %v7053_v59, %v7078_v54  ;;  %v6928_v13 = vsel %vm6927_vm0, 0.33333334, %v8140_v2  ;;  %v7605_v2 = vld [vmem:[%s10193_s6] ss:$0 sm:$0xff] }
 0x3ab   :  { %v7067_v50 = vsel %vm6969_vm1, %v7066_v17, %v7062_v63 }
 0x3ac   :  { %v7072_v6 = vsel %vm6976_vm5, %v7071_v60, %v7067_v50 }
 0x3ad   :  { %v7082_v38 = vsel %vm7081_vm2, %v7072_v6, %v7080_v35 }
 0x3ae   :  { %7615 = vmatpush3.msk.msra.mxu0 %vm7087_vm12, %v7082_v38 }
 0x3af   :  { %7617 = vmatmul.mubr.msk.f32.vlgmr.msra.gmra.mrb[24].mxu0 %vm7083_vm3, %v6928_v13 }
 0x482   :  { %v7156_v47 = vpop.f32.mrb[24].mxu0 }
 0x483   :  { %v7167_v58 = vmul.f32 %v7603_v24, %v7156_v47  ;;  %v7618_v0 = vpop.f32.mrb[25].mxu0 }
 0x485   :  { %v7175_v3 = vadd.f32 %v7604_v16, %v7167_v58 }
 0x487   :  { %7628 = vmatmul.mubr.msk.f32.vlgmr.msra.gmra.mrb[24].mxu1 %vm7187_vm4, %v7175_v3 }
 0x55a   :  { %v7257_v34 = vpop.f32.mrb[24].mxu1 }
 0x55b   :  { %v7258_v18 = vadd.f32 %v7605_v2, %v7257_v34  ;;  %v7629_v1 = vpop.f32.mrb[25].mxu1 }
 0x55d   :  { %7262 = vst.msk [vmem:[#allocation3] sm:$0x3] %vm7261_vm14, %v7258_v18 }
 0x55e   :  { %8127 = shalt.err (!%p8124_p4)
}
 0x55f   :  { %s8128_s16 = scalar_lea.hbm %s10194_s7, 32 }
 0x560   :  { %p8129_p5 = scmp.ne.s32.totalorder %s10194_s7, %s8128_s16  ;;  %p8132_p6 = scmp.lt.u32.totalorder %s8128_s16, %s10194_s7 }
 0x562   :  { %p8134_p7 = pnand %p8132_p6, %p8129_p5 }
 0x564   :  { %8137 = shalt.err (!%p8134_p7)
}
 0x565   :  { %7272 = dma.vmem_to_hbm [thread:$0]  %s7270_s15, 32, %s10194_s7, [#allocation4]  }
 0x566   :  { %8138 = dma.done.wait [#allocation4], 32  }
 0x567   :  { %8139 = vsyncadd [#allocation4], 4294967264 }
 0x568   :  { %7276 = vsyncpa [#allocation4], 1 }

</bundles_post_ra>
